<compile_context>
chip_gen: v5e
topology: v5e:2x2
jax: 0.10.0
libtpu: 0.0.40
codegen_flags: <defaults>
</compile_context>

<pallas_src>
from functools import partial

import jax
import jax.numpy as jnp
from jax.experimental import pallas as pl
from jax.experimental.pallas import tpu as pltpu

_P2 = pltpu.CompilerParams(dimension_semantics=("parallel", "parallel"))
_PTAIL = pltpu.CompilerParams(dimension_semantics=("parallel",),
                              vmem_limit_bytes=32 * 1024 * 1024)


# ----------------------------------------------------------------------------- helpers
def _gelu(y):  # exact (erf) GELU, PyTorch nn.GELU default
    return 0.5 * y * (1.0 + jax.lax.erf(y * (2.0 ** -0.5)))


def _leaky(y):  # LeakyReLU(0.1): the FM module uses slope=0.1
    return jnp.where(y >= 0, y, 0.1 * y)


def _dot(a, b):
    return jnp.dot(a, b, preferred_element_type=jnp.float32)


def _spatial_tile(hw):
    # whole image per grid step when it fits a ~1 MB block; else largest 128-multiple
    if hw <= 32768:
        return hw
    for t in (32768, 16384, 8192, 4096, 2048, 1024, 512, 256, 128):
        if hw % t == 0:
            return t
    return hw


def _interior_mask(h, w):
    ii = jnp.arange(h + 2)
    jj = jnp.arange(w + 2)
    m = ((ii >= 1) & (ii <= h))[:, None] & ((jj >= 1) & (jj <= w))[None, :]
    return m.astype(jnp.float32).reshape(1, (h + 2) * (w + 2))


# ----------------------------------------------------------------------------- kernels
def eag_front_kernel(g_ref, s_ref, gw_ref, gb_ref, xw_ref, xb_ref,
                     pw_ref, pb_ref, fw_ref, fb_ref, psi_ref, xf_ref):
    # g/s: (1, C, T); weights (Cout, Cin); biases (Cout, 1)
    g = g_ref[0]
    s = s_ref[0]
    gp = _gelu(_dot(gw_ref[...], g) + gb_ref[...])
    xp = _gelu(_dot(xw_ref[...], s) + xb_ref[...])
    t = jax.nn.sigmoid(_dot(pw_ref[...], gp + xp) + pb_ref[...])
    psi_ref[0] = t.astype(psi_ref.dtype)                       # FM input / residual
    xf_ref[0] = (_dot(fw_ref[...], t) + fb_ref[...]).astype(xf_ref.dtype)  # FM.fpre


def fm_freq_kernel(re_ref, im_ref, pha_ref,
                   w1a_ref, b1a_ref, w1b_ref, b1b_ref,
                   w2a_ref, b2a_ref, w2b_ref, b2b_ref, ro_ref, io_ref):
    # mag computed in-kernel from re/im (EUP sqrt); process1/process2 fused;
    # re' = mag'*cos(pha'), im' = mag'*sin(pha') emitted directly.
    re = re_ref[0]
    im = im_ref[0]
    mag = jnp.sqrt(re * re + im * im)
    m = _leaky(_dot(w1a_ref[...], mag) + b1a_ref[...])
    m = _dot(w1b_ref[...], m) + b1b_ref[...]
    p = _leaky(_dot(w2a_ref[...], pha_ref[0]) + b2a_ref[...])
    p = _dot(w2b_ref[...], p) + b2b_ref[...]
    ro_ref[0] = (m * jnp.cos(p)).astype(ro_ref.dtype)
    io_ref[0] = (m * jnp.sin(p)).astype(io_ref.dtype)


def _conv3x3(src_ref, dst_ref, w9, bias, mask, *, f, w2, halo, chunk,
             relu=False, residual=False):
    # 3x3 same-padding conv on the zero-ringed extended flat-halo layout.
    # src/dst: (C, FE) VMEM scratch refs; w9: (9, Cout, Cin) value; bias: (Cout, 1);
    # mask: (1, f) interior mask (re-zeros the padding ring so convs chain in VMEM).
    cout = bias.shape[0]
    for c0 in range(0, f, chunk):
        cl = min(chunk, f - c0)
        acc = jnp.zeros((cout, cl), jnp.float32)
        for k in range(9):                     # taps back-to-back: MRB accum on v7x
            dy, dx = divmod(k, 3)
            acc = acc + _dot(w9[k], src_ref[:, pl.ds(dy * w2 + dx + c0, cl)])
        acc = acc + bias
        if relu:
            acc = jnp.maximum(acc, 0.0)
        if residual:                           # fused "+ x" epilogue (centre window)
            acc = acc + src_ref[:, pl.ds(halo + c0, cl)]
        dst_ref[:, pl.ds(halo + c0, cl)] = acc * mask[:, c0:c0 + cl]


def tail_kernel(xo_ref, psi_ref, skip_ref,
                catw_ref, catb_ref,
                fusw_ref, fusb_ref,
                c1w_ref, c1b_ref,
                c2w_ref, c2b_ref,
                ca1wt_ref, ca1bt_ref,
                ca2w_ref, ca2b_ref,
                pa1w_ref, pa1b_ref,
                pa2w_ref, pa2b_ref,
                mask_ref,
                out_ref,
                buf0, buf1, buf2,
                *, c, h, w, hw, f, w2, halo, fe, chunk):
    # One kernel per batch element: FM.cat + FM residual + EAG gate, fusion 3x3,
    # CP block (conv1+ReLU+res, conv2, CALayer, PALayer, final residual).
    mask = mask_ref[...]                                   # (1, f)
    zeros = jnp.zeros((c, fe), jnp.float32)
    buf0[...] = zeros
    buf1[...] = zeros
    buf2[...] = zeros

    # --- EAG gate prologue: attn = FM.cat(x_out) + FM_input ; eag = skip*attn + skip
    attn = _dot(catw_ref[...], xo_ref[0]) + catb_ref[...] + psi_ref[0]
    s = skip_ref[0]
    eag = s * attn + s                                     # (C, HW) f32

    # --- scatter into the zero-ringed flat-halo layout (row stride W+2)
    # TODO(synk): for production H use a fori_loop / row-blocked store and a 128-aligned
    # row stride so the 9 tap windows become vreg-aligned (or pltpu.roll for dx).
    for rr in range(h):
        buf0[:, pl.ds(halo + (rr + 1) * w2 + 1, w)] = eag[:, rr * w:(rr + 1) * w]

    # --- conv chain, all intermediates VMEM-resident
    _conv3x3(buf0, buf1, fusw_ref[...], fusb_ref[...], mask,
             f=f, w2=w2, halo=halo, chunk=chunk)                       # y
    _conv3x3(buf1, buf2, c1w_ref[...], c1b_ref[...], mask,
             f=f, w2=w2, halo=halo, chunk=chunk, relu=True, residual=True)  # res1
    _conv3x3(buf2, buf0, c2w_ref[...], c2b_ref[...], mask,
             f=f, w2=w2, halo=halo, chunk=chunk)                       # res2 (reuse buf0)

    res2 = buf0[:, pl.ds(halo, f)]                         # (C, f), ring already zero
    y_in = buf1[:, pl.ds(halo, f)]                         # (C, f)

    # --- CALayer: GAP (ring is zero so sum over f == sum over HW) + squeeze MLP
    gap = jnp.sum(res2, axis=1, keepdims=True) * (1.0 / float(hw))     # (C, 1)
    z = jnp.maximum(jnp.sum(ca1wt_ref[...] * gap, axis=0, keepdims=True)
                    + ca1bt_ref[...], 0.0)                              # (1, r)
    ca = jax.nn.sigmoid(jnp.sum(ca2w_ref[...] * z, axis=1, keepdims=True)
                        + ca2b_ref[...])                                # (C, 1)
    res = res2 * ca

    # --- PALayer: conv1x1 -> ReLU -> conv1x1 -> sigmoid, per-pixel gate
    hh = jnp.maximum(_dot(pa1w_ref[...], res) + pa1b_ref[...], 0.0)     # (r, f)
    pa = jax.nn.sigmoid(_dot(pa2w_ref[...], hh) + pa2b_ref[...])        # (1, f)

    final = res * pa + y_in                                             # (C, f)

    # --- extract the interior back to the dense (C, HW) output layout
    for rr in range(h):
        out_ref[0, :, pl.ds(rr * w, w)] = (
            final[:, (rr + 1) * w2 + 1:(rr + 1) * w2 + 1 + w].astype(out_ref.dtype))


# ----------------------------------------------------------------------------- wrappers
def eag_front(g, s, e):
    n, c, hw = g.shape
    fi = e["g_w"].shape[0]
    ts = _spatial_tile(hw)
    aspec = pl.BlockSpec((1, c, ts), lambda i, j: (i, 0, j))

    def bc(shape):
        return pl.BlockSpec(shape, lambda i, j: (0,) * len(shape))

    out = jax.ShapeDtypeStruct((n, c, hw), g.dtype)
    return pl.pallas_call(
        eag_front_kernel,
        out_shape=(out, out),
        grid=(n, hw // ts),
        in_specs=[aspec, aspec,
                  bc((fi, c)), bc((fi, 1)), bc((fi, c)), bc((fi, 1)),
                  bc((c, fi)), bc((c, 1)), bc((c, c)), bc((c, 1))],
        out_specs=(aspec, aspec),
        compiler_params=_P2,
    )(g, s, e["g_w"], e["g_b"], e["x_w"], e["x_b"],
      e["psi_w"], e["psi_b"], e["fm"]["fpre_w"], e["fm"]["fpre_b"])


def fm_freq(re, im, pha, fm):
    n, c, hwf = re.shape
    ts = _spatial_tile(hwf)
    aspec = pl.BlockSpec((1, c, ts), lambda i, j: (i, 0, j))

    def bc(shape):
        return pl.BlockSpec(shape, lambda i, j: (0,) * len(shape))

    out = jax.ShapeDtypeStruct((n, c, hwf), re.dtype)
    return pl.pallas_call(
        fm_freq_kernel,
        out_shape=(out, out),
        grid=(n, hwf // ts),
        in_specs=[aspec, aspec, aspec,
                  bc((c, c)), bc((c, 1)), bc((c, c)), bc((c, 1)),
                  bc((c, c)), bc((c, 1)), bc((c, c)), bc((c, 1))],
        out_specs=(aspec, aspec),
        compiler_params=_P2,
    )(re, im, pha, fm["p1a_w"], fm["p1a_b"], fm["p1b_w"], fm["p1b_b"],
      fm["p2a_w"], fm["p2a_b"], fm["p2b_w"], fm["p2b_b"])


def fused_tail(x_out, psi_pre, skip, params, h, w):
    # TODO(synk): for production image sizes the per-batch whole-image VMEM residency
    # (3 x C*(H+2)*(W+2)*4B scratch) needs a haloed row-block grid axis (also gives v7x
    # a spatial 'parallel' axis when N is small); fine up to ~512x512 at C=8.
    n, c, hw = x_out.shape
    w2 = w + 2
    halo = w2 + 1
    f = (h + 2) * w2
    fe = f + 2 * halo
    chunk = min(f, 2048)
    mask = _interior_mask(h, w)

    fmp = params["eag"]["fm"]
    cp = params["cp"]
    r = cp["pa1_w"].shape[0]

    aspec = pl.BlockSpec((1, c, hw), lambda i: (i, 0, 0))

    def bc(shape):
        return pl.BlockSpec(shape, lambda i: (0,) * len(shape))

    kern = partial(tail_kernel, c=c, h=h, w=w, hw=hw, f=f, w2=w2, halo=halo,
                   fe=fe, chunk=chunk)
    return pl.pallas_call(
        kern,
        out_shape=jax.ShapeDtypeStruct((n, c, hw), x_out.dtype),
        grid=(n,),
        in_specs=[aspec, aspec, aspec,
                  bc((c, c)), bc((c, 1)),            # FM.cat
                  bc((9, c, c)), bc((c, 1)),         # fusion 3x3
                  bc((9, c, c)), bc((c, 1)),         # CP conv1 3x3
                  bc((9, c, c)), bc((c, 1)),         # CP conv2 3x3
                  bc((c, r)), bc((1, r)),            # CALayer squeeze (transposed)
                  bc((c, r)), bc((c, 1)),            # CALayer expand
                  bc((r, c)), bc((r, 1)),            # PALayer conv1
                  bc((1, r)), bc((1, 1)),            # PALayer conv2
                  bc((1, f))],                       # interior mask
        out_specs=aspec,
        scratch_shapes=[pltpu.VMEM((c, fe), jnp.float32)] * 3,
        compiler_params=_PTAIL,
    )(x_out, psi_pre, skip,
      fmp["cat_w"], fmp["cat_b"],
      params["fus_w"], params["fus_b"],
      cp["c1_w"], cp["c1_b"],
      cp["c2_w"], cp["c2_b"],
      cp["ca1_w"].T, cp["ca1_b"].T,
      cp["ca2_w"], cp["ca2_b"],
      cp["pa1_w"], cp["pa1_b"],
      cp["pa2_w"], cp["pa2_b"],
      mask)


# ----------------------------------------------------------------------------- model
@jax.jit
def spi_attention(x_nchw, skip_nchw, params):
    """SPI_Attention.forward(x, skip) with is_bottom=False. NCHW in / NCHW out."""
    n, c, h, w = x_nchw.shape
    hw = h * w
    g = x_nchw.reshape(n, c, hw)
    s = skip_nchw.reshape(n, c, hw)
    e = params["eag"]
    fmp = e["fm"]

    # TODO(synk): F.interpolate(bilinear, align_corners=True) branch omitted — x and
    # skip spatial sizes match here.
    # --- Enhanced_EAG front + FM.fpre (one kernel) ------------------------------------
    psi_pre, xf = eag_front(g, s, e)

    # TODO(synk): FFT has no Pallas equivalent; rfft2/irfft2 (and angle/atan2, which has
    # no guaranteed Mosaic lowering) stay in XLA; abs / cos / sin are fused in-kernel.
    wf = w // 2 + 1
    x_freq = jnp.fft.rfft2(xf.reshape(n, c, h, w), axes=(2, 3))
    re = jnp.real(x_freq).reshape(n, c, h * wf)
    im = jnp.imag(x_freq).reshape(n, c, h * wf)
    pha = jnp.angle(x_freq).reshape(n, c, h * wf)
    ro, io = fm_freq(re, im, pha, fmp)
    x_out = jnp.fft.irfft2(
        jax.lax.complex(ro, io).reshape(n, c, h, wf),
        s=(h, w), axes=(2, 3)).astype(x_nchw.dtype).reshape(n, c, hw)

    # --- fused tail: FM.cat + FM residual + EAG gate + fusion conv + CP block ---------
    # TODO(synk): CP_Attention_block is not defined in the reference snippet; the
    # canonical FFA-Net block (conv-relu-(+x)-conv, CALayer, PALayer, +x) is used.
    out_flat = fused_tail(x_out, psi_pre, s, params, h, w)
    return out_flat.reshape(n, c, h, w)


# ----------------------------------------------------------------------------- params
def init_params(key, c):
    fi = c // 2
    groups = max(1, min(16, fi // 4))     # Enhanced_EAG: valid_groups = min(16, F_int//4)
    r = max(1, c // 8)                    # CALayer / PALayer squeeze width
    keys = iter(jax.random.split(key, 64))

    def w(shape, scale=0.1):
        return jax.random.normal(next(keys), shape, jnp.float32) * scale

    def grouped_dense(cout, cin, g):
        # grouped 1x1 conv expressed as a block-diagonal dense (Cout, Cin) matrix
        blk = w((g, cout // g, cin // g))
        dense = jnp.zeros((cout, cin), jnp.float32)
        co, ci = cout // g, cin // g
        for gi in range(g):
            dense = dense.at[gi * co:(gi + 1) * co, gi * ci:(gi + 1) * ci].set(blk[gi])
        return dense

    eps = 1e-5

    def fold_bn(wm, bv):
        # TODO(synk): eval-mode BN folded with PyTorch-default running stats
        # (mean=0, var=1, affine identity); a trained checkpoint would supply real stats.
        nchan = wm.shape[0]
        scale = jnp.ones((nchan,), jnp.float32) / jnp.sqrt(jnp.ones((nchan,)) + eps)
        return wm * scale[:, None], (bv * scale)[:, None]

    g_w, g_b = fold_bn(grouped_dense(fi, c, groups), w((fi,)))
    x_w, x_b = fold_bn(grouped_dense(fi, c, groups), w((fi,)))
    psi_w, psi_b = fold_bn(w((c, fi)), w((c,)))

    fm = dict(
        fpre_w=w((c, c)), fpre_b=w((c, 1)),
        p1a_w=w((c, c)), p1a_b=w((c, 1)),
        p1b_w=w((c, c)), p1b_b=w((c, 1)),
        p2a_w=w((c, c)), p2a_b=w((c, 1)),
        p2b_w=w((c, c)), p2b_b=w((c, 1)),
        cat_w=w((c, c)), cat_b=w((c, 1)),
    )
    eag = dict(g_w=g_w, g_b=g_b, x_w=x_w, x_b=x_b, psi_w=psi_w, psi_b=psi_b, fm=fm)

    cp = dict(
        c1_w=w((9, c, c)), c1_b=w((c, 1)),       # (9, Cout, Cin): taps dy-major
        c2_w=w((9, c, c)), c2_b=w((c, 1)),
        ca1_w=w((r, c)), ca1_b=w((r, 1)),
        ca2_w=w((c, r)), ca2_b=w((c, 1)),
        pa1_w=w((r, c)), pa1_b=w((r, 1)),
        pa2_w=w((1, r)), pa2_b=w((1, 1)),
    )
    return dict(eag=eag, fus_w=w((9, c, c)), fus_b=w((c, 1)), cp=cp)


# ----------------------------------------------------------------------------- main
if __name__ == "__main__":
    key = jax.random.PRNGKey(0)
    kx, ks, kp = jax.random.split(key, 3)
    N, C, H, W = 2, 8, 16, 16          # C=8 -> F_int=4, valid_groups=1 (smallest legal)
    x = jax.random.normal(kx, (N, C, H, W), jnp.float32)
    skip = jax.random.normal(ks, (N, C, H, W), jnp.float32)
    params = init_params(kp, C)

    out = spi_attention(x, skip, params)
    out = jax.block_until_ready(out)
    assert out.shape == (N, C, H, W)
    assert bool(jnp.all(jnp.isfinite(out)))
    print("KERNEL_OK")
</pallas_src>

<mosaic_0001>
module attributes {stable_mosaic.version = 11 : i64} {
  func.func @eag_front_kernel(%arg0: i32, %arg1: i32, %arg2: memref<1x8x256xf32, #tpu.memory_space<vmem>>, %arg3: memref<1x8x256xf32, #tpu.memory_space<vmem>>, %arg4: memref<4x8xf32, #tpu.memory_space<vmem>>, %arg5: memref<4x1xf32, #tpu.memory_space<vmem>>, %arg6: memref<4x8xf32, #tpu.memory_space<vmem>>, %arg7: memref<4x1xf32, #tpu.memory_space<vmem>>, %arg8: memref<8x4xf32, #tpu.memory_space<vmem>>, %arg9: memref<8x1xf32, #tpu.memory_space<vmem>>, %arg10: memref<8x8xf32, #tpu.memory_space<vmem>>, %arg11: memref<8x1xf32, #tpu.memory_space<vmem>>, %arg12: memref<1x8x256xf32, #tpu.memory_space<vmem>>, %arg13: memref<1x8x256xf32, #tpu.memory_space<vmem>>) attributes {dimension_semantics = [#tpu.dimension_semantics<parallel>, #tpu.dimension_semantics<parallel>], iteration_bounds = array<i64: 2, 1>, scalar_prefetch = 0 : i64, scratch_operands = 0 : i64, tpu.core_type = #tpu.core_type<tc>, window_params = [{transform_indices = @transform_0, window_bounds = array<i64: 1, 8, 256>}, {transform_indices = @transform_1, window_bounds = array<i64: 1, 8, 256>}, {pipeline_mode = #tpu.pipeline_mode<synchronous>, transform_indices = @transform_2, window_bounds = array<i64: 4, 8>}, {pipeline_mode = #tpu.pipeline_mode<synchronous>, transform_indices = @transform_3, window_bounds = array<i64: 4, 1>}, {pipeline_mode = #tpu.pipeline_mode<synchronous>, transform_indices = @transform_4, window_bounds = array<i64: 4, 8>}, {pipeline_mode = #tpu.pipeline_mode<synchronous>, transform_indices = @transform_5, window_bounds = array<i64: 4, 1>}, {pipeline_mode = #tpu.pipeline_mode<synchronous>, transform_indices = @transform_6, window_bounds = array<i64: 8, 4>}, {pipeline_mode = #tpu.pipeline_mode<synchronous>, transform_indices = @transform_7, window_bounds = array<i64: 8, 1>}, {pipeline_mode = #tpu.pipeline_mode<synchronous>, transform_indices = @transform_8, window_bounds = array<i64: 8, 8>}, {pipeline_mode = #tpu.pipeline_mode<synchronous>, transform_indices = @transform_9, window_bounds = array<i64: 8, 1>}, {transform_indices = @transform_10, window_bounds = array<i64: 1, 8, 256>}, {transform_indices = @transform_11, window_bounds = array<i64: 1, 8, 256>}]} {
    %c0 = arith.constant 0 : index
    %c0_0 = arith.constant 0 : index
    %c0_1 = arith.constant 0 : index
    %0 = vector.load %arg2[%c0, %c0_0, %c0_1] : memref<1x8x256xf32, #tpu.memory_space<vmem>>, vector<1x8x256xf32>
    %1 = vector.shape_cast %0 : vector<1x8x256xf32> to vector<8x256xf32>
    %c0_2 = arith.constant 0 : index
    %c0_3 = arith.constant 0 : index
    %c0_4 = arith.constant 0 : index
    %2 = vector.load %arg3[%c0_2, %c0_3, %c0_4] : memref<1x8x256xf32, #tpu.memory_space<vmem>>, vector<1x8x256xf32>
    %3 = vector.shape_cast %2 : vector<1x8x256xf32> to vector<8x256xf32>
    %c0_5 = arith.constant 0 : index
    %c0_6 = arith.constant 0 : index
    %4 = vector.load %arg4[%c0_5, %c0_6] : memref<4x8xf32, #tpu.memory_space<vmem>>, vector<4x8xf32>
    %cst = arith.constant dense<0.000000e+00> : vector<4x256xf32>
    %5 = tpu.matmul %4, %1, %cst {dimension_numbers = #tpu.dot_dimension_numbers<[1], [0], [0], [1], [0, 0, 1, 1], [], []>} : vector<4x8xf32>, vector<8x256xf32>, vector<4x256xf32> -> vector<4x256xf32>
    %c0_7 = arith.constant 0 : index
    %c0_8 = arith.constant 0 : index
    %6 = vector.load %arg5[%c0_7, %c0_8] : memref<4x1xf32, #tpu.memory_space<vmem>>, vector<4x1xf32>
    %7 = vector.broadcast %6 : vector<4x1xf32> to vector<4x256xf32>
    %8 = arith.addf %5, %7 : vector<4x256xf32>
    %cst_9 = arith.constant 5.000000e-01 : f32
    %9 = vector.broadcast %cst_9 : f32 to vector<4x256xf32>
    %10 = arith.mulf %9, %8 : vector<4x256xf32>
    %cst_10 = arith.constant 0.707106769 : f32
    %11 = vector.broadcast %cst_10 : f32 to vector<4x256xf32>
    %12 = arith.mulf %8, %11 : vector<4x256xf32>
    %13 = math.erf %12 : vector<4x256xf32>
    %cst_11 = arith.constant 1.000000e+00 : f32
    %14 = vector.broadcast %cst_11 : f32 to vector<4x256xf32>
    %15 = arith.addf %14, %13 : vector<4x256xf32>
    %16 = arith.mulf %10, %15 : vector<4x256xf32>
    %c0_12 = arith.constant 0 : index
    %c0_13 = arith.constant 0 : index
    %17 = vector.load %arg6[%c0_12, %c0_13] : memref<4x8xf32, #tpu.memory_space<vmem>>, vector<4x8xf32>
    %cst_14 = arith.constant dense<0.000000e+00> : vector<4x256xf32>
    %18 = tpu.matmul %17, %3, %cst_14 {dimension_numbers = #tpu.dot_dimension_numbers<[1], [0], [0], [1], [0, 0, 1, 1], [], []>} : vector<4x8xf32>, vector<8x256xf32>, vector<4x256xf32> -> vector<4x256xf32>
    %c0_15 = arith.constant 0 : index
    %c0_16 = arith.constant 0 : index
    %19 = vector.load %arg7[%c0_15, %c0_16] : memref<4x1xf32, #tpu.memory_space<vmem>>, vector<4x1xf32>
    %20 = vector.broadcast %19 : vector<4x1xf32> to vector<4x256xf32>
    %21 = arith.addf %18, %20 : vector<4x256xf32>
    %cst_17 = arith.constant 5.000000e-01 : f32
    %22 = vector.broadcast %cst_17 : f32 to vector<4x256xf32>
    %23 = arith.mulf %22, %21 : vector<4x256xf32>
    %cst_18 = arith.constant 0.707106769 : f32
    %24 = vector.broadcast %cst_18 : f32 to vector<4x256xf32>
    %25 = arith.mulf %21, %24 : vector<4x256xf32>
    %26 = math.erf %25 : vector<4x256xf32>
    %cst_19 = arith.constant 1.000000e+00 : f32
    %27 = vector.broadcast %cst_19 : f32 to vector<4x256xf32>
    %28 = arith.addf %27, %26 : vector<4x256xf32>
    %29 = arith.mulf %23, %28 : vector<4x256xf32>
    %c0_20 = arith.constant 0 : index
    %c0_21 = arith.constant 0 : index
    %30 = vector.load %arg8[%c0_20, %c0_21] : memref<8x4xf32, #tpu.memory_space<vmem>>, vector<8x4xf32>
    %31 = arith.addf %16, %29 : vector<4x256xf32>
    %cst_22 = arith.constant dense<0.000000e+00> : vector<8x256xf32>
    %32 = tpu.matmul %30, %31, %cst_22 {dimension_numbers = #tpu.dot_dimension_numbers<[1], [0], [0], [1], [0, 0, 1, 1], [], []>} : vector<8x4xf32>, vector<4x256xf32>, vector<8x256xf32> -> vector<8x256xf32>
    %c0_23 = arith.constant 0 : index
    %c0_24 = arith.constant 0 : index
    %33 = vector.load %arg9[%c0_23, %c0_24] : memref<8x1xf32, #tpu.memory_space<vmem>>, vector<8x1xf32>
    %34 = vector.broadcast %33 : vector<8x1xf32> to vector<8x256xf32>
    %35 = arith.addf %32, %34 : vector<8x256xf32>
    %36 = arith.negf %35 : vector<8x256xf32>
    %37 = math.exp %36 : vector<8x256xf32>
    %cst_25 = arith.constant 1.000000e+00 : f32
    %38 = vector.broadcast %cst_25 : f32 to vector<8x256xf32>
    %39 = arith.addf %38, %37 : vector<8x256xf32>
    %40 = arith.divf %38, %39 : vector<8x256xf32>
    %c0_26 = arith.constant 0 : index
    %c0_27 = arith.constant 0 : index
    %c0_28 = arith.constant 0 : index
    %41 = vector.load %arg12[%c0_26, %c0_27, %c0_28] : memref<1x8x256xf32, #tpu.memory_space<vmem>>, vector<1x8x256xf32>
    %42 = vector.shape_cast %41 : vector<1x8x256xf32> to vector<8x256xf32>
    %43 = vector.shape_cast %40 : vector<8x256xf32> to vector<1x8x256xf32>
    tpu.vector_store %arg12[%c0_26, %c0_27, %c0_28], %43 {strides = array<i32>} : memref<1x8x256xf32, #tpu.memory_space<vmem>>, vector<1x8x256xf32>,
    %c0_29 = arith.constant 0 : index
    %c0_30 = arith.constant 0 : index
    %44 = vector.load %arg10[%c0_29, %c0_30] : memref<8x8xf32, #tpu.memory_space<vmem>>, vector<8x8xf32>
    %cst_31 = arith.constant dense<0.000000e+00> : vector<8x256xf32>
    %45 = tpu.matmul %44, %40, %cst_31 {dimension_numbers = #tpu.dot_dimension_numbers<[1], [0], [0], [1], [0, 0, 1, 1], [], []>} : vector<8x8xf32>, vector<8x256xf32>, vector<8x256xf32> -> vector<8x256xf32>
    %c0_32 = arith.constant 0 : index
    %c0_33 = arith.constant 0 : index
    %46 = vector.load %arg11[%c0_32, %c0_33] : memref<8x1xf32, #tpu.memory_space<vmem>>, vector<8x1xf32>
    %47 = vector.broadcast %46 : vector<8x1xf32> to vector<8x256xf32>
    %48 = arith.addf %45, %47 : vector<8x256xf32>
    %c0_34 = arith.constant 0 : index
    %c0_35 = arith.constant 0 : index
    %c0_36 = arith.constant 0 : index
    %49 = vector.load %arg13[%c0_34, %c0_35, %c0_36] : memref<1x8x256xf32, #tpu.memory_space<vmem>>, vector<1x8x256xf32>
    %50 = vector.shape_cast %49 : vector<1x8x256xf32> to vector<8x256xf32>
    %51 = vector.shape_cast %48 : vector<8x256xf32> to vector<1x8x256xf32>
    tpu.vector_store %arg13[%c0_34, %c0_35, %c0_36], %51 {strides = array<i32>} : memref<1x8x256xf32, #tpu.memory_space<vmem>>, vector<1x8x256xf32>,
    return
  }
  func.func @transform_0(%arg0: i32, %arg1: i32) -> (i32, i32, i32) {
    %c0_i32 = arith.constant 0 : i32
    %c0_i32_0 = arith.constant 0 : i32
    return %arg0, %c0_i32, %arg1 : i32, i32, i32
  }
  func.func @transform_1(%arg0: i32, %arg1: i32) -> (i32, i32, i32) {
    %c0_i32 = arith.constant 0 : i32
    %c0_i32_0 = arith.constant 0 : i32
    return %arg0, %c0_i32, %arg1 : i32, i32, i32
  }
  func.func @transform_2(%arg0: i32, %arg1: i32) -> (i32, i32) {
    %c0_i32 = arith.constant 0 : i32
    %c0_i32_0 = arith.constant 0 : i32
    %c0_i32_1 = arith.constant 0 : i32
    return %c0_i32, %c0_i32_0 : i32, i32
  }
  func.func @transform_3(%arg0: i32, %arg1: i32) -> (i32, i32) {
    %c0_i32 = arith.constant 0 : i32
    %c0_i32_0 = arith.constant 0 : i32
    %c0_i32_1 = arith.constant 0 : i32
    return %c0_i32, %c0_i32_0 : i32, i32
  }
  func.func @transform_4(%arg0: i32, %arg1: i32) -> (i32, i32) {
    %c0_i32 = arith.constant 0 : i32
    %c0_i32_0 = arith.constant 0 : i32
    %c0_i32_1 = arith.constant 0 : i32
    return %c0_i32, %c0_i32_0 : i32, i32
  }
  func.func @transform_5(%arg0: i32, %arg1: i32) -> (i32, i32) {
    %c0_i32 = arith.constant 0 : i32
    %c0_i32_0 = arith.constant 0 : i32
    %c0_i32_1 = arith.constant 0 : i32
    return %c0_i32, %c0_i32_0 : i32, i32
  }
  func.func @transform_6(%arg0: i32, %arg1: i32) -> (i32, i32) {
    %c0_i32 = arith.constant 0 : i32
    %c0_i32_0 = arith.constant 0 : i32
    %c0_i32_1 = arith.constant 0 : i32
    return %c0_i32, %c0_i32_0 : i32, i32
  }
  func.func @transform_7(%arg0: i32, %arg1: i32) -> (i32, i32) {
    %c0_i32 = arith.constant 0 : i32
    %c0_i32_0 = arith.constant 0 : i32
    %c0_i32_1 = arith.constant 0 : i32
    return %c0_i32, %c0_i32_0 : i32, i32
  }
  func.func @transform_8(%arg0: i32, %arg1: i32) -> (i32, i32) {
    %c0_i32 = arith.constant 0 : i32
    %c0_i32_0 = arith.constant 0 : i32
    %c0_i32_1 = arith.constant 0 : i32
    return %c0_i32, %c0_i32_0 : i32, i32
  }
  func.func @transform_9(%arg0: i32, %arg1: i32) -> (i32, i32) {
    %c0_i32 = arith.constant 0 : i32
    %c0_i32_0 = arith.constant 0 : i32
    %c0_i32_1 = arith.constant 0 : i32
    return %c0_i32, %c0_i32_0 : i32, i32
  }
  func.func @transform_10(%arg0: i32, %arg1: i32) -> (i32, i32, i32) {
    %c0_i32 = arith.constant 0 : i32
    %c0_i32_0 = arith.constant 0 : i32
    return %arg0, %c0_i32, %arg1 : i32, i32, i32
  }
  func.func @transform_11(%arg0: i32, %arg1: i32) -> (i32, i32, i32) {
    %c0_i32 = arith.constant 0 : i32
    %c0_i32_0 = arith.constant 0 : i32
    return %arg0, %c0_i32, %arg1 : i32, i32, i32
  }
}

module attributes {stable_mosaic.version = 11 : i64} {
  func.func @fm_freq_kernel(%arg0: i32, %arg1: i32, %arg2: memref<1x8x144xf32, #tpu.memory_space<vmem>>, %arg3: memref<1x8x144xf32, #tpu.memory_space<vmem>>, %arg4: memref<1x8x144xf32, #tpu.memory_space<vmem>>, %arg5: memref<8x8xf32, #tpu.memory_space<vmem>>, %arg6: memref<8x1xf32, #tpu.memory_space<vmem>>, %arg7: memref<8x8xf32, #tpu.memory_space<vmem>>, %arg8: memref<8x1xf32, #tpu.memory_space<vmem>>, %arg9: memref<8x8xf32, #tpu.memory_space<vmem>>, %arg10: memref<8x1xf32, #tpu.memory_space<vmem>>, %arg11: memref<8x8xf32, #tpu.memory_space<vmem>>, %arg12: memref<8x1xf32, #tpu.memory_space<vmem>>, %arg13: memref<1x8x144xf32, #tpu.memory_space<vmem>>, %arg14: memref<1x8x144xf32, #tpu.memory_space<vmem>>) attributes {dimension_semantics = [#tpu.dimension_semantics<parallel>, #tpu.dimension_semantics<parallel>], iteration_bounds = array<i64: 2, 1>, scalar_prefetch = 0 : i64, scratch_operands = 0 : i64, tpu.core_type = #tpu.core_type<tc>, window_params = [{transform_indices = @transform_0, window_bounds = array<i64: 1, 8, 144>}, {transform_indices = @transform_1, window_bounds = array<i64: 1, 8, 144>}, {transform_indices = @transform_2, window_bounds = array<i64: 1, 8, 144>}, {pipeline_mode = #tpu.pipeline_mode<synchronous>, transform_indices = @transform_3, window_bounds = array<i64: 8, 8>}, {pipeline_mode = #tpu.pipeline_mode<synchronous>, transform_indices = @transform_4, window_bounds = array<i64: 8, 1>}, {pipeline_mode = #tpu.pipeline_mode<synchronous>, transform_indices = @transform_5, window_bounds = array<i64: 8, 8>}, {pipeline_mode = #tpu.pipeline_mode<synchronous>, transform_indices = @transform_6, window_bounds = array<i64: 8, 1>}, {pipeline_mode = #tpu.pipeline_mode<synchronous>, transform_indices = @transform_7, window_bounds = array<i64: 8, 8>}, {pipeline_mode = #tpu.pipeline_mode<synchronous>, transform_indices = @transform_8, window_bounds = array<i64: 8, 1>}, {pipeline_mode = #tpu.pipeline_mode<synchronous>, transform_indices = @transform_9, window_bounds = array<i64: 8, 8>}, {pipeline_mode = #tpu.pipeline_mode<synchronous>, transform_indices = @transform_10, window_bounds = array<i64: 8, 1>}, {transform_indices = @transform_11, window_bounds = array<i64: 1, 8, 144>}, {transform_indices = @transform_12, window_bounds = array<i64: 1, 8, 144>}]} {
    %c0 = arith.constant 0 : index
    %c0_0 = arith.constant 0 : index
    %c0_1 = arith.constant 0 : index
    %0 = vector.load %arg2[%c0, %c0_0, %c0_1] : memref<1x8x144xf32, #tpu.memory_space<vmem>>, vector<1x8x144xf32>
    %1 = vector.shape_cast %0 : vector<1x8x144xf32> to vector<8x144xf32>
    %c0_2 = arith.constant 0 : index
    %c0_3 = arith.constant 0 : index
    %c0_4 = arith.constant 0 : index
    %2 = vector.load %arg3[%c0_2, %c0_3, %c0_4] : memref<1x8x144xf32, #tpu.memory_space<vmem>>, vector<1x8x144xf32>
    %3 = vector.shape_cast %2 : vector<1x8x144xf32> to vector<8x144xf32>
    %4 = arith.mulf %1, %1 : vector<8x144xf32>
    %5 = arith.mulf %3, %3 : vector<8x144xf32>
    %6 = arith.addf %4, %5 : vector<8x144xf32>
    %7 = math.sqrt %6 : vector<8x144xf32>
    %c0_5 = arith.constant 0 : index
    %c0_6 = arith.constant 0 : index
    %8 = vector.load %arg5[%c0_5, %c0_6] : memref<8x8xf32, #tpu.memory_space<vmem>>, vector<8x8xf32>
    %cst = arith.constant dense<0.000000e+00> : vector<8x144xf32>
    %9 = tpu.matmul %8, %7, %cst {dimension_numbers = #tpu.dot_dimension_numbers<[1], [0], [0], [1], [0, 0, 1, 1], [], []>} : vector<8x8xf32>, vector<8x144xf32>, vector<8x144xf32> -> vector<8x144xf32>
    %c0_7 = arith.constant 0 : index
    %c0_8 = arith.constant 0 : index
    %10 = vector.load %arg6[%c0_7, %c0_8] : memref<8x1xf32, #tpu.memory_space<vmem>>, vector<8x1xf32>
    %11 = vector.broadcast %10 : vector<8x1xf32> to vector<8x144xf32>
    %12 = arith.addf %9, %11 : vector<8x144xf32>
    %cst_9 = arith.constant 0.000000e+00 : f32
    %13 = vector.broadcast %cst_9 : f32 to vector<8x144xf32>
    %14 = arith.cmpf oge, %12, %13 : vector<8x144xf32>
    %cst_10 = arith.constant 1.000000e-01 : f32
    %15 = vector.broadcast %cst_10 : f32 to vector<8x144xf32>
    %16 = arith.mulf %15, %12 : vector<8x144xf32>
    %17 = arith.select %14, %12, %16 : vector<8x144xi1>, vector<8x144xf32>
    %c0_11 = arith.constant 0 : index
    %c0_12 = arith.constant 0 : index
    %18 = vector.load %arg7[%c0_11, %c0_12] : memref<8x8xf32, #tpu.memory_space<vmem>>, vector<8x8xf32>
    %cst_13 = arith.constant dense<0.000000e+00> : vector<8x144xf32>
    %19 = tpu.matmul %18, %17, %cst_13 {dimension_numbers = #tpu.dot_dimension_numbers<[1], [0], [0], [1], [0, 0, 1, 1], [], []>} : vector<8x8xf32>, vector<8x144xf32>, vector<8x144xf32> -> vector<8x144xf32>
    %c0_14 = arith.constant 0 : index
    %c0_15 = arith.constant 0 : index
    %20 = vector.load %arg8[%c0_14, %c0_15] : memref<8x1xf32, #tpu.memory_space<vmem>>, vector<8x1xf32>
    %21 = vector.broadcast %20 : vector<8x1xf32> to vector<8x144xf32>
    %22 = arith.addf %19, %21 : vector<8x144xf32>
    %c0_16 = arith.constant 0 : index
    %c0_17 = arith.constant 0 : index
    %23 = vector.load %arg9[%c0_16, %c0_17] : memref<8x8xf32, #tpu.memory_space<vmem>>, vector<8x8xf32>
    %c0_18 = arith.constant 0 : index
    %c0_19 = arith.constant 0 : index
    %c0_20 = arith.constant 0 : index
    %24 = vector.load %arg4[%c0_18, %c0_19, %c0_20] : memref<1x8x144xf32, #tpu.memory_space<vmem>>, vector<1x8x144xf32>
    %25 = vector.shape_cast %24 : vector<1x8x144xf32> to vector<8x144xf32>
    %cst_21 = arith.constant dense<0.000000e+00> : vector<8x144xf32>
    %26 = tpu.matmul %23, %25, %cst_21 {dimension_numbers = #tpu.dot_dimension_numbers<[1], [0], [0], [1], [0, 0, 1, 1], [], []>} : vector<8x8xf32>, vector<8x144xf32>, vector<8x144xf32> -> vector<8x144xf32>
    %c0_22 = arith.constant 0 : index
    %c0_23 = arith.constant 0 : index
    %27 = vector.load %arg10[%c0_22, %c0_23] : memref<8x1xf32, #tpu.memory_space<vmem>>, vector<8x1xf32>
    %28 = vector.broadcast %27 : vector<8x1xf32> to vector<8x144xf32>
    %29 = arith.addf %26, %28 : vector<8x144xf32>
    %cst_24 = arith.constant 0.000000e+00 : f32
    %30 = vector.broadcast %cst_24 : f32 to vector<8x144xf32>
    %31 = arith.cmpf oge, %29, %30 : vector<8x144xf32>
    %cst_25 = arith.constant 1.000000e-01 : f32
    %32 = vector.broadcast %cst_25 : f32 to vector<8x144xf32>
    %33 = arith.mulf %32, %29 : vector<8x144xf32>
    %34 = arith.select %31, %29, %33 : vector<8x144xi1>, vector<8x144xf32>
    %c0_26 = arith.constant 0 : index
    %c0_27 = arith.constant 0 : index
    %35 = vector.load %arg11[%c0_26, %c0_27] : memref<8x8xf32, #tpu.memory_space<vmem>>, vector<8x8xf32>
    %cst_28 = arith.constant dense<0.000000e+00> : vector<8x144xf32>
    %36 = tpu.matmul %35, %34, %cst_28 {dimension_numbers = #tpu.dot_dimension_numbers<[1], [0], [0], [1], [0, 0, 1, 1], [], []>} : vector<8x8xf32>, vector<8x144xf32>, vector<8x144xf32> -> vector<8x144xf32>
    %c0_29 = arith.constant 0 : index
    %c0_30 = arith.constant 0 : index
    %37 = vector.load %arg12[%c0_29, %c0_30] : memref<8x1xf32, #tpu.memory_space<vmem>>, vector<8x1xf32>
    %38 = vector.broadcast %37 : vector<8x1xf32> to vector<8x144xf32>
    %39 = arith.addf %36, %38 : vector<8x144xf32>
    %40 = math.cos %39 : vector<8x144xf32>
    %41 = arith.mulf %22, %40 : vector<8x144xf32>
    %c0_31 = arith.constant 0 : index
    %c0_32 = arith.constant 0 : index
    %c0_33 = arith.constant 0 : index
    %42 = vector.load %arg13[%c0_31, %c0_32, %c0_33] : memref<1x8x144xf32, #tpu.memory_space<vmem>>, vector<1x8x144xf32>
    %43 = vector.shape_cast %42 : vector<1x8x144xf32> to vector<8x144xf32>
    %44 = vector.shape_cast %41 : vector<8x144xf32> to vector<1x8x144xf32>
    tpu.vector_store %arg13[%c0_31, %c0_32, %c0_33], %44 {strides = array<i32>} : memref<1x8x144xf32, #tpu.memory_space<vmem>>, vector<1x8x144xf32>,
    %45 = math.sin %39 : vector<8x144xf32>
    %46 = arith.mulf %22, %45 : vector<8x144xf32>
    %c0_34 = arith.constant 0 : index
    %c0_35 = arith.constant 0 : index
    %c0_36 = arith.constant 0 : index
    %47 = vector.load %arg14[%c0_34, %c0_35, %c0_36] : memref<1x8x144xf32, #tpu.memory_space<vmem>>, vector<1x8x144xf32>
    %48 = vector.shape_cast %47 : vector<1x8x144xf32> to vector<8x144xf32>
    %49 = vector.shape_cast %46 : vector<8x144xf32> to vector<1x8x144xf32>
    tpu.vector_store %arg14[%c0_34, %c0_35, %c0_36], %49 {strides = array<i32>} : memref<1x8x144xf32, #tpu.memory_space<vmem>>, vector<1x8x144xf32>,
    return
  }
  func.func @transform_0(%arg0: i32, %arg1: i32) -> (i32, i32, i32) {
    %c0_i32 = arith.constant 0 : i32
    %c0_i32_0 = arith.constant 0 : i32
    return %arg0, %c0_i32, %arg1 : i32, i32, i32
  }
  func.func @transform_1(%arg0: i32, %arg1: i32) -> (i32, i32, i32) {
    %c0_i32 = arith.constant 0 : i32
    %c0_i32_0 = arith.constant 0 : i32
    return %arg0, %c0_i32, %arg1 : i32, i32, i32
  }
  func.func @transform_2(%arg0: i32, %arg1: i32) -> (i32, i32, i32) {
    %c0_i32 = arith.constant 0 : i32
    %c0_i32_0 = arith.constant 0 : i32
    return %arg0, %c0_i32, %arg1 : i32, i32, i32
  }
  func.func @transform_3(%arg0: i32, %arg1: i32) -> (i32, i32) {
    %c0_i32 = arith.constant 0 : i32
    %c0_i32_0 = arith.constant 0 : i32
    %c0_i32_1 = arith.constant 0 : i32
    return %c0_i32, %c0_i32_0 : i32, i32
  }
  func.func @transform_4(%arg0: i32, %arg1: i32) -> (i32, i32) {
    %c0_i32 = arith.constant 0 : i32
    %c0_i32_0 = arith.constant 0 : i32
    %c0_i32_1 = arith.constant 0 : i32
    return %c0_i32, %c0_i32_0 : i32, i32
  }
  func.func @transform_5(%arg0: i32, %arg1: i32) -> (i32, i32) {
    %c0_i32 = arith.constant 0 : i32
    %c0_i32_0 = arith.constant 0 : i32
    %c0_i32_1 = arith.constant 0 : i32
    return %c0_i32, %c0_i32_0 : i32, i32
  }
  func.func @transform_6(%arg0: i32, %arg1: i32) -> (i32, i32) {
    %c0_i32 = arith.constant 0 : i32
    %c0_i32_0 = arith.constant 0 : i32
    %c0_i32_1 = arith.constant 0 : i32
    return %c0_i32, %c0_i32_0 : i32, i32
  }
  func.func @transform_7(%arg0: i32, %arg1: i32) -> (i32, i32) {
    %c0_i32 = arith.constant 0 : i32
    %c0_i32_0 = arith.constant 0 : i32
    %c0_i32_1 = arith.constant 0 : i32
    return %c0_i32, %c0_i32_0 : i32, i32
  }
  func.func @transform_8(%arg0: i32, %arg1: i32) -> (i32, i32) {
    %c0_i32 = arith.constant 0 : i32
    %c0_i32_0 = arith.constant 0 : i32
    %c0_i32_1 = arith.constant 0 : i32
    return %c0_i32, %c0_i32_0 : i32, i32
  }
  func.func @transform_9(%arg0: i32, %arg1: i32) -> (i32, i32) {
    %c0_i32 = arith.constant 0 : i32
    %c0_i32_0 = arith.constant 0 : i32
    %c0_i32_1 = arith.constant 0 : i32
    return %c0_i32, %c0_i32_0 : i32, i32
  }
  func.func @transform_10(%arg0: i32, %arg1: i32) -> (i32, i32) {
    %c0_i32 = arith.constant 0 : i32
    %c0_i32_0 = arith.constant 0 : i32
    %c0_i32_1 = arith.constant 0 : i32
    return %c0_i32, %c0_i32_0 : i32, i32
  }
  func.func @transform_11(%arg0: i32, %arg1: i32) -> (i32, i32, i32) {
    %c0_i32 = arith.constant 0 : i32
    %c0_i32_0 = arith.constant 0 : i32
    return %arg0, %c0_i32, %arg1 : i32, i32, i32
  }
  func.func @transform_12(%arg0: i32, %arg1: i32) -> (i32, i32, i32) {
    %c0_i32 = arith.constant 0 : i32
    %c0_i32_0 = arith.constant 0 : i32
    return %arg0, %c0_i32, %arg1 : i32, i32, i32
  }
}

module attributes {stable_mosaic.version = 11 : i64} {
  func.func @tail_kernel(%arg0: i32, %arg1: memref<1x8x256xf32, #tpu.memory_space<vmem>>, %arg2: memref<1x8x256xf32, #tpu.memory_space<vmem>>, %arg3: memref<1x8x256xf32, #tpu.memory_space<vmem>>, %arg4: memref<8x8xf32, #tpu.memory_space<vmem>>, %arg5: memref<8x1xf32, #tpu.memory_space<vmem>>, %arg6: memref<9x8x8xf32, #tpu.memory_space<vmem>>, %arg7: memref<8x1xf32, #tpu.memory_space<vmem>>, %arg8: memref<9x8x8xf32, #tpu.memory_space<vmem>>, %arg9: memref<8x1xf32, #tpu.memory_space<vmem>>, %arg10: memref<9x8x8xf32, #tpu.memory_space<vmem>>, %arg11: memref<8x1xf32, #tpu.memory_space<vmem>>, %arg12: memref<8x1xf32, #tpu.memory_space<vmem>>, %arg13: memref<1x1xf32, #tpu.memory_space<vmem>>, %arg14: memref<8x1xf32, #tpu.memory_space<vmem>>, %arg15: memref<8x1xf32, #tpu.memory_space<vmem>>, %arg16: memref<1x8xf32, #tpu.memory_space<vmem>>, %arg17: memref<1x1xf32, #tpu.memory_space<vmem>>, %arg18: memref<1x1xf32, #tpu.memory_space<vmem>>, %arg19: memref<1x1xf32, #tpu.memory_space<vmem>>, %arg20: memref<1x324xf32, #tpu.memory_space<vmem>>, %arg21: memref<1x8x256xf32, #tpu.memory_space<vmem>>, %arg22: memref<8x362xf32, #tpu.memory_space<vmem>>, %arg23: memref<8x362xf32, #tpu.memory_space<vmem>>, %arg24: memref<8x362xf32, #tpu.memory_space<vmem>>) attributes {dimension_semantics = [#tpu.dimension_semantics<parallel>], iteration_bounds = array<i64: 2>, scalar_prefetch = 0 : i64, scratch_operands = 3 : i64, tpu.core_type = #tpu.core_type<tc>, window_params = [{transform_indices = @transform_0, window_bounds = array<i64: 1, 8, 256>}, {transform_indices = @transform_1, window_bounds = array<i64: 1, 8, 256>}, {transform_indices = @transform_2, window_bounds = array<i64: 1, 8, 256>}, {pipeline_mode = #tpu.pipeline_mode<synchronous>, transform_indices = @transform_3, window_bounds = array<i64: 8, 8>}, {pipeline_mode = #tpu.pipeline_mode<synchronous>, transform_indices = @transform_4, window_bounds = array<i64: 8, 1>}, {pipeline_mode = #tpu.pipeline_mode<synchronous>, transform_indices = @transform_5, window_bounds = array<i64: 9, 8, 8>}, {pipeline_mode = #tpu.pipeline_mode<synchronous>, transform_indices = @transform_6, window_bounds = array<i64: 8, 1>}, {pipeline_mode = #tpu.pipeline_mode<synchronous>, transform_indices = @transform_7, window_bounds = array<i64: 9, 8, 8>}, {pipeline_mode = #tpu.pipeline_mode<synchronous>, transform_indices = @transform_8, window_bounds = array<i64: 8, 1>}, {pipeline_mode = #tpu.pipeline_mode<synchronous>, transform_indices = @transform_9, window_bounds = array<i64: 9, 8, 8>}, {pipeline_mode = #tpu.pipeline_mode<synchronous>, transform_indices = @transform_10, window_bounds = array<i64: 8, 1>}, {pipeline_mode = #tpu.pipeline_mode<synchronous>, transform_indices = @transform_11, window_bounds = array<i64: 8, 1>}, {pipeline_mode = #tpu.pipeline_mode<synchronous>, transform_indices = @transform_12, window_bounds = array<i64: 1, 1>}, {pipeline_mode = #tpu.pipeline_mode<synchronous>, transform_indices = @transform_13, window_bounds = array<i64: 8, 1>}, {pipeline_mode = #tpu.pipeline_mode<synchronous>, transform_indices = @transform_14, window_bounds = array<i64: 8, 1>}, {pipeline_mode = #tpu.pipeline_mode<synchronous>, transform_indices = @transform_15, window_bounds = array<i64: 1, 8>}, {pipeline_mode = #tpu.pipeline_mode<synchronous>, transform_indices = @transform_16, window_bounds = array<i64: 1, 1>}, {pipeline_mode = #tpu.pipeline_mode<synchronous>, transform_indices = @transform_17, window_bounds = array<i64: 1, 1>}, {pipeline_mode = #tpu.pipeline_mode<synchronous>, transform_indices = @transform_18, window_bounds = array<i64: 1, 1>}, {pipeline_mode = #tpu.pipeline_mode<synchronous>, transform_indices = @transform_19, window_bounds = array<i64: 1, 324>}, {transform_indices = @transform_20, window_bounds = array<i64: 1, 8, 256>}]} {
    %c0 = arith.constant 0 : index
    %c0_0 = arith.constant 0 : index
    %0 = vector.load %arg20[%c0, %c0_0] : memref<1x324xf32, #tpu.memory_space<vmem>>, vector<1x324xf32>
    %cst = arith.constant 0.000000e+00 : f32
    %1 = vector.broadcast %cst : f32 to vector<8x362xf32>
    %c0_1 = arith.constant 0 : index
    %c0_2 = arith.constant 0 : index
    %2 = vector.load %arg22[%c0_1, %c0_2] : memref<8x362xf32, #tpu.memory_space<vmem>>, vector<8x362xf32>
    tpu.vector_store %arg22[%c0_1, %c0_2], %1 {strides = array<i32>} : memref<8x362xf32, #tpu.memory_space<vmem>>, vector<8x362xf32>,
    %c0_3 = arith.constant 0 : index
    %c0_4 = arith.constant 0 : index
    %3 = vector.load %arg23[%c0_3, %c0_4] : memref<8x362xf32, #tpu.memory_space<vmem>>, vector<8x362xf32>
    tpu.vector_store %arg23[%c0_3, %c0_4], %1 {strides = array<i32>} : memref<8x362xf32, #tpu.memory_space<vmem>>, vector<8x362xf32>,
    %c0_5 = arith.constant 0 : index
    %c0_6 = arith.constant 0 : index
    %4 = vector.load %arg24[%c0_5, %c0_6] : memref<8x362xf32, #tpu.memory_space<vmem>>, vector<8x362xf32>
    tpu.vector_store %arg24[%c0_5, %c0_6], %1 {strides = array<i32>} : memref<8x362xf32, #tpu.memory_space<vmem>>, vector<8x362xf32>,
    %c0_7 = arith.constant 0 : index
    %c0_8 = arith.constant 0 : index
    %5 = vector.load %arg4[%c0_7, %c0_8] : memref<8x8xf32, #tpu.memory_space<vmem>>, vector<8x8xf32>
    %c0_9 = arith.constant 0 : index
    %c0_10 = arith.constant 0 : index
    %c0_11 = arith.constant 0 : index
    %6 = vector.load %arg1[%c0_9, %c0_10, %c0_11] : memref<1x8x256xf32, #tpu.memory_space<vmem>>, vector<1x8x256xf32>
    %7 = vector.shape_cast %6 : vector<1x8x256xf32> to vector<8x256xf32>
    %cst_12 = arith.constant dense<0.000000e+00> : vector<8x256xf32>
    %8 = tpu.matmul %5, %7, %cst_12 {dimension_numbers = #tpu.dot_dimension_numbers<[1], [0], [0], [1], [0, 0, 1, 1], [], []>} : vector<8x8xf32>, vector<8x256xf32>, vector<8x256xf32> -> vector<8x256xf32>
    %c0_13 = arith.constant 0 : index
    %c0_14 = arith.constant 0 : index
    %9 = vector.load %arg5[%c0_13, %c0_14] : memref<8x1xf32, #tpu.memory_space<vmem>>, vector<8x1xf32>
    %10 = vector.broadcast %9 : vector<8x1xf32> to vector<8x256xf32>
    %11 = arith.addf %8, %10 : vector<8x256xf32>
    %c0_15 = arith.constant 0 : index
    %c0_16 = arith.constant 0 : index
    %c0_17 = arith.constant 0 : index
    %12 = vector.load %arg2[%c0_15, %c0_16, %c0_17] : memref<1x8x256xf32, #tpu.memory_space<vmem>>, vector<1x8x256xf32>
    %13 = vector.shape_cast %12 : vector<1x8x256xf32> to vector<8x256xf32>
    %14 = arith.addf %11, %13 : vector<8x256xf32>
    %c0_18 = arith.constant 0 : index
    %c0_19 = arith.constant 0 : index
    %c0_20 = arith.constant 0 : index
    %15 = vector.load %arg3[%c0_18, %c0_19, %c0_20] : memref<1x8x256xf32, #tpu.memory_space<vmem>>, vector<1x8x256xf32>
    %16 = vector.shape_cast %15 : vector<1x8x256xf32> to vector<8x256xf32>
    %17 = arith.mulf %16, %14 : vector<8x256xf32>
    %18 = arith.addf %17, %16 : vector<8x256xf32>
    %19 = vector.extract_strided_slice %18 {offsets = [0, 0], sizes = [8, 16], strides = [1, 1]} : vector<8x256xf32> to vector<8x16xf32>
    %c0_21 = arith.constant 0 : index
    %c38 = arith.constant 38 : index
    %20 = vector.load %arg22[%c0_21, %c38] : memref<8x362xf32, #tpu.memory_space<vmem>>, vector<8x16xf32>
    tpu.vector_store %arg22[%c0_21, %c38], %19 {strides = array<i32>} : memref<8x362xf32, #tpu.memory_space<vmem>>, vector<8x16xf32>,
    %21 = vector.extract_strided_slice %18 {offsets = [0, 16], sizes = [8, 16], strides = [1, 1]} : vector<8x256xf32> to vector<8x16xf32>
    %c0_22 = arith.constant 0 : index
    %c56 = arith.constant 56 : index
    %22 = vector.load %arg22[%c0_22, %c56] : memref<8x362xf32, #tpu.memory_space<vmem>>, vector<8x16xf32>
    tpu.vector_store %arg22[%c0_22, %c56], %21 {strides = array<i32>} : memref<8x362xf32, #tpu.memory_space<vmem>>, vector<8x16xf32>,
    %23 = vector.extract_strided_slice %18 {offsets = [0, 32], sizes = [8, 16], strides = [1, 1]} : vector<8x256xf32> to vector<8x16xf32>
    %c0_23 = arith.constant 0 : index
    %c74 = arith.constant 74 : index
    %24 = vector.load %arg22[%c0_23, %c74] : memref<8x362xf32, #tpu.memory_space<vmem>>, vector<8x16xf32>
    tpu.vector_store %arg22[%c0_23, %c74], %23 {strides = array<i32>} : memref<8x362xf32, #tpu.memory_space<vmem>>, vector<8x16xf32>,
    %25 = vector.extract_strided_slice %18 {offsets = [0, 48], sizes = [8, 16], strides = [1, 1]} : vector<8x256xf32> to vector<8x16xf32>
    %c0_24 = arith.constant 0 : index
    %c92 = arith.constant 92 : index
    %26 = vector.load %arg22[%c0_24, %c92] : memref<8x362xf32, #tpu.memory_space<vmem>>, vector<8x16xf32>
    tpu.vector_store %arg22[%c0_24, %c92], %25 {strides = array<i32>} : memref<8x362xf32, #tpu.memory_space<vmem>>, vector<8x16xf32>,
    %27 = vector.extract_strided_slice %18 {offsets = [0, 64], sizes = [8, 16], strides = [1, 1]} : vector<8x256xf32> to vector<8x16xf32>
    %c0_25 = arith.constant 0 : index
    %c110 = arith.constant 110 : index
    %28 = vector.load %arg22[%c0_25, %c110] : memref<8x362xf32, #tpu.memory_space<vmem>>, vector<8x16xf32>
    tpu.vector_store %arg22[%c0_25, %c110], %27 {strides = array<i32>} : memref<8x362xf32, #tpu.memory_space<vmem>>, vector<8x16xf32>,
    %29 = vector.extract_strided_slice %18 {offsets = [0, 80], sizes = [8, 16], strides = [1, 1]} : vector<8x256xf32> to vector<8x16xf32>
    %c0_26 = arith.constant 0 : index
    %c128 = arith.constant 128 : index
    %30 = vector.load %arg22[%c0_26, %c128] : memref<8x362xf32, #tpu.memory_space<vmem>>, vector<8x16xf32>
    tpu.vector_store %arg22[%c0_26, %c128], %29 {strides = array<i32>} : memref<8x362xf32, #tpu.memory_space<vmem>>, vector<8x16xf32>,
    %31 = vector.extract_strided_slice %18 {offsets = [0, 96], sizes = [8, 16], strides = [1, 1]} : vector<8x256xf32> to vector<8x16xf32>
    %c0_27 = arith.constant 0 : index
    %c146 = arith.constant 146 : index
    %32 = vector.load %arg22[%c0_27, %c146] : memref<8x362xf32, #tpu.memory_space<vmem>>, vector<8x16xf32>
    tpu.vector_store %arg22[%c0_27, %c146], %31 {strides = array<i32>} : memref<8x362xf32, #tpu.memory_space<vmem>>, vector<8x16xf32>,
    %33 = vector.extract_strided_slice %18 {offsets = [0, 112], sizes = [8, 16], strides = [1, 1]} : vector<8x256xf32> to vector<8x16xf32>
    %c0_28 = arith.constant 0 : index
    %c164 = arith.constant 164 : index
    %34 = vector.load %arg22[%c0_28, %c164] : memref<8x362xf32, #tpu.memory_space<vmem>>, vector<8x16xf32>
    tpu.vector_store %arg22[%c0_28, %c164], %33 {strides = array<i32>} : memref<8x362xf32, #tpu.memory_space<vmem>>, vector<8x16xf32>,
    %35 = vector.extract_strided_slice %18 {offsets = [0, 128], sizes = [8, 16], strides = [1, 1]} : vector<8x256xf32> to vector<8x16xf32>
    %c0_29 = arith.constant 0 : index
    %c182 = arith.constant 182 : index
    %36 = vector.load %arg22[%c0_29, %c182] : memref<8x362xf32, #tpu.memory_space<vmem>>, vector<8x16xf32>
    tpu.vector_store %arg22[%c0_29, %c182], %35 {strides = array<i32>} : memref<8x362xf32, #tpu.memory_space<vmem>>, vector<8x16xf32>,
    %37 = vector.extract_strided_slice %18 {offsets = [0, 144], sizes = [8, 16], strides = [1, 1]} : vector<8x256xf32> to vector<8x16xf32>
    %c0_30 = arith.constant 0 : index
    %c200 = arith.constant 200 : index
    %38 = vector.load %arg22[%c0_30, %c200] : memref<8x362xf32, #tpu.memory_space<vmem>>, vector<8x16xf32>
    tpu.vector_store %arg22[%c0_30, %c200], %37 {strides = array<i32>} : memref<8x362xf32, #tpu.memory_space<vmem>>, vector<8x16xf32>,
    %39 = vector.extract_strided_slice %18 {offsets = [0, 160], sizes = [8, 16], strides = [1, 1]} : vector<8x256xf32> to vector<8x16xf32>
    %c0_31 = arith.constant 0 : index
    %c218 = arith.constant 218 : index
    %40 = vector.load %arg22[%c0_31, %c218] : memref<8x362xf32, #tpu.memory_space<vmem>>, vector<8x16xf32>
    tpu.vector_store %arg22[%c0_31, %c218], %39 {strides = array<i32>} : memref<8x362xf32, #tpu.memory_space<vmem>>, vector<8x16xf32>,
    %41 = vector.extract_strided_slice %18 {offsets = [0, 176], sizes = [8, 16], strides = [1, 1]} : vector<8x256xf32> to vector<8x16xf32>
    %c0_32 = arith.constant 0 : index
    %c236 = arith.constant 236 : index
    %42 = vector.load %arg22[%c0_32, %c236] : memref<8x362xf32, #tpu.memory_space<vmem>>, vector<8x16xf32>
    tpu.vector_store %arg22[%c0_32, %c236], %41 {strides = array<i32>} : memref<8x362xf32, #tpu.memory_space<vmem>>, vector<8x16xf32>,
    %43 = vector.extract_strided_slice %18 {offsets = [0, 192], sizes = [8, 16], strides = [1, 1]} : vector<8x256xf32> to vector<8x16xf32>
    %c0_33 = arith.constant 0 : index
    %c254 = arith.constant 254 : index
    %44 = vector.load %arg22[%c0_33, %c254] : memref<8x362xf32, #tpu.memory_space<vmem>>, vector<8x16xf32>
    tpu.vector_store %arg22[%c0_33, %c254], %43 {strides = array<i32>} : memref<8x362xf32, #tpu.memory_space<vmem>>, vector<8x16xf32>,
    %45 = vector.extract_strided_slice %18 {offsets = [0, 208], sizes = [8, 16], strides = [1, 1]} : vector<8x256xf32> to vector<8x16xf32>
    %c0_34 = arith.constant 0 : index
    %c272 = arith.constant 272 : index
    %46 = vector.load %arg22[%c0_34, %c272] : memref<8x362xf32, #tpu.memory_space<vmem>>, vector<8x16xf32>
    tpu.vector_store %arg22[%c0_34, %c272], %45 {strides = array<i32>} : memref<8x362xf32, #tpu.memory_space<vmem>>, vector<8x16xf32>,
    %47 = vector.extract_strided_slice %18 {offsets = [0, 224], sizes = [8, 16], strides = [1, 1]} : vector<8x256xf32> to vector<8x16xf32>
    %c0_35 = arith.constant 0 : index
    %c290 = arith.constant 290 : index
    %48 = vector.load %arg22[%c0_35, %c290] : memref<8x362xf32, #tpu.memory_space<vmem>>, vector<8x16xf32>
    tpu.vector_store %arg22[%c0_35, %c290], %47 {strides = array<i32>} : memref<8x362xf32, #tpu.memory_space<vmem>>, vector<8x16xf32>,
    %49 = vector.extract_strided_slice %18 {offsets = [0, 240], sizes = [8, 16], strides = [1, 1]} : vector<8x256xf32> to vector<8x16xf32>
    %c0_36 = arith.constant 0 : index
    %c308 = arith.constant 308 : index
    %50 = vector.load %arg22[%c0_36, %c308] : memref<8x362xf32, #tpu.memory_space<vmem>>, vector<8x16xf32>
    tpu.vector_store %arg22[%c0_36, %c308], %49 {strides = array<i32>} : memref<8x362xf32, #tpu.memory_space<vmem>>, vector<8x16xf32>,
    %c0_37 = arith.constant 0 : index
    %c0_38 = arith.constant 0 : index
    %c0_39 = arith.constant 0 : index
    %51 = vector.load %arg6[%c0_37, %c0_38, %c0_39] : memref<9x8x8xf32, #tpu.memory_space<vmem>>, vector<9x8x8xf32>
    %c0_40 = arith.constant 0 : index
    %c0_41 = arith.constant 0 : index
    %52 = vector.load %arg7[%c0_40, %c0_41] : memref<8x1xf32, #tpu.memory_space<vmem>>, vector<8x1xf32>
    %cst_42 = arith.constant 0.000000e+00 : f32
    %53 = vector.broadcast %cst_42 : f32 to vector<8x324xf32>
    %54 = vector.extract_strided_slice %51 {offsets = [0, 0, 0], sizes = [1, 8, 8], strides = [1, 1, 1]} : vector<9x8x8xf32> to vector<1x8x8xf32>
    %55 = vector.shape_cast %54 : vector<1x8x8xf32> to vector<8x8xf32>
    %c0_43 = arith.constant 0 : index
    %c0_44 = arith.constant 0 : index
    %56 = vector.load %arg22[%c0_43, %c0_44] : memref<8x362xf32, #tpu.memory_space<vmem>>, vector<8x324xf32>
    %cst_45 = arith.constant dense<0.000000e+00> : vector<8x324xf32>
    %57 = tpu.matmul %55, %56, %cst_45 {dimension_numbers = #tpu.dot_dimension_numbers<[1], [0], [0], [1], [0, 0, 1, 1], [], []>} : vector<8x8xf32>, vector<8x324xf32>, vector<8x324xf32> -> vector<8x324xf32>
    %58 = arith.addf %53, %57 : vector<8x324xf32>
    %59 = vector.extract_strided_slice %51 {offsets = [1, 0, 0], sizes = [1, 8, 8], strides = [1, 1, 1]} : vector<9x8x8xf32> to vector<1x8x8xf32>
    %60 = vector.shape_cast %59 : vector<1x8x8xf32> to vector<8x8xf32>
    %c0_46 = arith.constant 0 : index
    %c1 = arith.constant 1 : index
    %61 = vector.load %arg22[%c0_46, %c1] : memref<8x362xf32, #tpu.memory_space<vmem>>, vector<8x324xf32>
    %cst_47 = arith.constant dense<0.000000e+00> : vector<8x324xf32>
    %62 = tpu.matmul %60, %61, %cst_47 {dimension_numbers = #tpu.dot_dimension_numbers<[1], [0], [0], [1], [0, 0, 1, 1], [], []>} : vector<8x8xf32>, vector<8x324xf32>, vector<8x324xf32> -> vector<8x324xf32>
    %63 = arith.addf %58, %62 : vector<8x324xf32>
    %64 = vector.extract_strided_slice %51 {offsets = [2, 0, 0], sizes = [1, 8, 8], strides = [1, 1, 1]} : vector<9x8x8xf32> to vector<1x8x8xf32>
    %65 = vector.shape_cast %64 : vector<1x8x8xf32> to vector<8x8xf32>
    %c0_48 = arith.constant 0 : index
    %c2 = arith.constant 2 : index
    %66 = vector.load %arg22[%c0_48, %c2] : memref<8x362xf32, #tpu.memory_space<vmem>>, vector<8x324xf32>
    %cst_49 = arith.constant dense<0.000000e+00> : vector<8x324xf32>
    %67 = tpu.matmul %65, %66, %cst_49 {dimension_numbers = #tpu.dot_dimension_numbers<[1], [0], [0], [1], [0, 0, 1, 1], [], []>} : vector<8x8xf32>, vector<8x324xf32>, vector<8x324xf32> -> vector<8x324xf32>
    %68 = arith.addf %63, %67 : vector<8x324xf32>
    %69 = vector.extract_strided_slice %51 {offsets = [3, 0, 0], sizes = [1, 8, 8], strides = [1, 1, 1]} : vector<9x8x8xf32> to vector<1x8x8xf32>
    %70 = vector.shape_cast %69 : vector<1x8x8xf32> to vector<8x8xf32>
    %c0_50 = arith.constant 0 : index
    %c18 = arith.constant 18 : index
    %71 = vector.load %arg22[%c0_50, %c18] : memref<8x362xf32, #tpu.memory_space<vmem>>, vector<8x324xf32>
    %cst_51 = arith.constant dense<0.000000e+00> : vector<8x324xf32>
    %72 = tpu.matmul %70, %71, %cst_51 {dimension_numbers = #tpu.dot_dimension_numbers<[1], [0], [0], [1], [0, 0, 1, 1], [], []>} : vector<8x8xf32>, vector<8x324xf32>, vector<8x324xf32> -> vector<8x324xf32>
    %73 = arith.addf %68, %72 : vector<8x324xf32>
    %74 = vector.extract_strided_slice %51 {offsets = [4, 0, 0], sizes = [1, 8, 8], strides = [1, 1, 1]} : vector<9x8x8xf32> to vector<1x8x8xf32>
    %75 = vector.shape_cast %74 : vector<1x8x8xf32> to vector<8x8xf32>
    %c0_52 = arith.constant 0 : index
    %c19 = arith.constant 19 : index
    %76 = vector.load %arg22[%c0_52, %c19] : memref<8x362xf32, #tpu.memory_space<vmem>>, vector<8x324xf32>
    %cst_53 = arith.constant dense<0.000000e+00> : vector<8x324xf32>
    %77 = tpu.matmul %75, %76, %cst_53 {dimension_numbers = #tpu.dot_dimension_numbers<[1], [0], [0], [1], [0, 0, 1, 1], [], []>} : vector<8x8xf32>, vector<8x324xf32>, vector<8x324xf32> -> vector<8x324xf32>
    %78 = arith.addf %73, %77 : vector<8x324xf32>
    %79 = vector.extract_strided_slice %51 {offsets = [5, 0, 0], sizes = [1, 8, 8], strides = [1, 1, 1]} : vector<9x8x8xf32> to vector<1x8x8xf32>
    %80 = vector.shape_cast %79 : vector<1x8x8xf32> to vector<8x8xf32>
    %c0_54 = arith.constant 0 : index
    %c20 = arith.constant 20 : index
    %81 = vector.load %arg22[%c0_54, %c20] : memref<8x362xf32, #tpu.memory_space<vmem>>, vector<8x324xf32>
    %cst_55 = arith.constant dense<0.000000e+00> : vector<8x324xf32>
    %82 = tpu.matmul %80, %81, %cst_55 {dimension_numbers = #tpu.dot_dimension_numbers<[1], [0], [0], [1], [0, 0, 1, 1], [], []>} : vector<8x8xf32>, vector<8x324xf32>, vector<8x324xf32> -> vector<8x324xf32>
    %83 = arith.addf %78, %82 : vector<8x324xf32>
    %84 = vector.extract_strided_slice %51 {offsets = [6, 0, 0], sizes = [1, 8, 8], strides = [1, 1, 1]} : vector<9x8x8xf32> to vector<1x8x8xf32>
    %85 = vector.shape_cast %84 : vector<1x8x8xf32> to vector<8x8xf32>
    %c0_56 = arith.constant 0 : index
    %c36 = arith.constant 36 : index
    %86 = vector.load %arg22[%c0_56, %c36] : memref<8x362xf32, #tpu.memory_space<vmem>>, vector<8x324xf32>
    %cst_57 = arith.constant dense<0.000000e+00> : vector<8x324xf32>
    %87 = tpu.matmul %85, %86, %cst_57 {dimension_numbers = #tpu.dot_dimension_numbers<[1], [0], [0], [1], [0, 0, 1, 1], [], []>} : vector<8x8xf32>, vector<8x324xf32>, vector<8x324xf32> -> vector<8x324xf32>
    %88 = arith.addf %83, %87 : vector<8x324xf32>
    %89 = vector.extract_strided_slice %51 {offsets = [7, 0, 0], sizes = [1, 8, 8], strides = [1, 1, 1]} : vector<9x8x8xf32> to vector<1x8x8xf32>
    %90 = vector.shape_cast %89 : vector<1x8x8xf32> to vector<8x8xf32>
    %c0_58 = arith.constant 0 : index
    %c37 = arith.constant 37 : index
    %91 = vector.load %arg22[%c0_58, %c37] : memref<8x362xf32, #tpu.memory_space<vmem>>, vector<8x324xf32>
    %cst_59 = arith.constant dense<0.000000e+00> : vector<8x324xf32>
    %92 = tpu.matmul %90, %91, %cst_59 {dimension_numbers = #tpu.dot_dimension_numbers<[1], [0], [0], [1], [0, 0, 1, 1], [], []>} : vector<8x8xf32>, vector<8x324xf32>, vector<8x324xf32> -> vector<8x324xf32>
    %93 = arith.addf %88, %92 : vector<8x324xf32>
    %94 = vector.extract_strided_slice %51 {offsets = [8, 0, 0], sizes = [1, 8, 8], strides = [1, 1, 1]} : vector<9x8x8xf32> to vector<1x8x8xf32>
    %95 = vector.shape_cast %94 : vector<1x8x8xf32> to vector<8x8xf32>
    %c0_60 = arith.constant 0 : index
    %c38_61 = arith.constant 38 : index
    %96 = vector.load %arg22[%c0_60, %c38_61] : memref<8x362xf32, #tpu.memory_space<vmem>>, vector<8x324xf32>
    %cst_62 = arith.constant dense<0.000000e+00> : vector<8x324xf32>
    %97 = tpu.matmul %95, %96, %cst_62 {dimension_numbers = #tpu.dot_dimension_numbers<[1], [0], [0], [1], [0, 0, 1, 1], [], []>} : vector<8x8xf32>, vector<8x324xf32>, vector<8x324xf32> -> vector<8x324xf32>
    %98 = arith.addf %93, %97 : vector<8x324xf32>
    %99 = vector.broadcast %52 : vector<8x1xf32> to vector<8x324xf32>
    %100 = arith.addf %98, %99 : vector<8x324xf32>
    %101 = vector.broadcast %0 : vector<1x324xf32> to vector<8x324xf32>
    %102 = arith.mulf %100, %101 : vector<8x324xf32>
    %c0_63 = arith.constant 0 : index
    %c19_64 = arith.constant 19 : index
    %103 = vector.load %arg23[%c0_63, %c19_64] : memref<8x362xf32, #tpu.memory_space<vmem>>, vector<8x324xf32>
    tpu.vector_store %arg23[%c0_63, %c19_64], %102 {strides = array<i32>} : memref<8x362xf32, #tpu.memory_space<vmem>>, vector<8x324xf32>,
    %c0_65 = arith.constant 0 : index
    %c0_66 = arith.constant 0 : index
    %c0_67 = arith.constant 0 : index
    %104 = vector.load %arg8[%c0_65, %c0_66, %c0_67] : memref<9x8x8xf32, #tpu.memory_space<vmem>>, vector<9x8x8xf32>
    %c0_68 = arith.constant 0 : index
    %c0_69 = arith.constant 0 : index
    %105 = vector.load %arg9[%c0_68, %c0_69] : memref<8x1xf32, #tpu.memory_space<vmem>>, vector<8x1xf32>
    %cst_70 = arith.constant 0.000000e+00 : f32
    %106 = vector.broadcast %cst_70 : f32 to vector<8x324xf32>
    %107 = vector.extract_strided_slice %104 {offsets = [0, 0, 0], sizes = [1, 8, 8], strides = [1, 1, 1]} : vector<9x8x8xf32> to vector<1x8x8xf32>
    %108 = vector.shape_cast %107 : vector<1x8x8xf32> to vector<8x8xf32>
    %c0_71 = arith.constant 0 : index
    %c0_72 = arith.constant 0 : index
    %109 = vector.load %arg23[%c0_71, %c0_72] : memref<8x362xf32, #tpu.memory_space<vmem>>, vector<8x324xf32>
    %cst_73 = arith.constant dense<0.000000e+00> : vector<8x324xf32>
    %110 = tpu.matmul %108, %109, %cst_73 {dimension_numbers = #tpu.dot_dimension_numbers<[1], [0], [0], [1], [0, 0, 1, 1], [], []>} : vector<8x8xf32>, vector<8x324xf32>, vector<8x324xf32> -> vector<8x324xf32>
    %111 = arith.addf %106, %110 : vector<8x324xf32>
    %112 = vector.extract_strided_slice %104 {offsets = [1, 0, 0], sizes = [1, 8, 8], strides = [1, 1, 1]} : vector<9x8x8xf32> to vector<1x8x8xf32>
    %113 = vector.shape_cast %112 : vector<1x8x8xf32> to vector<8x8xf32>
    %c0_74 = arith.constant 0 : index
    %c1_75 = arith.constant 1 : index
    %114 = vector.load %arg23[%c0_74, %c1_75] : memref<8x362xf32, #tpu.memory_space<vmem>>, vector<8x324xf32>
    %cst_76 = arith.constant dense<0.000000e+00> : vector<8x324xf32>
    %115 = tpu.matmul %113, %114, %cst_76 {dimension_numbers = #tpu.dot_dimension_numbers<[1], [0], [0], [1], [0, 0, 1, 1], [], []>} : vector<8x8xf32>, vector<8x324xf32>, vector<8x324xf32> -> vector<8x324xf32>
    %116 = arith.addf %111, %115 : vector<8x324xf32>
    %117 = vector.extract_strided_slice %104 {offsets = [2, 0, 0], sizes = [1, 8, 8], strides = [1, 1, 1]} : vector<9x8x8xf32> to vector<1x8x8xf32>
    %118 = vector.shape_cast %117 : vector<1x8x8xf32> to vector<8x8xf32>
    %c0_77 = arith.constant 0 : index
    %c2_78 = arith.constant 2 : index
    %119 = vector.load %arg23[%c0_77, %c2_78] : memref<8x362xf32, #tpu.memory_space<vmem>>, vector<8x324xf32>
    %cst_79 = arith.constant dense<0.000000e+00> : vector<8x324xf32>
    %120 = tpu.matmul %118, %119, %cst_79 {dimension_numbers = #tpu.dot_dimension_numbers<[1], [0], [0], [1], [0, 0, 1, 1], [], []>} : vector<8x8xf32>, vector<8x324xf32>, vector<8x324xf32> -> vector<8x324xf32>
    %121 = arith.addf %116, %120 : vector<8x324xf32>
    %122 = vector.extract_strided_slice %104 {offsets = [3, 0, 0], sizes = [1, 8, 8], strides = [1, 1, 1]} : vector<9x8x8xf32> to vector<1x8x8xf32>
    %123 = vector.shape_cast %122 : vector<1x8x8xf32> to vector<8x8xf32>
    %c0_80 = arith.constant 0 : index
    %c18_81 = arith.constant 18 : index
    %124 = vector.load %arg23[%c0_80, %c18_81] : memref<8x362xf32, #tpu.memory_space<vmem>>, vector<8x324xf32>
    %cst_82 = arith.constant dense<0.000000e+00> : vector<8x324xf32>
    %125 = tpu.matmul %123, %124, %cst_82 {dimension_numbers = #tpu.dot_dimension_numbers<[1], [0], [0], [1], [0, 0, 1, 1], [], []>} : vector<8x8xf32>, vector<8x324xf32>, vector<8x324xf32> -> vector<8x324xf32>
    %126 = arith.addf %121, %125 : vector<8x324xf32>
    %127 = vector.extract_strided_slice %104 {offsets = [4, 0, 0], sizes = [1, 8, 8], strides = [1, 1, 1]} : vector<9x8x8xf32> to vector<1x8x8xf32>
    %128 = vector.shape_cast %127 : vector<1x8x8xf32> to vector<8x8xf32>
    %c0_83 = arith.constant 0 : index
    %c19_84 = arith.constant 19 : index
    %129 = vector.load %arg23[%c0_83, %c19_84] : memref<8x362xf32, #tpu.memory_space<vmem>>, vector<8x324xf32>
    %cst_85 = arith.constant dense<0.000000e+00> : vector<8x324xf32>
    %130 = tpu.matmul %128, %129, %cst_85 {dimension_numbers = #tpu.dot_dimension_numbers<[1], [0], [0], [1], [0, 0, 1, 1], [], []>} : vector<8x8xf32>, vector<8x324xf32>, vector<8x324xf32> -> vector<8x324xf32>
    %131 = arith.addf %126, %130 : vector<8x324xf32>
    %132 = vector.extract_strided_slice %104 {offsets = [5, 0, 0], sizes = [1, 8, 8], strides = [1, 1, 1]} : vector<9x8x8xf32> to vector<1x8x8xf32>
    %133 = vector.shape_cast %132 : vector<1x8x8xf32> to vector<8x8xf32>
    %c0_86 = arith.constant 0 : index
    %c20_87 = arith.constant 20 : index
    %134 = vector.load %arg23[%c0_86, %c20_87] : memref<8x362xf32, #tpu.memory_space<vmem>>, vector<8x324xf32>
    %cst_88 = arith.constant dense<0.000000e+00> : vector<8x324xf32>
    %135 = tpu.matmul %133, %134, %cst_88 {dimension_numbers = #tpu.dot_dimension_numbers<[1], [0], [0], [1], [0, 0, 1, 1], [], []>} : vector<8x8xf32>, vector<8x324xf32>, vector<8x324xf32> -> vector<8x324xf32>
    %136 = arith.addf %131, %135 : vector<8x324xf32>
    %137 = vector.extract_strided_slice %104 {offsets = [6, 0, 0], sizes = [1, 8, 8], strides = [1, 1, 1]} : vector<9x8x8xf32> to vector<1x8x8xf32>
    %138 = vector.shape_cast %137 : vector<1x8x8xf32> to vector<8x8xf32>
    %c0_89 = arith.constant 0 : index
    %c36_90 = arith.constant 36 : index
    %139 = vector.load %arg23[%c0_89, %c36_90] : memref<8x362xf32, #tpu.memory_space<vmem>>, vector<8x324xf32>
    %cst_91 = arith.constant dense<0.000000e+00> : vector<8x324xf32>
    %140 = tpu.matmul %138, %139, %cst_91 {dimension_numbers = #tpu.dot_dimension_numbers<[1], [0], [0], [1], [0, 0, 1, 1], [], []>} : vector<8x8xf32>, vector<8x324xf32>, vector<8x324xf32> -> vector<8x324xf32>
    %141 = arith.addf %136, %140 : vector<8x324xf32>
    %142 = vector.extract_strided_slice %104 {offsets = [7, 0, 0], sizes = [1, 8, 8], strides = [1, 1, 1]} : vector<9x8x8xf32> to vector<1x8x8xf32>
    %143 = vector.shape_cast %142 : vector<1x8x8xf32> to vector<8x8xf32>
    %c0_92 = arith.constant 0 : index
    %c37_93 = arith.constant 37 : index
    %144 = vector.load %arg23[%c0_92, %c37_93] : memref<8x362xf32, #tpu.memory_space<vmem>>, vector<8x324xf32>
    %cst_94 = arith.constant dense<0.000000e+00> : vector<8x324xf32>
    %145 = tpu.matmul %143, %144, %cst_94 {dimension_numbers = #tpu.dot_dimension_numbers<[1], [0], [0], [1], [0, 0, 1, 1], [], []>} : vector<8x8xf32>, vector<8x324xf32>, vector<8x324xf32> -> vector<8x324xf32>
    %146 = arith.addf %141, %145 : vector<8x324xf32>
    %147 = vector.extract_strided_slice %104 {offsets = [8, 0, 0], sizes = [1, 8, 8], strides = [1, 1, 1]} : vector<9x8x8xf32> to vector<1x8x8xf32>
    %148 = vector.shape_cast %147 : vector<1x8x8xf32> to vector<8x8xf32>
    %c0_95 = arith.constant 0 : index
    %c38_96 = arith.constant 38 : index
    %149 = vector.load %arg23[%c0_95, %c38_96] : memref<8x362xf32, #tpu.memory_space<vmem>>, vector<8x324xf32>
    %cst_97 = arith.constant dense<0.000000e+00> : vector<8x324xf32>
    %150 = tpu.matmul %148, %149, %cst_97 {dimension_numbers = #tpu.dot_dimension_numbers<[1], [0], [0], [1], [0, 0, 1, 1], [], []>} : vector<8x8xf32>, vector<8x324xf32>, vector<8x324xf32> -> vector<8x324xf32>
    %151 = arith.addf %146, %150 : vector<8x324xf32>
    %152 = vector.broadcast %105 : vector<8x1xf32> to vector<8x324xf32>
    %153 = arith.addf %151, %152 : vector<8x324xf32>
    %cst_98 = arith.constant 0.000000e+00 : f32
    %154 = vector.broadcast %cst_98 : f32 to vector<8x324xf32>
    %155 = arith.maximumf %153, %154 : vector<8x324xf32>
    %c0_99 = arith.constant 0 : index
    %c19_100 = arith.constant 19 : index
    %156 = vector.load %arg23[%c0_99, %c19_100] : memref<8x362xf32, #tpu.memory_space<vmem>>, vector<8x324xf32>
    %157 = arith.addf %155, %156 : vector<8x324xf32>
    %158 = vector.broadcast %0 : vector<1x324xf32> to vector<8x324xf32>
    %159 = arith.mulf %157, %158 : vector<8x324xf32>
    %c0_101 = arith.constant 0 : index
    %c19_102 = arith.constant 19 : index
    %160 = vector.load %arg24[%c0_101, %c19_102] : memref<8x362xf32, #tpu.memory_space<vmem>>, vector<8x324xf32>
    tpu.vector_store %arg24[%c0_101, %c19_102], %159 {strides = array<i32>} : memref<8x362xf32, #tpu.memory_space<vmem>>, vector<8x324xf32>,
    %c0_103 = arith.constant 0 : index
    %c0_104 = arith.constant 0 : index
    %c0_105 = arith.constant 0 : index
    %161 = vector.load %arg10[%c0_103, %c0_104, %c0_105] : memref<9x8x8xf32, #tpu.memory_space<vmem>>, vector<9x8x8xf32>
    %c0_106 = arith.constant 0 : index
    %c0_107 = arith.constant 0 : index
    %162 = vector.load %arg11[%c0_106, %c0_107] : memref<8x1xf32, #tpu.memory_space<vmem>>, vector<8x1xf32>
    %cst_108 = arith.constant 0.000000e+00 : f32
    %163 = vector.broadcast %cst_108 : f32 to vector<8x324xf32>
    %164 = vector.extract_strided_slice %161 {offsets = [0, 0, 0], sizes = [1, 8, 8], strides = [1, 1, 1]} : vector<9x8x8xf32> to vector<1x8x8xf32>
    %165 = vector.shape_cast %164 : vector<1x8x8xf32> to vector<8x8xf32>
    %c0_109 = arith.constant 0 : index
    %c0_110 = arith.constant 0 : index
    %166 = vector.load %arg24[%c0_109, %c0_110] : memref<8x362xf32, #tpu.memory_space<vmem>>, vector<8x324xf32>
    %cst_111 = arith.constant dense<0.000000e+00> : vector<8x324xf32>
    %167 = tpu.matmul %165, %166, %cst_111 {dimension_numbers = #tpu.dot_dimension_numbers<[1], [0], [0], [1], [0, 0, 1, 1], [], []>} : vector<8x8xf32>, vector<8x324xf32>, vector<8x324xf32> -> vector<8x324xf32>
    %168 = arith.addf %163, %167 : vector<8x324xf32>
    %169 = vector.extract_strided_slice %161 {offsets = [1, 0, 0], sizes = [1, 8, 8], strides = [1, 1, 1]} : vector<9x8x8xf32> to vector<1x8x8xf32>
    %170 = vector.shape_cast %169 : vector<1x8x8xf32> to vector<8x8xf32>
    %c0_112 = arith.constant 0 : index
    %c1_113 = arith.constant 1 : index
    %171 = vector.load %arg24[%c0_112, %c1_113] : memref<8x362xf32, #tpu.memory_space<vmem>>, vector<8x324xf32>
    %cst_114 = arith.constant dense<0.000000e+00> : vector<8x324xf32>
    %172 = tpu.matmul %170, %171, %cst_114 {dimension_numbers = #tpu.dot_dimension_numbers<[1], [0], [0], [1], [0, 0, 1, 1], [], []>} : vector<8x8xf32>, vector<8x324xf32>, vector<8x324xf32> -> vector<8x324xf32>
    %173 = arith.addf %168, %172 : vector<8x324xf32>
    %174 = vector.extract_strided_slice %161 {offsets = [2, 0, 0], sizes = [1, 8, 8], strides = [1, 1, 1]} : vector<9x8x8xf32> to vector<1x8x8xf32>
    %175 = vector.shape_cast %174 : vector<1x8x8xf32> to vector<8x8xf32>
    %c0_115 = arith.constant 0 : index
    %c2_116 = arith.constant 2 : index
    %176 = vector.load %arg24[%c0_115, %c2_116] : memref<8x362xf32, #tpu.memory_space<vmem>>, vector<8x324xf32>
    %cst_117 = arith.constant dense<0.000000e+00> : vector<8x324xf32>
    %177 = tpu.matmul %175, %176, %cst_117 {dimension_numbers = #tpu.dot_dimension_numbers<[1], [0], [0], [1], [0, 0, 1, 1], [], []>} : vector<8x8xf32>, vector<8x324xf32>, vector<8x324xf32> -> vector<8x324xf32>
    %178 = arith.addf %173, %177 : vector<8x324xf32>
    %179 = vector.extract_strided_slice %161 {offsets = [3, 0, 0], sizes = [1, 8, 8], strides = [1, 1, 1]} : vector<9x8x8xf32> to vector<1x8x8xf32>
    %180 = vector.shape_cast %179 : vector<1x8x8xf32> to vector<8x8xf32>
    %c0_118 = arith.constant 0 : index
    %c18_119 = arith.constant 18 : index
    %181 = vector.load %arg24[%c0_118, %c18_119] : memref<8x362xf32, #tpu.memory_space<vmem>>, vector<8x324xf32>
    %cst_120 = arith.constant dense<0.000000e+00> : vector<8x324xf32>
    %182 = tpu.matmul %180, %181, %cst_120 {dimension_numbers = #tpu.dot_dimension_numbers<[1], [0], [0], [1], [0, 0, 1, 1], [], []>} : vector<8x8xf32>, vector<8x324xf32>, vector<8x324xf32> -> vector<8x324xf32>
    %183 = arith.addf %178, %182 : vector<8x324xf32>
    %184 = vector.extract_strided_slice %161 {offsets = [4, 0, 0], sizes = [1, 8, 8], strides = [1, 1, 1]} : vector<9x8x8xf32> to vector<1x8x8xf32>
    %185 = vector.shape_cast %184 : vector<1x8x8xf32> to vector<8x8xf32>
    %c0_121 = arith.constant 0 : index
    %c19_122 = arith.constant 19 : index
    %186 = vector.load %arg24[%c0_121, %c19_122] : memref<8x362xf32, #tpu.memory_space<vmem>>, vector<8x324xf32>
    %cst_123 = arith.constant dense<0.000000e+00> : vector<8x324xf32>
    %187 = tpu.matmul %185, %186, %cst_123 {dimension_numbers = #tpu.dot_dimension_numbers<[1], [0], [0], [1], [0, 0, 1, 1], [], []>} : vector<8x8xf32>, vector<8x324xf32>, vector<8x324xf32> -> vector<8x324xf32>
    %188 = arith.addf %183, %187 : vector<8x324xf32>
    %189 = vector.extract_strided_slice %161 {offsets = [5, 0, 0], sizes = [1, 8, 8], strides = [1, 1, 1]} : vector<9x8x8xf32> to vector<1x8x8xf32>
    %190 = vector.shape_cast %189 : vector<1x8x8xf32> to vector<8x8xf32>
    %c0_124 = arith.constant 0 : index
    %c20_125 = arith.constant 20 : index
    %191 = vector.load %arg24[%c0_124, %c20_125] : memref<8x362xf32, #tpu.memory_space<vmem>>, vector<8x324xf32>
    %cst_126 = arith.constant dense<0.000000e+00> : vector<8x324xf32>
    %192 = tpu.matmul %190, %191, %cst_126 {dimension_numbers = #tpu.dot_dimension_numbers<[1], [0], [0], [1], [0, 0, 1, 1], [], []>} : vector<8x8xf32>, vector<8x324xf32>, vector<8x324xf32> -> vector<8x324xf32>
    %193 = arith.addf %188, %192 : vector<8x324xf32>
    %194 = vector.extract_strided_slice %161 {offsets = [6, 0, 0], sizes = [1, 8, 8], strides = [1, 1, 1]} : vector<9x8x8xf32> to vector<1x8x8xf32>
    %195 = vector.shape_cast %194 : vector<1x8x8xf32> to vector<8x8xf32>
    %c0_127 = arith.constant 0 : index
    %c36_128 = arith.constant 36 : index
    %196 = vector.load %arg24[%c0_127, %c36_128] : memref<8x362xf32, #tpu.memory_space<vmem>>, vector<8x324xf32>
    %cst_129 = arith.constant dense<0.000000e+00> : vector<8x324xf32>
    %197 = tpu.matmul %195, %196, %cst_129 {dimension_numbers = #tpu.dot_dimension_numbers<[1], [0], [0], [1], [0, 0, 1, 1], [], []>} : vector<8x8xf32>, vector<8x324xf32>, vector<8x324xf32> -> vector<8x324xf32>
    %198 = arith.addf %193, %197 : vector<8x324xf32>
    %199 = vector.extract_strided_slice %161 {offsets = [7, 0, 0], sizes = [1, 8, 8], strides = [1, 1, 1]} : vector<9x8x8xf32> to vector<1x8x8xf32>
    %200 = vector.shape_cast %199 : vector<1x8x8xf32> to vector<8x8xf32>
    %c0_130 = arith.constant 0 : index
    %c37_131 = arith.constant 37 : index
    %201 = vector.load %arg24[%c0_130, %c37_131] : memref<8x362xf32, #tpu.memory_space<vmem>>, vector<8x324xf32>
    %cst_132 = arith.constant dense<0.000000e+00> : vector<8x324xf32>
    %202 = tpu.matmul %200, %201, %cst_132 {dimension_numbers = #tpu.dot_dimension_numbers<[1], [0], [0], [1], [0, 0, 1, 1], [], []>} : vector<8x8xf32>, vector<8x324xf32>, vector<8x324xf32> -> vector<8x324xf32>
    %203 = arith.addf %198, %202 : vector<8x324xf32>
    %204 = vector.extract_strided_slice %161 {offsets = [8, 0, 0], sizes = [1, 8, 8], strides = [1, 1, 1]} : vector<9x8x8xf32> to vector<1x8x8xf32>
    %205 = vector.shape_cast %204 : vector<1x8x8xf32> to vector<8x8xf32>
    %c0_133 = arith.constant 0 : index
    %c38_134 = arith.constant 38 : index
    %206 = vector.load %arg24[%c0_133, %c38_134] : memref<8x362xf32, #tpu.memory_space<vmem>>, vector<8x324xf32>
    %cst_135 = arith.constant dense<0.000000e+00> : vector<8x324xf32>
    %207 = tpu.matmul %205, %206, %cst_135 {dimension_numbers = #tpu.dot_dimension_numbers<[1], [0], [0], [1], [0, 0, 1, 1], [], []>} : vector<8x8xf32>, vector<8x324xf32>, vector<8x324xf32> -> vector<8x324xf32>
    %208 = arith.addf %203, %207 : vector<8x324xf32>
    %209 = vector.broadcast %162 : vector<8x1xf32> to vector<8x324xf32>
    %210 = arith.addf %208, %209 : vector<8x324xf32>
    %211 = vector.broadcast %0 : vector<1x324xf32> to vector<8x324xf32>
    %212 = arith.mulf %210, %211 : vector<8x324xf32>
    %c0_136 = arith.constant 0 : index
    %c19_137 = arith.constant 19 : index
    %213 = vector.load %arg22[%c0_136, %c19_137] : memref<8x362xf32, #tpu.memory_space<vmem>>, vector<8x324xf32>
    tpu.vector_store %arg22[%c0_136, %c19_137], %212 {strides = array<i32>} : memref<8x362xf32, #tpu.memory_space<vmem>>, vector<8x324xf32>,
    %c0_138 = arith.constant 0 : index
    %c19_139 = arith.constant 19 : index
    %214 = vector.load %arg22[%c0_138, %c19_139] : memref<8x362xf32, #tpu.memory_space<vmem>>, vector<8x324xf32>
    %c0_140 = arith.constant 0 : index
    %c19_141 = arith.constant 19 : index
    %215 = vector.load %arg23[%c0_140, %c19_141] : memref<8x362xf32, #tpu.memory_space<vmem>>, vector<8x324xf32>
    %cst_142 = arith.constant dense<0.000000e+00> : vector<8xf32>
    %216 = vector.multi_reduction <add>, %214, %cst_142 [1] : vector<8x324xf32> to vector<8xf32>
    %217 = vector.shape_cast %216 : vector<8xf32> to vector<8x1xf32>
    %cst_143 = arith.constant 3.906250e-03 : f32
    %218 = vector.broadcast %cst_143 : f32 to vector<8x1xf32>
    %219 = arith.mulf %217, %218 : vector<8x1xf32>
    %c0_144 = arith.constant 0 : index
    %c0_145 = arith.constant 0 : index
    %220 = vector.load %arg12[%c0_144, %c0_145] : memref<8x1xf32, #tpu.memory_space<vmem>>, vector<8x1xf32>
    %221 = arith.mulf %220, %219 : vector<8x1xf32>
    %cst_146 = arith.constant dense<0.000000e+00> : vector<1xf32>
    %222 = vector.multi_reduction <add>, %221, %cst_146 [0] : vector<8x1xf32> to vector<1xf32>
    %223 = vector.shape_cast %222 : vector<1xf32> to vector<1x1xf32>
    %c0_147 = arith.constant 0 : index
    %c0_148 = arith.constant 0 : index
    %224 = vector.load %arg13[%c0_147, %c0_148] : memref<1x1xf32, #tpu.memory_space<vmem>>, vector<1x1xf32>
    %225 = arith.addf %223, %224 : vector<1x1xf32>
    %cst_149 = arith.constant 0.000000e+00 : f32
    %226 = vector.broadcast %cst_149 : f32 to vector<1x1xf32>
    %227 = arith.maximumf %225, %226 : vector<1x1xf32>
    %c0_150 = arith.constant 0 : index
    %c0_151 = arith.constant 0 : index
    %228 = vector.load %arg14[%c0_150, %c0_151] : memref<8x1xf32, #tpu.memory_space<vmem>>, vector<8x1xf32>
    %229 = vector.broadcast %227 : vector<1x1xf32> to vector<8x1xf32>
    %230 = arith.mulf %228, %229 : vector<8x1xf32>
    %cst_152 = arith.constant dense<0.000000e+00> : vector<8xf32>
    %231 = vector.multi_reduction <add>, %230, %cst_152 [1] : vector<8x1xf32> to vector<8xf32>
    %232 = vector.shape_cast %231 : vector<8xf32> to vector<8x1xf32>
    %c0_153 = arith.constant 0 : index
    %c0_154 = arith.constant 0 : index
    %233 = vector.load %arg15[%c0_153, %c0_154] : memref<8x1xf32, #tpu.memory_space<vmem>>, vector<8x1xf32>
    %234 = arith.addf %232, %233 : vector<8x1xf32>
    %235 = arith.negf %234 : vector<8x1xf32>
    %236 = math.exp %235 : vector<8x1xf32>
    %cst_155 = arith.constant 1.000000e+00 : f32
    %237 = vector.broadcast %cst_155 : f32 to vector<8x1xf32>
    %238 = arith.addf %237, %236 : vector<8x1xf32>
    %239 = arith.divf %237, %238 : vector<8x1xf32>
    %240 = vector.broadcast %239 : vector<8x1xf32> to vector<8x324xf32>
    %241 = arith.mulf %214, %240 : vector<8x324xf32>
    %c0_156 = arith.constant 0 : index
    %c0_157 = arith.constant 0 : index
    %242 = vector.load %arg16[%c0_156, %c0_157] : memref<1x8xf32, #tpu.memory_space<vmem>>, vector<1x8xf32>
    %cst_158 = arith.constant dense<0.000000e+00> : vector<1x324xf32>
    %243 = tpu.matmul %242, %241, %cst_158 {dimension_numbers = #tpu.dot_dimension_numbers<[1], [0], [0], [1], [0, 0, 1, 1], [], []>} : vector<1x8xf32>, vector<8x324xf32>, vector<1x324xf32> -> vector<1x324xf32>
    %c0_159 = arith.constant 0 : index
    %c0_160 = arith.constant 0 : index
    %244 = vector.load %arg17[%c0_159, %c0_160] : memref<1x1xf32, #tpu.memory_space<vmem>>, vector<1x1xf32>
    %245 = vector.broadcast %244 : vector<1x1xf32> to vector<1x324xf32>
    %246 = arith.addf %243, %245 : vector<1x324xf32>
    %cst_161 = arith.constant 0.000000e+00 : f32
    %247 = vector.broadcast %cst_161 : f32 to vector<1x324xf32>
    %248 = arith.maximumf %246, %247 : vector<1x324xf32>
    %c0_162 = arith.constant 0 : index
    %c0_163 = arith.constant 0 : index
    %249 = vector.load %arg18[%c0_162, %c0_163] : memref<1x1xf32, #tpu.memory_space<vmem>>, vector<1x1xf32>
    %cst_164 = arith.constant dense<0.000000e+00> : vector<1x324xf32>
    %250 = tpu.matmul %249, %248, %cst_164 {dimension_numbers = #tpu.dot_dimension_numbers<[1], [0], [0], [1], [0, 0, 1, 1], [], []>} : vector<1x1xf32>, vector<1x324xf32>, vector<1x324xf32> -> vector<1x324xf32>
    %c0_165 = arith.constant 0 : index
    %c0_166 = arith.constant 0 : index
    %251 = vector.load %arg19[%c0_165, %c0_166] : memref<1x1xf32, #tpu.memory_space<vmem>>, vector<1x1xf32>
    %252 = vector.broadcast %251 : vector<1x1xf32> to vector<1x324xf32>
    %253 = arith.addf %250, %252 : vector<1x324xf32>
    %254 = arith.negf %253 : vector<1x324xf32>
    %255 = math.exp %254 : vector<1x324xf32>
    %cst_167 = arith.constant 1.000000e+00 : f32
    %256 = vector.broadcast %cst_167 : f32 to vector<1x324xf32>
    %257 = arith.addf %256, %255 : vector<1x324xf32>
    %258 = arith.divf %256, %257 : vector<1x324xf32>
    %259 = vector.broadcast %258 : vector<1x324xf32> to vector<8x324xf32>
    %260 = arith.mulf %241, %259 : vector<8x324xf32>
    %261 = arith.addf %260, %215 : vector<8x324xf32>
    %262 = vector.extract_strided_slice %261 {offsets = [0, 19], sizes = [8, 16], strides = [1, 1]} : vector<8x324xf32> to vector<8x16xf32>
    %c0_168 = arith.constant 0 : index
    %c0_169 = arith.constant 0 : index
    %c0_170 = arith.constant 0 : index
    %263 = vector.load %arg21[%c0_168, %c0_169, %c0_170] : memref<1x8x256xf32, #tpu.memory_space<vmem>>, vector<1x8x16xf32>
    %264 = vector.shape_cast %263 : vector<1x8x16xf32> to vector<8x16xf32>
    %265 = vector.shape_cast %262 : vector<8x16xf32> to vector<1x8x16xf32>
    tpu.vector_store %arg21[%c0_168, %c0_169, %c0_170], %265 {strides = array<i32>} : memref<1x8x256xf32, #tpu.memory_space<vmem>>, vector<1x8x16xf32>,
    %266 = vector.extract_strided_slice %261 {offsets = [0, 37], sizes = [8, 16], strides = [1, 1]} : vector<8x324xf32> to vector<8x16xf32>
    %c0_171 = arith.constant 0 : index
    %c0_172 = arith.constant 0 : index
    %c16 = arith.constant 16 : index
    %267 = vector.load %arg21[%c0_171, %c0_172, %c16] : memref<1x8x256xf32, #tpu.memory_space<vmem>>, vector<1x8x16xf32>
    %268 = vector.shape_cast %267 : vector<1x8x16xf32> to vector<8x16xf32>
    %269 = vector.shape_cast %266 : vector<8x16xf32> to vector<1x8x16xf32>
    tpu.vector_store %arg21[%c0_171, %c0_172, %c16], %269 {strides = array<i32>} : memref<1x8x256xf32, #tpu.memory_space<vmem>>, vector<1x8x16xf32>,
    %270 = vector.extract_strided_slice %261 {offsets = [0, 55], sizes = [8, 16], strides = [1, 1]} : vector<8x324xf32> to vector<8x16xf32>
    %c0_173 = arith.constant 0 : index
    %c0_174 = arith.constant 0 : index
    %c32 = arith.constant 32 : index
    %271 = vector.load %arg21[%c0_173, %c0_174, %c32] : memref<1x8x256xf32, #tpu.memory_space<vmem>>, vector<1x8x16xf32>
    %272 = vector.shape_cast %271 : vector<1x8x16xf32> to vector<8x16xf32>
    %273 = vector.shape_cast %270 : vector<8x16xf32> to vector<1x8x16xf32>
    tpu.vector_store %arg21[%c0_173, %c0_174, %c32], %273 {strides = array<i32>} : memref<1x8x256xf32, #tpu.memory_space<vmem>>, vector<1x8x16xf32>,
    %274 = vector.extract_strided_slice %261 {offsets = [0, 73], sizes = [8, 16], strides = [1, 1]} : vector<8x324xf32> to vector<8x16xf32>
    %c0_175 = arith.constant 0 : index
    %c0_176 = arith.constant 0 : index
    %c48 = arith.constant 48 : index
    %275 = vector.load %arg21[%c0_175, %c0_176, %c48] : memref<1x8x256xf32, #tpu.memory_space<vmem>>, vector<1x8x16xf32>
    %276 = vector.shape_cast %275 : vector<1x8x16xf32> to vector<8x16xf32>
    %277 = vector.shape_cast %274 : vector<8x16xf32> to vector<1x8x16xf32>
    tpu.vector_store %arg21[%c0_175, %c0_176, %c48], %277 {strides = array<i32>} : memref<1x8x256xf32, #tpu.memory_space<vmem>>, vector<1x8x16xf32>,
    %278 = vector.extract_strided_slice %261 {offsets = [0, 91], sizes = [8, 16], strides = [1, 1]} : vector<8x324xf32> to vector<8x16xf32>
    %c0_177 = arith.constant 0 : index
    %c0_178 = arith.constant 0 : index
    %c64 = arith.constant 64 : index
    %279 = vector.load %arg21[%c0_177, %c0_178, %c64] : memref<1x8x256xf32, #tpu.memory_space<vmem>>, vector<1x8x16xf32>
    %280 = vector.shape_cast %279 : vector<1x8x16xf32> to vector<8x16xf32>
    %281 = vector.shape_cast %278 : vector<8x16xf32> to vector<1x8x16xf32>
    tpu.vector_store %arg21[%c0_177, %c0_178, %c64], %281 {strides = array<i32>} : memref<1x8x256xf32, #tpu.memory_space<vmem>>, vector<1x8x16xf32>,
    %282 = vector.extract_strided_slice %261 {offsets = [0, 109], sizes = [8, 16], strides = [1, 1]} : vector<8x324xf32> to vector<8x16xf32>
    %c0_179 = arith.constant 0 : index
    %c0_180 = arith.constant 0 : index
    %c80 = arith.constant 80 : index
    %283 = vector.load %arg21[%c0_179, %c0_180, %c80] : memref<1x8x256xf32, #tpu.memory_space<vmem>>, vector<1x8x16xf32>
    %284 = vector.shape_cast %283 : vector<1x8x16xf32> to vector<8x16xf32>
    %285 = vector.shape_cast %282 : vector<8x16xf32> to vector<1x8x16xf32>
    tpu.vector_store %arg21[%c0_179, %c0_180, %c80], %285 {strides = array<i32>} : memref<1x8x256xf32, #tpu.memory_space<vmem>>, vector<1x8x16xf32>,
    %286 = vector.extract_strided_slice %261 {offsets = [0, 127], sizes = [8, 16], strides = [1, 1]} : vector<8x324xf32> to vector<8x16xf32>
    %c0_181 = arith.constant 0 : index
    %c0_182 = arith.constant 0 : index
    %c96 = arith.constant 96 : index
    %287 = vector.load %arg21[%c0_181, %c0_182, %c96] : memref<1x8x256xf32, #tpu.memory_space<vmem>>, vector<1x8x16xf32>
    %288 = vector.shape_cast %287 : vector<1x8x16xf32> to vector<8x16xf32>
    %289 = vector.shape_cast %286 : vector<8x16xf32> to vector<1x8x16xf32>
    tpu.vector_store %arg21[%c0_181, %c0_182, %c96], %289 {strides = array<i32>} : memref<1x8x256xf32, #tpu.memory_space<vmem>>, vector<1x8x16xf32>,
    %290 = vector.extract_strided_slice %261 {offsets = [0, 145], sizes = [8, 16], strides = [1, 1]} : vector<8x324xf32> to vector<8x16xf32>
    %c0_183 = arith.constant 0 : index
    %c0_184 = arith.constant 0 : index
    %c112 = arith.constant 112 : index
    %291 = vector.load %arg21[%c0_183, %c0_184, %c112] : memref<1x8x256xf32, #tpu.memory_space<vmem>>, vector<1x8x16xf32>
    %292 = vector.shape_cast %291 : vector<1x8x16xf32> to vector<8x16xf32>
    %293 = vector.shape_cast %290 : vector<8x16xf32> to vector<1x8x16xf32>
    tpu.vector_store %arg21[%c0_183, %c0_184, %c112], %293 {strides = array<i32>} : memref<1x8x256xf32, #tpu.memory_space<vmem>>, vector<1x8x16xf32>,
    %294 = vector.extract_strided_slice %261 {offsets = [0, 163], sizes = [8, 16], strides = [1, 1]} : vector<8x324xf32> to vector<8x16xf32>
    %c0_185 = arith.constant 0 : index
    %c0_186 = arith.constant 0 : index
    %c128_187 = arith.constant 128 : index
    %295 = vector.load %arg21[%c0_185, %c0_186, %c128_187] : memref<1x8x256xf32, #tpu.memory_space<vmem>>, vector<1x8x16xf32>
    %296 = vector.shape_cast %295 : vector<1x8x16xf32> to vector<8x16xf32>
    %297 = vector.shape_cast %294 : vector<8x16xf32> to vector<1x8x16xf32>
    tpu.vector_store %arg21[%c0_185, %c0_186, %c128_187], %297 {strides = array<i32>} : memref<1x8x256xf32, #tpu.memory_space<vmem>>, vector<1x8x16xf32>,
    %298 = vector.extract_strided_slice %261 {offsets = [0, 181], sizes = [8, 16], strides = [1, 1]} : vector<8x324xf32> to vector<8x16xf32>
    %c0_188 = arith.constant 0 : index
    %c0_189 = arith.constant 0 : index
    %c144 = arith.constant 144 : index
    %299 = vector.load %arg21[%c0_188, %c0_189, %c144] : memref<1x8x256xf32, #tpu.memory_space<vmem>>, vector<1x8x16xf32>
    %300 = vector.shape_cast %299 : vector<1x8x16xf32> to vector<8x16xf32>
    %301 = vector.shape_cast %298 : vector<8x16xf32> to vector<1x8x16xf32>
    tpu.vector_store %arg21[%c0_188, %c0_189, %c144], %301 {strides = array<i32>} : memref<1x8x256xf32, #tpu.memory_space<vmem>>, vector<1x8x16xf32>,
    %302 = vector.extract_strided_slice %261 {offsets = [0, 199], sizes = [8, 16], strides = [1, 1]} : vector<8x324xf32> to vector<8x16xf32>
    %c0_190 = arith.constant 0 : index
    %c0_191 = arith.constant 0 : index
    %c160 = arith.constant 160 : index
    %303 = vector.load %arg21[%c0_190, %c0_191, %c160] : memref<1x8x256xf32, #tpu.memory_space<vmem>>, vector<1x8x16xf32>
    %304 = vector.shape_cast %303 : vector<1x8x16xf32> to vector<8x16xf32>
    %305 = vector.shape_cast %302 : vector<8x16xf32> to vector<1x8x16xf32>
    tpu.vector_store %arg21[%c0_190, %c0_191, %c160], %305 {strides = array<i32>} : memref<1x8x256xf32, #tpu.memory_space<vmem>>, vector<1x8x16xf32>,
    %306 = vector.extract_strided_slice %261 {offsets = [0, 217], sizes = [8, 16], strides = [1, 1]} : vector<8x324xf32> to vector<8x16xf32>
    %c0_192 = arith.constant 0 : index
    %c0_193 = arith.constant 0 : index
    %c176 = arith.constant 176 : index
    %307 = vector.load %arg21[%c0_192, %c0_193, %c176] : memref<1x8x256xf32, #tpu.memory_space<vmem>>, vector<1x8x16xf32>
    %308 = vector.shape_cast %307 : vector<1x8x16xf32> to vector<8x16xf32>
    %309 = vector.shape_cast %306 : vector<8x16xf32> to vector<1x8x16xf32>
    tpu.vector_store %arg21[%c0_192, %c0_193, %c176], %309 {strides = array<i32>} : memref<1x8x256xf32, #tpu.memory_space<vmem>>, vector<1x8x16xf32>,
    %310 = vector.extract_strided_slice %261 {offsets = [0, 235], sizes = [8, 16], strides = [1, 1]} : vector<8x324xf32> to vector<8x16xf32>
    %c0_194 = arith.constant 0 : index
    %c0_195 = arith.constant 0 : index
    %c192 = arith.constant 192 : index
    %311 = vector.load %arg21[%c0_194, %c0_195, %c192] : memref<1x8x256xf32, #tpu.memory_space<vmem>>, vector<1x8x16xf32>
    %312 = vector.shape_cast %311 : vector<1x8x16xf32> to vector<8x16xf32>
    %313 = vector.shape_cast %310 : vector<8x16xf32> to vector<1x8x16xf32>
    tpu.vector_store %arg21[%c0_194, %c0_195, %c192], %313 {strides = array<i32>} : memref<1x8x256xf32, #tpu.memory_space<vmem>>, vector<1x8x16xf32>,
    %314 = vector.extract_strided_slice %261 {offsets = [0, 253], sizes = [8, 16], strides = [1, 1]} : vector<8x324xf32> to vector<8x16xf32>
    %c0_196 = arith.constant 0 : index
    %c0_197 = arith.constant 0 : index
    %c208 = arith.constant 208 : index
    %315 = vector.load %arg21[%c0_196, %c0_197, %c208] : memref<1x8x256xf32, #tpu.memory_space<vmem>>, vector<1x8x16xf32>
    %316 = vector.shape_cast %315 : vector<1x8x16xf32> to vector<8x16xf32>
    %317 = vector.shape_cast %314 : vector<8x16xf32> to vector<1x8x16xf32>
    tpu.vector_store %arg21[%c0_196, %c0_197, %c208], %317 {strides = array<i32>} : memref<1x8x256xf32, #tpu.memory_space<vmem>>, vector<1x8x16xf32>,
    %318 = vector.extract_strided_slice %261 {offsets = [0, 271], sizes = [8, 16], strides = [1, 1]} : vector<8x324xf32> to vector<8x16xf32>
    %c0_198 = arith.constant 0 : index
    %c0_199 = arith.constant 0 : index
    %c224 = arith.constant 224 : index
    %319 = vector.load %arg21[%c0_198, %c0_199, %c224] : memref<1x8x256xf32, #tpu.memory_space<vmem>>, vector<1x8x16xf32>
    %320 = vector.shape_cast %319 : vector<1x8x16xf32> to vector<8x16xf32>
    %321 = vector.shape_cast %318 : vector<8x16xf32> to vector<1x8x16xf32>
    tpu.vector_store %arg21[%c0_198, %c0_199, %c224], %321 {strides = array<i32>} : memref<1x8x256xf32, #tpu.memory_space<vmem>>, vector<1x8x16xf32>,
    %322 = vector.extract_strided_slice %261 {offsets = [0, 289], sizes = [8, 16], strides = [1, 1]} : vector<8x324xf32> to vector<8x16xf32>
    %c0_200 = arith.constant 0 : index
    %c0_201 = arith.constant 0 : index
    %c240 = arith.constant 240 : index
    %323 = vector.load %arg21[%c0_200, %c0_201, %c240] : memref<1x8x256xf32, #tpu.memory_space<vmem>>, vector<1x8x16xf32>
    %324 = vector.shape_cast %323 : vector<1x8x16xf32> to vector<8x16xf32>
    %325 = vector.shape_cast %322 : vector<8x16xf32> to vector<1x8x16xf32>
    tpu.vector_store %arg21[%c0_200, %c0_201, %c240], %325 {strides = array<i32>} : memref<1x8x256xf32, #tpu.memory_space<vmem>>, vector<1x8x16xf32>,
    return
  }
  func.func @transform_0(%arg0: i32) -> (i32, i32, i32) {
    %c0_i32 = arith.constant 0 : i32
    %c0_i32_0 = arith.constant 0 : i32
    %c0_i32_1 = arith.constant 0 : i32
    return %arg0, %c0_i32, %c0_i32_0 : i32, i32, i32
  }
  func.func @transform_1(%arg0: i32) -> (i32, i32, i32) {
    %c0_i32 = arith.constant 0 : i32
    %c0_i32_0 = arith.constant 0 : i32
    %c0_i32_1 = arith.constant 0 : i32
    return %arg0, %c0_i32, %c0_i32_0 : i32, i32, i32
  }
  func.func @transform_2(%arg0: i32) -> (i32, i32, i32) {
    %c0_i32 = arith.constant 0 : i32
    %c0_i32_0 = arith.constant 0 : i32
    %c0_i32_1 = arith.constant 0 : i32
    return %arg0, %c0_i32, %c0_i32_0 : i32, i32, i32
  }
  func.func @transform_3(%arg0: i32) -> (i32, i32) {
    %c0_i32 = arith.constant 0 : i32
    %c0_i32_0 = arith.constant 0 : i32
    %c0_i32_1 = arith.constant 0 : i32
    return %c0_i32, %c0_i32_0 : i32, i32
  }
  func.func @transform_4(%arg0: i32) -> (i32, i32) {
    %c0_i32 = arith.constant 0 : i32
    %c0_i32_0 = arith.constant 0 : i32
    %c0_i32_1 = arith.constant 0 : i32
    return %c0_i32, %c0_i32_0 : i32, i32
  }
  func.func @transform_5(%arg0: i32) -> (i32, i32, i32) {
    %c0_i32 = arith.constant 0 : i32
    %c0_i32_0 = arith.constant 0 : i32
    %c0_i32_1 = arith.constant 0 : i32
    %c0_i32_2 = arith.constant 0 : i32
    return %c0_i32, %c0_i32_0, %c0_i32_1 : i32, i32, i32
  }
  func.func @transform_6(%arg0: i32) -> (i32, i32) {
    %c0_i32 = arith.constant 0 : i32
    %c0_i32_0 = arith.constant 0 : i32
    %c0_i32_1 = arith.constant 0 : i32
    return %c0_i32, %c0_i32_0 : i32, i32
  }
  func.func @transform_7(%arg0: i32) -> (i32, i32, i32) {
    %c0_i32 = arith.constant 0 : i32
    %c0_i32_0 = arith.constant 0 : i32
    %c0_i32_1 = arith.constant 0 : i32
    %c0_i32_2 = arith.constant 0 : i32
    return %c0_i32, %c0_i32_0, %c0_i32_1 : i32, i32, i32
  }
  func.func @transform_8(%arg0: i32) -> (i32, i32) {
    %c0_i32 = arith.constant 0 : i32
    %c0_i32_0 = arith.constant 0 : i32
    %c0_i32_1 = arith.constant 0 : i32
    return %c0_i32, %c0_i32_0 : i32, i32
  }
  func.func @transform_9(%arg0: i32) -> (i32, i32, i32) {
    %c0_i32 = arith.constant 0 : i32
    %c0_i32_0 = arith.constant 0 : i32
    %c0_i32_1 = arith.constant 0 : i32
    %c0_i32_2 = arith.constant 0 : i32
    return %c0_i32, %c0_i32_0, %c0_i32_1 : i32, i32, i32
  }
  func.func @transform_10(%arg0: i32) -> (i32, i32) {
    %c0_i32 = arith.constant 0 : i32
    %c0_i32_0 = arith.constant 0 : i32
    %c0_i32_1 = arith.constant 0 : i32
    return %c0_i32, %c0_i32_0 : i32, i32
  }
  func.func @transform_11(%arg0: i32) -> (i32, i32) {
    %c0_i32 = arith.constant 0 : i32
    %c0_i32_0 = arith.constant 0 : i32
    %c0_i32_1 = arith.constant 0 : i32
    return %c0_i32, %c0_i32_0 : i32, i32
  }
  func.func @transform_12(%arg0: i32) -> (i32, i32) {
    %c0_i32 = arith.constant 0 : i32
    %c0_i32_0 = arith.constant 0 : i32
    %c0_i32_1 = arith.constant 0 : i32
    return %c0_i32, %c0_i32_0 : i32, i32
  }
  func.func @transform_13(%arg0: i32) -> (i32, i32) {
    %c0_i32 = arith.constant 0 : i32
    %c0_i32_0 = arith.constant 0 : i32
    %c0_i32_1 = arith.constant 0 : i32
    return %c0_i32, %c0_i32_0 : i32, i32
  }
  func.func @transform_14(%arg0: i32) -> (i32, i32) {
    %c0_i32 = arith.constant 0 : i32
    %c0_i32_0 = arith.constant 0 : i32
    %c0_i32_1 = arith.constant 0 : i32
    return %c0_i32, %c0_i32_0 : i32, i32
  }
  func.func @transform_15(%arg0: i32) -> (i32, i32) {
    %c0_i32 = arith.constant 0 : i32
    %c0_i32_0 = arith.constant 0 : i32
    %c0_i32_1 = arith.constant 0 : i32
    return %c0_i32, %c0_i32_0 : i32, i32
  }
  func.func @transform_16(%arg0: i32) -> (i32, i32) {
    %c0_i32 = arith.constant 0 : i32
    %c0_i32_0 = arith.constant 0 : i32
    %c0_i32_1 = arith.constant 0 : i32
    return %c0_i32, %c0_i32_0 : i32, i32
  }
  func.func @transform_17(%arg0: i32) -> (i32, i32) {
    %c0_i32 = arith.constant 0 : i32
    %c0_i32_0 = arith.constant 0 : i32
    %c0_i32_1 = arith.constant 0 : i32
    return %c0_i32, %c0_i32_0 : i32, i32
  }
  func.func @transform_18(%arg0: i32) -> (i32, i32) {
    %c0_i32 = arith.constant 0 : i32
    %c0_i32_0 = arith.constant 0 : i32
    %c0_i32_1 = arith.constant 0 : i32
    return %c0_i32, %c0_i32_0 : i32, i32
  }
  func.func @transform_19(%arg0: i32) -> (i32, i32) {
    %c0_i32 = arith.constant 0 : i32
    %c0_i32_0 = arith.constant 0 : i32
    %c0_i32_1 = arith.constant 0 : i32
    return %c0_i32, %c0_i32_0 : i32, i32
  }
  func.func @transform_20(%arg0: i32) -> (i32, i32, i32) {
    %c0_i32 = arith.constant 0 : i32
    %c0_i32_0 = arith.constant 0 : i32
    %c0_i32_1 = arith.constant 0 : i32
    return %arg0, %c0_i32, %c0_i32_0 : i32, i32, i32
  }
}

</mosaic_0001>

<bundles_post_ra>
// kernel: spi_attention.3
= control target key start
LH: loop header
LB: loop body
LE: loop exit
PB: predicated region body
PF: predicated region fallthrough
CT: control target
= control target key end

     0   :  { %s1237_s17 = smov 0   ;;  %s1239_s18 = smov 0   ;;  %s1427_s0 = inlined_call_operand.vmem [shape: f32[2,8,256], index: 0, kind: input, shape index: {}]   ;;  %s1428_s1 = inlined_call_operand.vmem [shape: f32[2,8,256], index: 1, kind: input, shape index: {}]   ;;  %s1429_s2 = inlined_call_operand.vmem [shape: f32[4,8], index: 2, kind: input, shape index: {}]   ;;  %s1430_s3 = inlined_call_operand.vmem [shape: f32[4,1], index: 3, kind: input, shape index: {}]   ;;  %s1431_s4 = inlined_call_operand.vmem [shape: f32[4,8], index: 4, kind: input, shape index: {}]   ;;  %s1432_s5 = inlined_call_operand.vmem [shape: f32[4,1], index: 5, kind: input, shape index: {}]   ;;  %s1433_s6 = inlined_call_operand.vmem [shape: f32[8,4], index: 6, kind: input, shape index: {}]   ;;  %s1434_s7 = inlined_call_operand.vmem [shape: f32[8,1], index: 7, kind: input, shape index: {}]   ;;  %s1435_s8 = inlined_call_operand.vmem [shape: f32[8,8], index: 8, kind: input, shape index: {}]   ;;  %s1436_s9 = inlined_call_operand.vmem [shape: f32[8,1], index: 9, kind: input, shape index: {}]   ;;  %s1437_s10 = inlined_call_operand.vmem [shape: f32[2,8,256], index: 10, kind: output, shape index: {0}]   ;;  %s1438_s11 = inlined_call_operand.vmem [shape: f32[2,8,256], index: 11, kind: output, shape index: {1}]  }
   0x1   :  { %s1241_s19 = smov 0  }
   0x2 LB: > { %s34_s20 = sadd.s32 1, %s1170_s18  ;;  %p1078_p0 = scmp.ge.s32.totalorder %s1174_s19, 1  ;;  %s1174_s19 = sphi %s1241_s19, %s22_s19   ;;  %s1170_s18 = sphi %s1239_s18, %s1442_s18   ;;  %s1166_s17 = sphi %s1237_s17, %s1441_s17  }
   0x3   : > { %p36_p1 = scmp.ge.s32.totalorder %s34_s20, 2  ;;  %p380_p2 = scmp.lt.s32.totalorder %s1174_s19, 3 }
   0x5   : > { %s1444_s20 = smov (%p36_p1, %s34_s20), 0  ;;  %p381_p3 = pnand %p1078_p0, %p380_p2 }
   0x6   : > { %p447_p4 = scmp.lt.s32.totalorder (!%p381_p3), %s1166_s17, 1 }
   0x7   : > { %384 = sbr.rel (%p381_p3) target bundleno = 509 (0x1fd), region = 60 }
   0xc   : > { %v1176_v0 = vmov 0   ;;  %v491_v1 = vld [vmem:[%s1430_s3] sm:$0xf]  ;;  %s1446_s17 = smov (!%p447_p4, %s1166_s17), 1  ;;  %vm497_vm0 = vcmask 64512  }
   0xd   : > { %1134 = vset.pattern.permute.xlu0 %v1176_v0  ;;  %1135 = vset.pattern.permute.xlu1 %v1176_v0  ;;  %s1258_s23 = sshll.u32 %s1446_s17, 4  ;;  %v490_v2 = vld [vmem:[%s1429_s2] sm:$0xf] }
   0xe   : > { %494 = vperm.xlu0 %1134, %v491_v1   ;;  %s454_s26 = scalar_lea.vmem %s1427_s0, %s1258_s23  ;;  %s464_s29 = scalar_lea.vmem %s1428_s1, %s1258_s23  ;;  %v629_v7 = vld [vmem:[%s1431_s4] sm:$0xf] }
   0xf   : > { %v486_v3 = vld [vmem:[%s454_s26] sm:$0xff]  ;;  %v487_v4 = vld [vmem:[%s454_s26 + $0x8] sm:$0xff]  ;;  %s484_s15 = scalar_lea.vmem %s1438_s11, %s1258_s23 }
  0x10   : > { %v488_v5 = vld [vmem:[%s464_s29] sm:$0xff]  ;;  %516 = vmatpush.msra.mxu0 %v486_v3  ;;  %536 = vmatpush.msra.mxu1 %v487_v4  ;;  %v489_v6 = vld [vmem:[%s464_s29 + $0x8] sm:$0xff]  ;;  %s474_s29 = scalar_lea.vmem %s1437_s10, %s1258_s23 }
  0x11   : > { %654 = vmatpush.msra.mxu2 %v488_v5  ;;  %674 = vmatpush.msra.mxu3 %v489_v6  ;;  %v630_v8 = vld [vmem:[%s1432_s5] sm:$0xf] }
  0x12   : > { %1087 = vmatmul.msk.f32.vlgmr.msra.gmra.mxu0 %vm497_vm0, %v490_v2  ;;  %1088 = vmatmul.msk.f32.vlgmr.msra.gmra.mxu1 %vm497_vm0, %v490_v2 }
  0x13   : > { %1091 = vmatmul.msk.f32.vlgmr.msra.gmra.mxu2 %vm497_vm0, %v629_v7  ;;  %1092 = vmatmul.msk.f32.vlgmr.msra.gmra.mxu3 %vm497_vm0, %v629_v7 }
  0x16   : > { %633 = vperm.xlu0 %1134, %v630_v8  }
  0x80   : > { %v495_v9 = vpop.permute.xlu0 %494 }
  0x88   : > { %v634_v18 = vpop.permute.xlu0 %633 }
  0x8f   : > { %v518_v10 = vpop.f32.mrf.mxu0  ;;  %v538_v11 = vpop.f32.mrf.mxu1 }
  0x90   : > { %v1281_v12 = vadd.f32 %v518_v10, %v495_v9  ;;  %v1283_v13 = vadd.f32 %v538_v11, %v495_v9 }
  0x92   : > { %v1286_v14 = vmul.f32 0.70710677, %v1281_v12  ;;  %v1289_v15 = vmul.f32 0.70710677, %v1283_v13 }
  0x94   : > { %v545_v16 = vmul.f32 %v1286_v14, %v1286_v14  ;;  %v585_v17 = vmul.f32 %v1289_v15, %v1289_v15 }
  0x96   : > { %v1295_v19 = vmin.f32 %v545_v16, 16.0  ;;  %v1297_v20 = vmin.f32 %v585_v17, 16.0  ;;  %v656_v21 = vpop.f32.mrf.mxu2  ;;  %v676_v22 = vpop.f32.mrf.mxu3 }
  0x97   : > { %v1299_v23 = vadd.f32 %v656_v21, %v634_v18  ;;  %v1301_v24 = vadd.f32 %v676_v22, %v634_v18 }
  0x98   : > { %v547_v25 = vmul.f32 2.1237322e-06, %v1295_v19  ;;  %v558_v26 = vmul.f32 3.8918573e-05, %v1295_v19  ;;  %v598_v27 = vmul.f32 3.8918573e-05, %v1297_v20 }
  0x99   : > { %v1307_v28 = vmul.f32 0.70710677, %v1299_v23  ;;  %v1312_v33 = vmul.f32 0.70710677, %v1301_v24  ;;  %v587_v35 = vmul.f32 2.1237322e-06, %v1297_v20 }
  0x9a   : > { %v548_v29 = vadd.f32 0.00028619796, %v547_v25  ;;  %v559_v30 = vadd.f32 0.001143296, %v558_v26  ;;  %v599_v31 = vadd.f32 0.001143296, %v598_v27 }
  0x9b   : > { %v683_v32 = vmul.f32 %v1307_v28, %v1307_v28  ;;  %v723_v38 = vmul.f32 %v1312_v33, %v1312_v33  ;;  %v588_v46 = vadd.f32 0.00028619796, %v587_v35 }
  0x9c   : > { %v560_v34 = vmul.f32 %v559_v30, %v1295_v19  ;;  %v600_v36 = vmul.f32 %v599_v31, %v1297_v20  ;;  %v549_v39 = vmul.f32 %v548_v29, %v1295_v19 }
  0x9d   : > { %v1317_v37 = vmin.f32 %v683_v32, 16.0  ;;  %v1325_v45 = vmin.f32 %v723_v38, 16.0  ;;  %v589_v57 = vmul.f32 %v588_v46, %v1297_v20 }
  0x9e   : > { %v561_v40 = vadd.f32 0.014752088, %v560_v34  ;;  %v601_v41 = vadd.f32 0.014752088, %v600_v36  ;;  %v550_v50 = vadd.f32 0.0036580483, %v549_v39 }
  0x9f   : > { %v685_v42 = vmul.f32 2.1237322e-06, %v1317_v37  ;;  %v696_v43 = vmul.f32 3.8918573e-05, %v1317_v37  ;;  %v736_v56 = vmul.f32 3.8918573e-05, %v1325_v45 }
  0xa0   : > { %v562_v44 = vmul.f32 %v561_v40, %v1295_v19  ;;  %v602_v47 = vmul.f32 %v601_v41, %v1297_v20  ;;  %v725_v60 = vmul.f32 2.1237322e-06, %v1325_v45  ;;  %v551_v61 = vmul.f32 %v550_v50, %v1295_v19 }
  0xa1   : > { %v686_v48 = vadd.f32 0.00028619796, %v685_v42  ;;  %v697_v49 = vadd.f32 0.001143296, %v696_v43  ;;  %v737_v3 = vadd.f32 0.001143296, %v736_v56 }
  0xa2   : > { %v563_v51 = vadd.f32 0.112945676, %v562_v44  ;;  %v603_v52 = vadd.f32 0.112945676, %v602_v47  ;;  %v590_v4 = vadd.f32 0.0036580483, %v589_v57 }
  0xa3   : > { %v687_v53 = vmul.f32 %v686_v48, %v1317_v37  ;;  %v698_v54 = vmul.f32 %v697_v49, %v1317_v37  ;;  %v726_v7 = vadd.f32 0.00028619796, %v725_v60  ;;  %v552_v8 = vadd.f32 0.05243302, %v551_v61 }
  0xa4   : > { %v564_v55 = vmul.f32 %v563_v51, %v1295_v19  ;;  %v604_v58 = vmul.f32 %v603_v52, %v1297_v20  ;;  %v738_v17 = vmul.f32 %v737_v3, %v1325_v45  ;;  %v591_v18 = vmul.f32 %v590_v4, %v1297_v20 }
  0xa5   : > { %v699_v59 = vadd.f32 0.014752088, %v698_v54  ;;  %v688_v63 = vadd.f32 0.0036580483, %v687_v53  ;;  %v727_v21 = vmul.f32 %v726_v7, %v1325_v45  ;;  %v553_v22 = vmul.f32 %v552_v8, %v1295_v19 }
  0xa6   : > { %v565_v62 = vadd.f32 0.4994258, %v564_v55  ;;  %v605_v0 = vadd.f32 0.4994258, %v604_v58  ;;  %v739_v27 = vadd.f32 0.014752088, %v738_v17 }
  0xa7   : > { %v700_v1 = vmul.f32 %v699_v59, %v1317_v37  ;;  %v689_v10 = vmul.f32 %v688_v63, %v1317_v37  ;;  %v592_v29 = vadd.f32 0.05243302, %v591_v18  ;;  %v728_v31 = vadd.f32 0.0036580483, %v727_v21  ;;  %v868_v21 = vld [vmem:[%s1436_s9] sm:$0xff] }
  0xa8   : > { %v566_v2 = vmul.f32 %v565_v62, %v1295_v19  ;;  %v606_v5 = vmul.f32 %v605_v0, %v1297_v20  ;;  %v554_v34 = vadd.f32 0.18741608, %v553_v22  ;;  %v740_v36 = vmul.f32 %v739_v27, %v1325_v45  ;;  %v770_v0 = vld [vmem:[%s1434_s7] sm:$0xff] }
  0xa9   : > { %v701_v6 = vadd.f32 0.112945676, %v700_v1  ;;  %v690_v25 = vadd.f32 0.05243302, %v689_v10  ;;  %v593_v44 = vmul.f32 %v592_v29, %v1297_v20  ;;  %v729_v46 = vmul.f32 %v728_v31, %v1325_v45  ;;  %773 = vperm.xlu1 %1135, %v770_v0  }
  0xaa   : > { %v567_v9 = vadd.f32 1.0, %v566_v2  ;;  %v1340_v11 = vadd.f32 1.0, %v606_v5  ;;  %v741_v42 = vadd.f32 0.112945676, %v740_v36  ;;  %v555_v47 = vmul.f32 %v554_v34, %v1295_v19 }
  0xab   : > { %v702_v16 = vmul.f32 %v701_v6, %v1317_v37  ;;  %v691_v35 = vmul.f32 %v690_v25, %v1317_v37  ;;  %v594_v56 = vadd.f32 0.18741608, %v593_v44  ;;  %v730_v57 = vadd.f32 0.05243302, %v729_v46 }
  0xac   : > { %1136 = vrcp.f32 %v567_v9  ;;  %v742_v49 = vmul.f32 %v741_v42, %v1325_v45  ;;  %v579_v51 = vand.u32 2147483648, %v567_v9  ;;  %v577_v53 = vand.u32 2147483647, %v567_v9 }
  0xad   : > { %1138 = vrcp.f32 %v1340_v11  ;;  %v703_v26 = vadd.f32 0.4994258, %v702_v16  ;;  %v692_v48 = vadd.f32 0.18741608, %v691_v35  ;;  %vm573_vm2 = vweird.f32 %v567_v9 }
  0xae   : > { %v743_v54 = vadd.f32 0.4994258, %v742_v49  ;;  %v556_v58 = vadd.f32 1.1283791, %v555_v47  ;;  %v580_v62 = vor.u32 1.1754944e-38, %v579_v51  ;;  %vm578_vm4 = vcmp.eq.f32.partialorder %v577_v53, 8.507059e+37 }
  0xaf   : > { %v704_v30 = vmul.f32 %v703_v26, %v1317_v37  ;;  %v693_v59 = vmul.f32 %v692_v48, %v1317_v37  ;;  %v595_v3 = vmul.f32 %v594_v56, %v1297_v20  ;;  %v731_v37 = vmul.f32 %v730_v57, %v1325_v45  ;;  %v767_v57 = vld [vmem:[%s1433_s6] sm:$0xff] }
  0xb0   : > { %v744_v60 = vmul.f32 %v743_v54, %v1325_v45  ;;  %v557_v5 = vmul.f32 %v556_v58, %v1286_v14  ;;  %v619_v6 = vand.u32 2147483648, %v1340_v11  ;;  %vm613_vm7 = vweird.f32 %v1340_v11 }
  0xb1   : > { %v1353_v40 = vadd.f32 1.0, %v704_v30  ;;  %v694_v7 = vadd.f32 1.1283791, %v693_v59  ;;  %v617_v14 = vand.u32 2147483647, %v1340_v11  ;;  %871 = vperm.xlu1 %1135, %v868_v21  }
  0xb2   : > { %v1137_v32 = vpop.eup %1136  ;;  %v745_v4 = vadd.f32 1.0, %v744_v60  ;;  %v732_v18 = vadd.f32 0.18741608, %v731_v37  ;;  %v596_v26 = vadd.f32 1.1283791, %v595_v3  ;;  %v620_v29 = vor.u32 1.1754944e-38, %v619_v6 }
  0xb3   : > { %v1351_v38 = vpop.eup %1138  ;;  %v569_v39 = vmul.f32 %v1137_v32, %v567_v9  ;;  %1140 = vrcp.f32 %v1353_v40  ;;  %vm574_vm1 = vweird.f32 %v1137_v32  ;;  %v717_v10 = vand.u32 2147483648, %v1353_v40 }
  0xb4   : > { %v609_v41 = vmul.f32 %v1351_v38, %v1340_v11  ;;  %vm575_vm3 = vmor %vm573_vm2, %vm574_vm1  ;;  %vm614_vm5 = vweird.f32 %v1351_v38  ;;  %1142 = vrcp.f32 %v745_v4  ;;  %v715_v20 = vand.u32 2147483647, %v1353_v40 }
  0xb5   : > { %v570_v43 = vsub.f32 1.0, %v569_v39  ;;  %vm1382_vm8 = vmor %vm613_vm7, %vm614_vm5  ;;  %vm711_vm9 = vweird.f32 %v1353_v40  ;;  %v718_v11 = vor.u32 1.1754944e-38, %v717_v10  ;;  %v695_v31 = vmul.f32 %v694_v7, %v1307_v28 }
  0xb6   : > { %v610_v52 = vsub.f32 1.0, %v609_v41  ;;  %vm716_vm11 = vcmp.eq.f32.partialorder %v715_v20, 8.507059e+37  ;;  %vm618_vm12 = vcmp.eq.f32.partialorder %v617_v14, 8.507059e+37  ;;  %v733_v36 = vmul.f32 %v732_v18, %v1325_v45 }
  0xb7   : > { %v571_v50 = vmul.f32 %v1137_v32, %v570_v43  ;;  %v597_v42 = vmul.f32 %v596_v26, %v1289_v15  ;;  %v679_v28 = vmul.f32 0.5, %v1299_v23  ;;  %v757_v49 = vand.u32 2147483648, %v745_v4  ;;  %v867_v26 = vld [vmem:[%s1435_s8] sm:$0xff] }
  0xb8   : > { %v611_v63 = vmul.f32 %v1351_v38, %v610_v52  ;;  %v734_v48 = vadd.f32 1.1283791, %v733_v36  ;;  %v755_v52 = vand.u32 2147483647, %v745_v4  ;;  %vm751_vm14 = vweird.f32 %v745_v4 }
  0xb9   : > { %v572_v55 = vadd.f32 %v1137_v32, %v571_v50  ;;  %v1141_v19 = vpop.eup %1140  ;;  %vm780_vm1 = vcmask 1043456   ;;  %vm776_vm2 = vcmask 31744  }
  0xba   : > { %v707_v1 = vmul.f32 %v1141_v19, %v1353_v40  ;;  %v612_v9 = vadd.f32 %v1351_v38, %v611_v63  ;;  %vm712_vm6 = vweird.f32 %v1141_v19  ;;  %v1143_v34 = vpop.eup %1142  ;;  %v735_v15 = vmul.f32 %v734_v48, %v1312_v33 }
  0xbb   : > { %v576_v61 = vsel %vm575_vm3, %v1137_v32, %v572_v55  ;;  %vm713_vm10 = vmor %vm711_vm9, %vm712_vm6  ;;  %v747_v41 = vmul.f32 %v1143_v34, %v745_v4  ;;  %vm752_vm13 = vweird.f32 %v1143_v34  ;;  %vm756_vm3 = vcmp.eq.f32.partialorder %v755_v52, 8.507059e+37 }
  0xbc   : > { %v581_v2 = vsel %vm578_vm4, %v580_v62, %v576_v61  ;;  %v708_v8 = vsub.f32 1.0, %v707_v1  ;;  %v616_v27 = vsel %vm1382_vm8, %v1351_v38, %v612_v9  ;;  %v541_v38 = vmul.f32 0.5, %v1281_v12  ;;  %vm753_vm15 = vmor %vm751_vm14, %vm752_vm13 }
  0xbd   : > { %v582_v16 = vmul.f32 %v581_v2, %v557_v5  ;;  %v621_v39 = vsel %vm618_vm12, %v620_v29, %v616_v27  ;;  %v748_v46 = vsub.f32 1.0, %v747_v41  ;;  %v758_v12 = vor.u32 1.1754944e-38, %v757_v49 }
  0xbe   : > { %v709_v17 = vmul.f32 %v1141_v19, %v708_v8  ;;  %v622_v47 = vmul.f32 %v621_v39, %v597_v42  ;;  %v680_v61 = vmul.f32 0.5, %v1301_v24 }
  0xbf   : > { %v1089_v30 = vclamps-f32 %v582_v16, 1.0  ;;  %v749_v51 = vmul.f32 %v1143_v34, %v748_v46 }
  0xc0   : > { %v710_v25 = vadd.f32 %v1141_v19, %v709_v17  ;;  %v1090_v55 = vclamps-f32 %v622_v47, 1.0 }
  0xc1   : > { %v625_v43 = vadd.f32 1.0, %v1089_v30  ;;  %v750_v54 = vadd.f32 %v1143_v34, %v749_v51 }
  0xc2   : > { %v714_v32 = vsel %vm713_vm10, %v1141_v19, %v710_v25  ;;  %v626_v60 = vadd.f32 1.0, %v1090_v55  ;;  %v542_v19 = vmul.f32 0.5, %v1283_v13 }
  0xc3   : > { %v719_v35 = vsel %vm716_vm11, %v718_v11, %v714_v32  ;;  %v627_v45 = vmul.f32 %v625_v43, %v541_v38  ;;  %v754_v56 = vsel %vm753_vm15, %v1143_v34, %v750_v54 }
  0xc4   : > { %v720_v40 = vmul.f32 %v719_v35, %v695_v31  ;;  %v759_v58 = vsel %vm756_vm3, %v758_v12, %v754_v56  ;;  %v628_v63 = vmul.f32 %v626_v60, %v542_v19 }
  0xc5   : > { %v760_v59 = vmul.f32 %v759_v58, %v735_v15 }
  0xc6   : > { %v1093_v44 = vclamps-f32 %v720_v40, 1.0 }
  0xc7   : > { %v1094_v33 = vclamps-f32 %v760_v59, 1.0 }
  0xc8   : > { %v763_v50 = vadd.f32 1.0, %v1093_v44 }
  0xc9   : > { %v764_v62 = vadd.f32 1.0, %v1094_v33 }
  0xca   : > { %v765_v53 = vmul.f32 %v763_v50, %v679_v28 }
  0xcb   : > { %v766_v0 = vmul.f32 %v764_v62, %v680_v61 }
  0xcc   : > { %v768_v23 = vadd.f32 %v765_v53, %v627_v45 }
  0xcd   : > { %v769_v1 = vadd.f32 %v766_v0, %v628_v63 }
  0xce   : > { %1095 = vmatpush.msk.msrb.mxu0 %vm780_vm1, %v768_v23 }
  0xcf   : > { %1096 = vmatmul.msk.f32.vlgmr.msrb.gmra.mxu0 %vm776_vm2, %v767_v57  ;;  %1097 = vmatpush.msk.msrb.mxu1 %vm780_vm1, %v769_v1 }
  0xd0   : > { %1098 = vmatmul.msk.f32.vlgmr.msrb.gmra.mxu1 %vm776_vm2, %v767_v57 }
 0x11b   : > { %v774_v2 = vpop.permute.xlu1 %773 }
 0x123   : > { %v872_v41 = vpop.permute.xlu1 %871 }
 0x14c   : > { %v804_v3 = vpop.f32.mrf.mxu0 }
 0x14d   : > { %v805_v37 = vadd.f32 %v804_v3, %v774_v2  ;;  %v824_v5 = vpop.f32.mrf.mxu1 }
 0x14e   : > { %v825_v7 = vadd.f32 %v824_v5, %v774_v2 }
 0x14f   : > { %v1099_v4 = vmul.f32 -1.442695, %v805_v37 }
 0x150   : > { %v1100_v13 = vmul.f32 -1.442695, %v825_v7 }
 0x151   : > { %1144 = vpow2.f32 %v1099_v4 }
 0x157   : > { %v1145_v6 = vpop.eup %1144 }
 0x158   : > { %v833_v8 = vadd.f32 1.0, %v1145_v6 }
 0x15a   : > { %1146 = vrcp.f32 %v833_v8  ;;  %v846_v20 = vand.u32 2147483648, %v833_v8  ;;  %v844_v18 = vand.u32 2147483647, %v833_v8  ;;  %vm840_vm5 = vweird.f32 %v833_v8 }
 0x15b   : > { %1148 = vpow2.f32 %v1100_v13 }
 0x15c   : > { %v847_v22 = vor.u32 1.1754944e-38, %v846_v20  ;;  %vm845_vm7 = vcmp.eq.f32.partialorder %v844_v18, 8.507059e+37 }
 0x160   : > { %v1147_v24 = vpop.eup %1146 }
 0x161   : > { %v1149_v9 = vpop.eup %1148  ;;  %v836_v10 = vmul.f32 %v1147_v24, %v833_v8  ;;  %vm841_vm4 = vweird.f32 %v1147_v24 }
 0x162   : > { %v834_v16 = vadd.f32 1.0, %v1149_v9  ;;  %vm842_vm6 = vmor %vm840_vm5, %vm841_vm4 }
 0x163   : > { %v837_v17 = vsub.f32 1.0, %v836_v10 }
 0x164   : > { %1150 = vrcp.f32 %v834_v16  ;;  %v861_v31 = vand.u32 2147483648, %v834_v16  ;;  %v859_v34 = vand.u32 2147483647, %v834_v16  ;;  %vm855_vm9 = vweird.f32 %v834_v16 }
 0x165   : > { %v838_v14 = vmul.f32 %v1147_v24, %v837_v17 }
 0x166   : > { %v862_v36 = vor.u32 1.1754944e-38, %v861_v31  ;;  %vm860_vm11 = vcmp.eq.f32.partialorder %v859_v34, 8.507059e+37 }
 0x167   : > { %v839_v21 = vadd.f32 %v1147_v24, %v838_v14 }
 0x169   : > { %v843_v25 = vsel %vm842_vm6, %v1147_v24, %v839_v21 }
 0x16a   : > { %v1151_v27 = vpop.eup %1150  ;;  %v848_v29 = vsel %vm845_vm7, %v847_v22, %v843_v25 }
 0x16b   : > { %865 = vst [vmem:[%s474_s29] sm:$0xff] %v848_v29  ;;  %892 = vmatpush.msrb.mxu2 %v848_v29  ;;  %v851_v11 = vmul.f32 %v1151_v27, %v834_v16  ;;  %vm856_vm8 = vweird.f32 %v1151_v27 }
 0x16c   : > { %1101 = vmatmul.msk.f32.vlgmr.msrb.gmra.mxu2 %vm497_vm0, %v867_v26  ;;  %vm857_vm10 = vmor %vm855_vm9, %vm856_vm8 }
 0x16d   : > { %v852_v30 = vsub.f32 1.0, %v851_v11 }
 0x16f   : > { %v853_v32 = vmul.f32 %v1151_v27, %v852_v30 }
 0x171   : > { %v854_v35 = vadd.f32 %v1151_v27, %v853_v32 }
 0x173   : > { %v858_v39 = vsel %vm857_vm10, %v1151_v27, %v854_v35 }
 0x174   : > { %v863_v40 = vsel %vm860_vm11, %v862_v36, %v858_v39 }
 0x175   : > { %866 = vst [vmem:[%s474_s29 + $0x8] sm:$0xff] %v863_v40  ;;  %912 = vmatpush.msrb.mxu3 %v863_v40 }
 0x176   : > { %1102 = vmatmul.msk.f32.vlgmr.msrb.gmra.mxu3 %vm497_vm0, %v867_v26 }
 0x1ef   : > { %v894_v42 = vpop.f32.mrf.mxu2 }
 0x1f0   : > { %v895_v38 = vadd.f32 %v894_v42, %v872_v41 }
 0x1f2   : > { %917 = vst [vmem:[%s484_s15] sm:$0xff] %v895_v38 }
 0x1f9   : > { %v914_v43 = vpop.f32.mrf.mxu3 }
 0x1fa   : > { %v915_v44 = vadd.f32 %v914_v43, %v872_v41 }
 0x1fc   : > { %918 = vst [vmem:[%s484_s15 + $0x8] sm:$0xff] %v915_v44 }
 0x1fd PF: > { %s22_s19 = sadd.s32 1, %s1174_s19   ;;  %s1441_s17 = smov %s1170_s18 }
 0x1fe   : > { %p19_p5 = scmp.ge.s32.totalorder %s22_s19, 4   ;;  %s1442_s18 = smov %s1444_s20 }
 0x200   :  { %21 = sbr.rel (!%p19_p5) target bundleno = 2 (0x2), region = 105 }

// kernel: spi_attention.4
= control target key start
LH: loop header
LB: loop body
LE: loop exit
PB: predicated region body
PF: predicated region fallthrough
CT: control target
= control target key end

     0   :  { %s1773_s21 = smov 0   ;;  %s1775_s22 = smov 0   ;;  %s2057_s0 = inlined_call_operand.vmem [shape: f32[2,8,144], index: 0, kind: input, shape index: {}]   ;;  %s2058_s1 = inlined_call_operand.vmem [shape: f32[2,8,144], index: 1, kind: input, shape index: {}]   ;;  %s2059_s2 = inlined_call_operand.vmem [shape: f32[2,8,144], index: 2, kind: input, shape index: {}]   ;;  %s2060_s3 = inlined_call_operand.vmem [shape: f32[8,8], index: 3, kind: input, shape index: {}]   ;;  %s2061_s4 = inlined_call_operand.vmem [shape: f32[8,1], index: 4, kind: input, shape index: {}]   ;;  %s2062_s5 = inlined_call_operand.vmem [shape: f32[8,8], index: 5, kind: input, shape index: {}]   ;;  %s2063_s6 = inlined_call_operand.vmem [shape: f32[8,1], index: 6, kind: input, shape index: {}]   ;;  %s2064_s7 = inlined_call_operand.vmem [shape: f32[8,8], index: 7, kind: input, shape index: {}]   ;;  %s2065_s8 = inlined_call_operand.vmem [shape: f32[8,1], index: 8, kind: input, shape index: {}]   ;;  %s2066_s9 = inlined_call_operand.vmem [shape: f32[8,8], index: 9, kind: input, shape index: {}]   ;;  %s2067_s10 = inlined_call_operand.vmem [shape: f32[8,1], index: 10, kind: input, shape index: {}]   ;;  %s2068_s11 = inlined_call_operand.vmem [shape: f32[2,8,144], index: 11, kind: output, shape index: {0}]   ;;  %s2069_s12 = inlined_call_operand.vmem [shape: f32[2,8,144], index: 12, kind: output, shape index: {1}]  }
   0x1   :  { %s1777_s23 = smov 0  }
   0x2 LB: > { %s35_s24 = sadd.s32 1, %s1695_s22  ;;  %p1602_p0 = scmp.ge.s32.totalorder %s1699_s23, 1  ;;  %s1699_s23 = sphi %s1777_s23, %s23_s23   ;;  %s1695_s22 = sphi %s1775_s22, %s2075_s22   ;;  %s1691_s21 = sphi %s1773_s21, %s2074_s21  }
   0x3   : > { %p37_p1 = scmp.ge.s32.totalorder %s35_s24, 2  ;;  %p422_p2 = scmp.lt.s32.totalorder %s1699_s23, 3 }
   0x5   : > { %s2077_s24 = smov (%p37_p1, %s35_s24), 0  ;;  %p423_p3 = pnand %p1602_p0, %p422_p2 }
   0x6   : > { %p500_p4 = scmp.lt.s32.totalorder (!%p423_p3), %s1691_s21, 1 }
   0x7   : > { %426 = sbr.rel (%p423_p3) target bundleno = 434 (0x1b2), region = 64 }
   0xc   : > { %s2079_s21 = smov (!%p500_p4, %s1691_s21), 1  ;;  %v584_v0 = vld [vmem:[%s2061_s4] sm:$0xff]  ;;  %v1701_v1 = vmov 0   ;;  %vm590_vm4 = vcmask 64512  }
   0xd   : > { %1671 = vset.pattern.permute.xlu0 %v1701_v1  ;;  %1672 = vset.pattern.permute.xlu1 %v1701_v1  ;;  %s1796_s27 = sshll.u32 %s2079_s21, 4  ;;  %v693_v12 = vld [vmem:[%s2065_s8] sm:$0xff] }
   0xe   : > { %587 = vperm.xlu0 %1671, %v584_v0   ;;  %s507_s30 = scalar_lea.vmem %s2057_s0, %s1796_s27  ;;  %s517_s15 = scalar_lea.vmem %s2058_s1, %s1796_s27  ;;  %v583_v30 = vld [vmem:[%s2060_s3] sm:$0xff] }
   0xf   : > { %v549_v2 = vld [vmem:[%s507_s30] sm:$0xff]  ;;  %v550_v4 = vld [vmem:[%s507_s30 + $0x8] sm:$0xff]  ;;  %s527_s20 = scalar_lea.vmem %s2059_s2, %s1796_s27  ;;  %s2028_s21 = scalar_lea.vmem %s2068_s11, %s1796_s27 }
  0x10   : > { %v551_v3 = vld [vmem:[%s517_s15] sm:$0xff]  ;;  %v553_v5 = vmul.f32 %v549_v2, %v549_v2  ;;  %v552_v7 = vld [vmem:[%s517_s15 + $0x8] sm:$0xff]  ;;  %v554_v8 = vmul.f32 %v550_v4, %v550_v4  ;;  %s2034_s28 = scalar_lea.vmem %s2069_s12, %s1796_s27 }
  0x11   : > { %v555_v6 = vmul.f32 %v551_v3, %v551_v3  ;;  %v556_v9 = vmul.f32 %v552_v7, %v552_v7  ;;  %v691_v33 = vld [vmem:[%s527_s20] sm:$0xff]  ;;  %v692_v35 = vld [vmem:[%s527_s20 + $0x8] sm:$0xff] }
  0x12   : > { %v690_v36 = vld [vmem:[%s2064_s7] sm:$0xff] }
  0x13   : > { %v557_v10 = vadd.f32 %v555_v6, %v553_v5  ;;  %v558_v11 = vadd.f32 %v556_v9, %v554_v8  ;;  %v749_v37 = vld [vmem:[%s2067_s10] sm:$0xff] }
  0x14   : > { %752 = vperm.xlu1 %1672, %v749_v37   ;;  %v641_v38 = vld [vmem:[%s2063_s6] sm:$0xff] }
  0x15   : > { %1673 = vrsqrt.f32 %v557_v10  ;;  %vm566_vm0 = vcmp.eq.f32.partialorder %v557_v10, inf  ;;  %v569_v24 = vand.u32 2147483648, %v557_v10  ;;  %vm568_vm1 = vcmp.eq.f32.partialorder %v557_v10, 0.0  ;;  %v640_v46 = vld [vmem:[%s2062_s5] sm:$0xff] }
  0x16   : > { %1675 = vrsqrt.f32 %v558_v11  ;;  %696 = vperm.xlu0 %1671, %v693_v12   ;;  %vm578_vm2 = vcmp.eq.f32.partialorder %v558_v11, inf  ;;  %v581_v27 = vand.u32 2147483648, %v558_v11  ;;  %vm580_vm3 = vcmp.eq.f32.partialorder %v558_v11, 0.0  ;;  %v748_v56 = vld [vmem:[%s2066_s9] sm:$0xff] }
  0x1b   : > { %v1674_v13 = vpop.eup %1673 }
  0x1c   : > { %v1676_v14 = vpop.eup %1675  ;;  %v560_v15 = vmul.f32 %v1674_v13, %v557_v10  ;;  %644 = vperm.xlu1 %1672, %v641_v38   ;;  %v1706_v38 = vmov 920167782  }
  0x1d   : > { %v572_v16 = vmul.f32 %v1676_v14, %v558_v11 }
  0x1e   : > { %v561_v17 = vmul.f32 %v1674_v13, %v560_v15 }
  0x1f   : > { %v573_v18 = vmul.f32 %v1676_v14, %v572_v16 }
  0x20   : > { %v562_v19 = vmul.f32 0.5, %v561_v17 }
  0x21   : > { %v574_v20 = vmul.f32 0.5, %v573_v18 }
  0x22   : > { %v563_v21 = vsub.f32 1.5, %v562_v19 }
  0x23   : > { %v575_v22 = vsub.f32 1.5, %v574_v20 }
  0x24   : > { %v564_v23 = vmul.f32 %v1674_v13, %v563_v21 }
  0x25   : > { %v576_v25 = vmul.f32 %v1676_v14, %v575_v22 }
  0x26   : > { %v565_v26 = vmul.f32 %v564_v23, %v557_v10 }
  0x27   : > { %v577_v28 = vmul.f32 %v576_v25, %v558_v11 }
  0x28   : > { %v567_v29 = vsel %vm566_vm0, %v557_v10, %v565_v26  ;;  %v1702_v26 = vmov 683565275  }
  0x29   : > { %v570_v31 = vsel %vm568_vm1, %v569_v24, %v567_v29  ;;  %v579_v32 = vsel %vm578_vm2, %v558_v11, %v577_v28  ;;  %v1703_v28 = vmov 2475754826  }
  0x2a   : > { %609 = vmatpush.msra.mxu0 %v570_v31  ;;  %v582_v34 = vsel %vm580_vm3, %v581_v27, %v579_v32  ;;  %v1704_v32 = vmov 2131351028  }
  0x2b   : > { %629 = vmatpush.msra.mxu1 %v582_v34  ;;  %1613 = vmatmul.msk.f32.vlgmr.msra.gmra.mxu0 %vm590_vm4, %v583_v30 }
  0x2c   : > { %1614 = vmatmul.msk.f32.vlgmr.msra.gmra.mxu1 %vm590_vm4, %v583_v30  ;;  %717 = vmatpush.msrb.mxu0 %v691_v33 }
  0x2d   : > { %737 = vmatpush.msrb.mxu1 %v692_v35  ;;  %v1705_v35 = vmov 2102212464  }
  0x33   : > { %1617 = vmatmul.msk.f32.vlgmr.msrb.gmra.mxu0 %vm590_vm4, %v690_v36 }
  0x34   : > { %1618 = vmatmul.msk.f32.vlgmr.msrb.gmra.mxu1 %vm590_vm4, %v690_v36 }
  0x80   : > { %v588_v39 = vpop.permute.xlu0 %587 }
  0x86   : > { %v753_v61 = vpop.permute.xlu1 %752 }
  0x88   : > { %v697_v49 = vpop.permute.xlu0 %696 }
  0xa8   : > { %v611_v40 = vpop.f32.mrf.mxu0 }
  0xa9   : > { %v612_v41 = vadd.f32 %v611_v40, %v588_v39  ;;  %v631_v42 = vpop.f32.mrf.mxu1 }
  0xaa   : > { %v632_v43 = vadd.f32 %v631_v42, %v588_v39 }
  0xab   : > { %vm634_vm5 = vcmp.ge.f32.partialorder %v612_v41, 0.0  ;;  %v636_v44 = vmul.f32 0.1, %v612_v41 }
  0xac   : > { %vm635_vm6 = vcmp.ge.f32.partialorder %v632_v43, 0.0  ;;  %v637_v45 = vmul.f32 0.1, %v632_v43 }
  0xad   : > { %v638_v47 = vsel %vm634_vm5, %v612_v41, %v636_v44  ;;  %v1707_v41 = vmov 1326507024  }
  0xae   : > { %665 = vmatpush.msra.mxu2 %v638_v47  ;;  %v639_v48 = vsel %vm635_vm6, %v632_v43, %v637_v45 }
  0xaf   : > { %685 = vmatpush.msra.mxu3 %v639_v48  ;;  %1615 = vmatmul.msk.f32.vlgmr.msra.gmra.mxu2 %vm590_vm4, %v640_v46 }
  0xb0   : > { %1616 = vmatmul.msk.f32.vlgmr.msra.gmra.mxu3 %vm590_vm4, %v640_v46  ;;  %v719_v50 = vpop.f32.mrf.mxu0 }
  0xb1   : > { %v720_v51 = vadd.f32 %v719_v50, %v697_v49  ;;  %v739_v52 = vpop.f32.mrf.mxu1 }
  0xb2   : > { %v740_v53 = vadd.f32 %v739_v52, %v697_v49 }
  0xb3   : > { %vm742_vm7 = vcmp.ge.f32.partialorder %v720_v51, 0.0  ;;  %v744_v54 = vmul.f32 0.1, %v720_v51 }
  0xb4   : > { %vm743_vm8 = vcmp.ge.f32.partialorder %v740_v53, 0.0  ;;  %v745_v55 = vmul.f32 0.1, %v740_v53 }
  0xb5   : > { %v746_v57 = vsel %vm742_vm7, %v720_v51, %v744_v54 }
  0xb6   : > { %773 = vmatpush.msrb.mxu2 %v746_v57  ;;  %v747_v58 = vsel %vm743_vm8, %v740_v53, %v745_v55 }
  0xb7   : > { %793 = vmatpush.msrb.mxu3 %v747_v58  ;;  %1619 = vmatmul.msk.f32.vlgmr.msrb.gmra.mxu2 %vm590_vm4, %v748_v56 }
  0xb8   : > { %1620 = vmatmul.msk.f32.vlgmr.msrb.gmra.mxu3 %vm590_vm4, %v748_v56 }
 0x132   : > { %v1839_v59 = vpop.f32.mrf.mxu2 }
 0x133   : > { %v1841_v60 = vpop.f32.mrf.mxu3 }
 0x13a   : > { %v775_v62 = vpop.f32.mrf.mxu2 }
 0x13b   : > { %v1843_v63 = vadd.f32 %v775_v62, %v753_v61  ;;  %v795_v0 = vpop.f32.mrf.mxu3 }
 0x13c   : > { %v1845_v2 = vadd.f32 %v795_v0, %v753_v61 }
 0x13d   : > { %v798_v3 = vand.u32 2147483647, %v1843_v63  ;;  %v801_v4 = vand.u32 2139095040, %v1843_v63 }
 0x13e   : > { %v952_v5 = vand.u32 2147483647, %v1845_v2  ;;  %v955_v6 = vand.u32 2139095040, %v1845_v2 }
 0x13f   : > { %v802_v7 = vshrl.u32 %v801_v4, 23  ;;  %v805_v8 = vand.u32 8388607, %v798_v3 }
 0x140   : > { %v956_v9 = vshrl.u32 %v955_v6, 23  ;;  %v959_v12 = vand.u32 8388607, %v952_v5 }
 0x141   : > { %v1621_v10 = vadd.s32 4294967169, %v802_v7  ;;  %v806_v11 = vor.u32 8388608, %v805_v8 }
 0x142   : > { %v1624_v13 = vadd.s32 4294967169, %v956_v9  ;;  %v960_v17 = vor.u32 8388608, %v959_v12 }
 0x143   : > { %v808_v14 = vadd.s32 1, %v1621_v10  ;;  %v1855_v16 = vshll.u32 %v806_v11, 8 }
 0x144   : > { %v962_v15 = vadd.s32 1, %v1624_v13  ;;  %v1862_v24 = vshll.u32 %v960_v17, 8 }
 0x145   : > { %vm809_vm9 = vcmp.gt.s32.totalorder %v808_v14, 0  ;;  %v1858_v22 = vand.u32 65535, %v1855_v16  ;;  %v848_v30 = vshrl.u32 %v1855_v16, 16 }
 0x146   : > { %v810_v18 = vsel %vm809_vm9, %v808_v14, 0  ;;  %vm963_vm10 = vcmp.gt.s32.totalorder %v962_v15, 0 }
 0x147   : > { %v812_v19 = vand.u32 31, %v810_v18  ;;  %v964_v20 = vsel %vm963_vm10, %v962_v15, 0  ;;  %v1864_v25 = vshrl.u32 %v810_v18, 5 }
 0x148   : > { %v1860_v23 = vand.u32 31, %v964_v20  ;;  %v1902_v12 = vshrl.u32 %v964_v20, 5 }
 0x149   : > { %v813_v21 = vsub.s32 32, %v812_v19  ;;  %v815_v27 = vshll.u32 %v1702_v26, %v812_v19  ;;  %v818_v29 = vshll.u32 %v1703_v28, %v812_v19  ;;  %v821_v34 = vshll.u32 %v1704_v32, %v812_v19 }
 0x14a   : > { %v824_v37 = vshll.u32 %v1705_v35, %v812_v19  ;;  %v827_v40 = vshll.u32 %v1706_v38, %v812_v19  ;;  %v1874_v46 = vsub.s32 32, %v1860_v23  ;;  %vm830_vm11 = vcmp.lt.s32.totalorder %v1864_v25, 1 }
 0x14b   : > { %v816_v31 = vshrl.u32 %v1703_v28, %v813_v21  ;;  %v819_v33 = vshrl.u32 %v1704_v32, %v813_v21  ;;  %v822_v36 = vshrl.u32 %v1705_v35, %v813_v21  ;;  %v825_v39 = vshrl.u32 %v1706_v38, %v813_v21 }
 0x14c   : > { %v828_v42 = vshrl.u32 %v1707_v41, %v813_v21  ;;  %vm831_vm12 = vcmp.lt.s32.totalorder %v1864_v25, 2  ;;  %v814_v49 = vshrl.u32 %v1702_v26, %v813_v21  ;;  %vm833_vm13 = vcmp.lt.s32.totalorder %v1864_v25, 4 }
 0x14d   : > { %v817_v43 = vor.u32 %v816_v31, %v815_v27  ;;  %v820_v44 = vor.u32 %v819_v33, %v818_v29  ;;  %v823_v45 = vor.u32 %v822_v36, %v821_v34  ;;  %v826_v47 = vor.u32 %v825_v39, %v824_v37 }
 0x14e   : > { %v829_v48 = vor.u32 %v828_v42, %v827_v40  ;;  %vm832_vm14 = vcmp.lt.s32.totalorder %v1864_v25, 3  ;;  %v969_v54 = vshll.u32 %v1702_v26, %v1860_v23  ;;  %v970_v58 = vshrl.u32 %v1703_v28, %v1874_v46 }
 0x14f   : > { %v838_v50 = vsel %vm830_vm11, %v817_v43, %v820_v44  ;;  %v842_v51 = vsel %vm830_vm11, %v820_v44, %v823_v45  ;;  %v839_v52 = vsel %vm833_vm13, %v826_v47, 920167782  ;;  %v835_v55 = vsel %vm833_vm13, %v823_v45, 2102212464 }
 0x150   : > { %v843_v53 = vsel %vm833_vm13, %v829_v48, 1326507024  ;;  %v840_v56 = vsel %vm832_vm14, %v823_v45, %v839_v52  ;;  %v972_v0 = vshll.u32 %v1703_v28, %v1860_v23  ;;  %v973_v4 = vshrl.u32 %v1704_v32, %v1874_v46 }
 0x151   : > { %v844_v57 = vsel %vm832_vm14, %v826_v47, %v843_v53  ;;  %v841_v61 = vsel %vm831_vm12, %v838_v50, %v840_v56  ;;  %v834_v10 = vsel %vm830_vm11, %v814_v49, %v817_v43  ;;  %v836_v11 = vsel %vm832_vm14, %v820_v44, %v835_v55 }
 0x152   : > { %v845_v62 = vsel %vm831_vm12, %v842_v51, %v844_v57  ;;  %v871_v8 = vand.u32 65535, %v841_v61  ;;  %v872_v9 = vshrl.u32 %v841_v61, 16  ;;  %v1904_v13 = vor.u32 %v970_v58, %v969_v54 }
 0x153   : > { %v849_v6 = vand.u32 65535, %v845_v62  ;;  %v850_v7 = vshrl.u32 %v845_v62, 16  ;;  %v1907_v17 = vor.u32 %v973_v4, %v972_v0  ;;  %v976_v18 = vshrl.u32 %v1705_v35, %v1874_v46 }
 0x154   : > { %v874_v21 = vmul.u32 %v872_v9, %v1858_v22  ;;  %v875_v27 = vmul.u32 %v871_v8, %v848_v30  ;;  %v975_v28 = vshll.u32 %v1704_v32, %v1860_v23  ;;  %v873_v31 = vmul.u32 %v871_v8, %v1858_v22 }
 0x155   : > { %v852_v14 = vmul.u32 %v850_v7, %v1858_v22  ;;  %v853_v15 = vmul.u32 %v849_v6, %v848_v30  ;;  %v851_v19 = vmul.u32 %v849_v6, %v1858_v22  ;;  %v854_v29 = vmul.u32 %v850_v7, %v848_v30 }
 0x156   : > { %v876_v33 = vmul.u32 %v872_v9, %v848_v30  ;;  %v877_v39 = vshll.u32 %v874_v21, 16  ;;  %v879_v42 = vshll.u32 %v875_v27, 16  ;;  %v1915_v43 = vor.u32 %v976_v18, %v975_v28 }
 0x157   : > { %v855_v20 = vshll.u32 %v852_v14, 16  ;;  %v856_v34 = vshrl.u32 %v852_v14, 16  ;;  %v857_v36 = vshll.u32 %v853_v15, 16  ;;  %v858_v37 = vshrl.u32 %v853_v15, 16 }
 0x158   : > { %vm881_vm0 = vc.u32 %v873_v31, %v877_v39  ;;  %v883_v45 = vadd.s32 %v877_v39, %v873_v31  ;;  %v979_v32 = vshrl.u32 %v1706_v38, %v1874_v46  ;;  %v978_v30 = vshll.u32 %v1705_v35, %v1860_v23 }
 0x159   : > { %vm859_vm15 = vc.u32 %v851_v19, %v855_v20  ;;  %v861_v40 = vadd.s32 %v855_v20, %v851_v19  ;;  %v882_v22 = vsel %vm881_vm0, 1, %v1701_v1  ;;  %v981_v50 = vshll.u32 %v1706_v38, %v1860_v23 }
 0x15a   : > { %v860_v44 = vsel %vm859_vm15, 1, %v1701_v1  ;;  %v884_v49 = vadd.s32 %v882_v22, %v876_v33  ;;  %vm885_vm2 = vc.u32 %v883_v45, %v879_v42  ;;  %v980_v53 = vor.u32 %v979_v32, %v978_v30 }
 0x15b   : > { %v862_v47 = vadd.s32 %v860_v44, %v854_v29  ;;  %vm863_vm1 = vc.u32 %v861_v40, %v857_v36  ;;  %v886_v52 = vsel %vm885_vm2, 1, %v1701_v1  ;;  %v982_v54 = vshrl.u32 %v1707_v41, %v1874_v46 }
 0x15c   : > { %v864_v48 = vsel %vm863_vm1, 1, %v1701_v1  ;;  %v878_v55 = vshrl.u32 %v874_v21, 16  ;;  %v880_v56 = vshrl.u32 %v875_v27, 16  ;;  %v1929_v57 = vadd.s32 %v883_v45, %v879_v42 }
 0x15d   : > { %v866_v51 = vadd.s32 %v864_v48, %v862_v47  ;;  %v888_v58 = vadd.s32 %v886_v52, %v884_v49  ;;  %v983_v61 = vor.u32 %v982_v54, %v981_v50  ;;  %vm984_vm3 = vcmp.lt.s32.totalorder %v1902_v12, 1 }
 0x15e   : > { %vm987_vm4 = vcmp.lt.s32.totalorder %v1902_v12, 4  ;;  %vm986_vm5 = vcmp.lt.s32.totalorder %v1902_v12, 3  ;;  %v992_v23 = vsel %vm984_vm3, %v1904_v13, %v1907_v17  ;;  %vm985_vm6 = vcmp.lt.s32.totalorder %v1902_v12, 2 }
 0x15f   : > { %v867_v35 = vadd.s32 %v866_v51, %v856_v34  ;;  %v889_v62 = vadd.s32 %v888_v58, %v878_v55  ;;  %v993_v38 = vsel %vm987_vm4, %v980_v53, 920167782  ;;  %v996_v4 = vsel %vm984_vm3, %v1907_v17, %v1915_v43 }
 0x160   : > { %v994_v0 = vsel %vm986_vm5, %v1915_v43, %v993_v38  ;;  %v837_v6 = vsel %vm831_vm12, %v834_v10, %v836_v11  ;;  %v997_v9 = vsel %vm987_vm4, %v983_v61, 1326507024  ;;  %v1001_v15 = vand.u32 65535, %v1862_v24 }
 0x161   : > { %v1940_v41 = vadd.s32 %v867_v35, %v858_v37  ;;  %v890_v7 = vadd.s32 %v889_v62, %v880_v56  ;;  %v995_v8 = vsel %vm985_vm6, %v992_v23, %v994_v0  ;;  %v998_v14 = vsel %vm986_vm5, %v980_v53, %v997_v9 }
 0x162   : > { %v1025_v18 = vand.u32 65535, %v995_v8  ;;  %v999_v25 = vsel %vm985_vm6, %v996_v4, %v998_v14  ;;  %v1002_v10 = vshrl.u32 %v1862_v24, 16  ;;  %v1026_v11 = vshrl.u32 %v995_v8, 16 }
 0x163   : > { %vm893_vm7 = vc.u32 %v1940_v41, %v1929_v57  ;;  %v894_v19 = vadd.s32 1, %v890_v7  ;;  %v891_v21 = vmul.u32 %v1855_v16, %v837_v6  ;;  %v1003_v27 = vand.u32 65535, %v999_v25 }
 0x164   : > { %v1004_v28 = vshrl.u32 %v999_v25, 16  ;;  %v1028_v20 = vmul.u32 %v1026_v11, %v1001_v15  ;;  %v1029_v31 = vmul.u32 %v1025_v18, %v1002_v10  ;;  %v1027_v37 = vmul.u32 %v1025_v18, %v1001_v15 }
 0x165   : > { %v895_v29 = vsel %vm893_vm7, %v894_v19, %v890_v7  ;;  %v1007_v36 = vmul.u32 %v1003_v27, %v1002_v10  ;;  %v1030_v39 = vmul.u32 %v1026_v11, %v1002_v10  ;;  %v1005_v44 = vmul.u32 %v1003_v27, %v1001_v15 }
 0x166   : > { %v896_v33 = vadd.s32 %v895_v29, %v891_v21  ;;  %v1006_v34 = vmul.u32 %v1004_v28, %v1001_v15  ;;  %v1031_v40 = vshll.u32 %v1028_v20, 16  ;;  %v1008_v45 = vmul.u32 %v1004_v28, %v1002_v10 }
 0x167   : > { %v1011_v47 = vshll.u32 %v1007_v36, 16  ;;  %v1033_v22 = vshll.u32 %v1029_v31, 16  ;;  %v989_v54 = vsel %vm987_vm4, %v1915_v43, 2102212464  ;;  %v968_v35 = vshrl.u32 %v1702_v26, %v1874_v46 }
 0x168   : > { %v897_v42 = vadd.s32 536870912, %v896_v33  ;;  %v1009_v32 = vshll.u32 %v1006_v34, 16  ;;  %vm1035_vm8 = vc.u32 %v1027_v37, %v1031_v40  ;;  %v1037_v30 = vadd.s32 %v1031_v40, %v1027_v37 }
 0x169   : > { %v1036_v49 = vsel %vm1035_vm8, 1, %v1701_v1  ;;  %v1010_v23 = vshrl.u32 %v1006_v34, 16  ;;  %v1032_v38 = vshrl.u32 %v1028_v20, 16  ;;  %v988_v4 = vsel %vm984_vm3, %v968_v35, %v1904_v13 }
 0x16a   : > { %v1965_v16 = vshrl.u32 %v897_v42, 30  ;;  %vm1013_vm9 = vc.u32 %v1005_v44, %v1009_v32  ;;  %v1015_v48 = vadd.s32 %v1009_v32, %v1005_v44  ;;  %v1038_v51 = vadd.s32 %v1036_v49, %v1030_v39 }
 0x16b   : > { %v1014_v50 = vsel %vm1013_vm9, 1, %v1701_v1  ;;  %vm1039_vm10 = vc.u32 %v1037_v30, %v1033_v22  ;;  %v990_v43 = vsel %vm986_vm5, %v1907_v17, %v989_v54  ;;  %v1012_v6 = vshrl.u32 %v1007_v36, 16 }
 0x16c   : > { %v899_v52 = vshll.u32 %v1965_v16, 30  ;;  %v1016_v53 = vadd.s32 %v1014_v50, %v1008_v45  ;;  %vm1017_vm11 = vc.u32 %v1015_v48, %v1011_v47  ;;  %v1040_v56 = vsel %vm1039_vm10, 1, %v1701_v1 }
 0x16d   : > { %v1018_v55 = vsel %vm1017_vm11, 1, %v1701_v1  ;;  %v1042_v62 = vadd.s32 %v1040_v56, %v1038_v51  ;;  %v1034_v7 = vshrl.u32 %v1029_v31, 16  ;;  %v991_v15 = vsel %vm985_vm6, %v988_v4, %v990_v43 }
 0x16e   : > { %v900_v58 = vsub.s32 %v896_v33, %v899_v52  ;;  %v1020_v61 = vadd.s32 %v1018_v55, %v1016_v53  ;;  %v1041_v18 = vadd.s32 %v1037_v30, %v1033_v22  ;;  %v1045_v13 = vmul.u32 %v1862_v24, %v991_v15 }
 0x16f   : > { %v1043_v8 = vadd.s32 %v1042_v62, %v1032_v38  ;;  %v892_v11 = vadd.s32 %v1929_v57, %v1940_v41  ;;  %vm800_vm0 = vcmp.lt.s32.totalorder %v1843_v63, 0  ;;  %vm1994_vm1 = vcmp.le.f32.partialorder %v798_v3, 0.7853982 }
 0x170   : > { %vm901_vm12 = vcmp.lt.s32.totalorder %v900_v58, 0  ;;  %v902_v0 = vsub.s32 0, %v900_v58  ;;  %v1021_v1 = vadd.s32 %v1020_v61, %v1010_v23  ;;  %v922_v30 = vsub.s32 4, %v1965_v16 }
 0x171   : > { %v1044_v14 = vadd.s32 %v1043_v8, %v1034_v7  ;;  %vm954_vm3 = vcmp.lt.s32.totalorder %v1845_v2, 0  ;;  %vm2012_vm6 = vcmp.le.f32.partialorder %v952_v5, 0.7853982  ;;  %vm941_vm11 = vweird.f32 %v1843_v63 }
 0x172   : > { %v903_v9 = vsel %vm901_vm12, %v902_v0, %v900_v58  ;;  %v1022_v46 = vadd.s32 %v1021_v1, %v1012_v6  ;;  %v923_v51 = vsel %vm800_vm0, %v922_v30, %v1965_v16 }
 0x173   : > { %v904_v26 = vclz %v903_v9  ;;  %v1048_v25 = vadd.s32 1, %v1044_v14  ;;  %v925_v61 = vsel %vm1994_vm1, 0, %v923_v51 }
 0x174   : > { %vm1047_vm13 = vc.u32 %v1022_v46, %v1041_v18  ;;  %v1046_v55 = vadd.s32 %v1041_v18, %v1022_v46  ;;  %v1255_v7 = vadd.s32 3, %v925_v61  ;;  %v2005_v46 = vpop.permute.xlu1 %644 }
 0x175   : > { %v1622_v19 = vadd.s32 4294967294, %v904_v26  ;;  %v1049_v17 = vsel %vm1047_vm13, %v1048_v25, %v1044_v14  ;;  %v942_v14 = vand.u32 3, %v925_v61 }
 0x176   : > { %v1050_v28 = vadd.s32 %v1049_v17, %v1045_v13  ;;  %v1256_v13 = vand.u32 3, %v1255_v7  ;;  %v668_v17 = vadd.f32 %v1839_v59, %v2005_v46 }
 0x177   : > { %vm1623_vm14 = vcmp.lt.s32.totalorder %v1622_v19, 0  ;;  %vm943_vm4 = vcmp.lt.s32.totalorder %v942_v14, 2  ;;  %vm944_vm5 = vcmp.eq.s32.totalorder %v942_v14, 0  ;;  %vm947_vm7 = vcmp.eq.s32.totalorder %v942_v14, 2 }
 0x178   : > { %v907_v10 = vsel %vm1623_vm14, 0, %v1622_v19  ;;  %v1051_v12 = vadd.s32 536870912, %v1050_v28  ;;  %vm1257_vm8 = vcmp.lt.s32.totalorder %v1256_v13, 2  ;;  %vm1258_vm9 = vcmp.eq.s32.totalorder %v1256_v13, 0 }
 0x179   : > { %v908_v21 = vsub.s32 32, %v907_v10  ;;  %v912_v27 = vsub.s32 4294967266, %v907_v10  ;;  %v909_v29 = vshll.u32 %v900_v58, %v907_v10  ;;  %vm1261_vm10 = vcmp.eq.s32.totalorder %v1256_v13, 2 }
 0x17a   : > { %v1988_v36 = vshrl.u32 %v1051_v12, 30 }
 0x17b   : > { %v910_v20 = vshrl.u32 %v892_v11, %v908_v21  ;;  %v913_v31 = vadd.s32 127, %v912_v27 }
 0x17c   : > { %v1053_v39 = vshll.u32 %v1988_v36, 30 }
 0x17d   : > { %v911_v33 = vor.u32 %v910_v20, %v909_v29  ;;  %v914_v34 = vshll.u32 %v913_v31, 23  ;;  %v1076_v31 = vsub.s32 4, %v1988_v36 }
 0x17e   : > { %v1054_v42 = vsub.s32 %v1050_v28, %v1053_v39 }
 0x17f   : > { %v915_v37 = vor.u32 4788187, %v914_v34  ;;  %v918_v40 = vcvt.s32.f32 %v911_v33 }
 0x180   : > { %vm1055_vm15 = vcmp.lt.s32.totalorder %v1054_v42, 0  ;;  %v1056_v57 = vsub.s32 0, %v1054_v42 }
 0x181   : > { %v916_v24 = vand.u32 2147483647, %v915_v37 }
 0x182   : > { %v1057_v45 = vsel %vm1055_vm15, %v1056_v57, %v1054_v42 }
 0x183   : > { %v919_v44 = vmul.f32 %v918_v40, %v916_v24  ;;  %v1058_v32 = vclz %v1057_v45  ;;  %v1077_v45 = vsel %vm954_vm3, %v1076_v31, %v1988_v36 }
 0x185   : > { %v920_v41 = vxor.u32 2147483648, %v919_v44  ;;  %v1625_v49 = vadd.s32 4294967294, %v1058_v32 }
 0x187   : > { %v921_v22 = vsel %vm800_vm0, %v920_v41, %v919_v44  ;;  %vm1626_vm2 = vcmp.lt.s32.totalorder %v1625_v49, 0 }
 0x188   : > { %v924_v48 = vsel %vm1994_vm1, %v1843_v63, %v921_v22  ;;  %v1061_v54 = vsel %vm1626_vm2, 0, %v1625_v49  ;;  %v1079_v22 = vsel %vm2012_vm6, 0, %v1077_v45  ;;  %vm1095_vm2 = vweird.f32 %v1845_v2 }
 0x189   : > { %v926_v50 = vmul.f32 %v924_v48, %v924_v48  ;;  %v1062_v3 = vsub.s32 32, %v1061_v54  ;;  %v1066_v56 = vsub.s32 4294967266, %v1061_v54  ;;  %v1063_v62 = vshll.u32 %v1054_v42, %v1061_v54 }
 0x18a   : > { %v1410_v51 = vadd.s32 3, %v1079_v22 }
 0x18b   : > { %v927_v52 = vmul.f32 -0.001358992, %v926_v50  ;;  %v934_v53 = vmul.f32 -0.00019511016, %v926_v50  ;;  %v1064_v23 = vshrl.u32 %v1046_v55, %v1062_v3  ;;  %v1067_v38 = vadd.s32 127, %v1066_v56 }
 0x18c   : > { %v1096_v3 = vand.u32 3, %v1079_v22  ;;  %v1411_v56 = vand.u32 3, %v1410_v51 }
 0x18d   : > { %v928_v58 = vadd.f32 0.041655596, %v927_v52  ;;  %v935_v35 = vadd.f32 0.008332121, %v934_v53  ;;  %v1065_v43 = vor.u32 %v1064_v23, %v1063_v62  ;;  %v1068_v6 = vshll.u32 %v1067_v38, 23 }
 0x18e   : > { %vm1097_vm12 = vcmp.lt.s32.totalorder %v1096_v3, 2  ;;  %vm1098_vm13 = vcmp.eq.s32.totalorder %v1096_v3, 0  ;;  %vm1101_vm14 = vcmp.eq.s32.totalorder %v1096_v3, 2  ;;  %vm1412_vm15 = vcmp.lt.s32.totalorder %v1411_v56, 2 }
 0x18f   : > { %v929_v0 = vmul.f32 %v928_v58, %v926_v50  ;;  %v936_v4 = vmul.f32 %v935_v35, %v926_v50  ;;  %v1069_v8 = vor.u32 4788187, %v1068_v6  ;;  %v1072_v18 = vcvt.s32.f32 %v1065_v43 }
 0x190   : > { %vm1413_vm0 = vcmp.eq.s32.totalorder %v1411_v56, 0  ;;  %vm1416_vm1 = vcmp.eq.s32.totalorder %v1411_v56, 2 }
 0x191   : > { %v930_v1 = vadd.f32 -0.4999988, %v929_v0  ;;  %v937_v16 = vadd.f32 -0.16666654, %v936_v4  ;;  %v1070_v15 = vand.u32 2147483647, %v1069_v8  ;;  %v688_v0 = vadd.f32 %v1841_v60, %v2005_v46 }
 0x193   : > { %v931_v9 = vmul.f32 %v930_v1, %v926_v50  ;;  %v938_v26 = vmul.f32 %v937_v16, %v926_v50  ;;  %v1073_v10 = vmul.f32 %v1072_v18, %v1070_v15 }
 0x195   : > { %v932_v19 = vadd.f32 1.0, %v931_v9  ;;  %v939_v25 = vadd.f32 1.0, %v938_v26  ;;  %v1074_v28 = vxor.u32 2147483648, %v1073_v10 }
 0x197   : > { %v940_v11 = vmul.f32 %v939_v25, %v924_v48  ;;  %v948_v21 = vxor.u32 2147483648, %v932_v19  ;;  %v1075_v20 = vsel %vm954_vm3, %v1074_v28, %v1073_v10  ;;  %vm1109_vm3 = vcmask 130048  }
 0x198   : > { %v1078_v34 = vsel %vm2012_vm6, %v1845_v2, %v1075_v20 }
 0x199   : > { %v945_v29 = vxor.u32 2147483648, %v940_v11  ;;  %v949_v59 = vsel %vm947_vm7, %v948_v21, %v940_v11  ;;  %v1263_v5 = vsel %vm1261_vm10, %v948_v21, %v940_v11  ;;  %v1080_v24 = vmul.f32 %v1078_v34, %v1078_v34 }
 0x19b   : > { %v946_v12 = vsel %vm944_vm5, %v932_v19, %v945_v29  ;;  %v1260_v33 = vsel %vm1258_vm9, %v932_v19, %v945_v29  ;;  %v1081_v57 = vmul.f32 -0.001358992, %v1080_v24  ;;  %v1088_v41 = vmul.f32 -0.00019511016, %v1080_v24 }
 0x19c   : > { %v950_v37 = vsel %vm943_vm4, %v946_v12, %v949_v59  ;;  %v1264_v39 = vsel %vm1257_vm8, %v1260_v33, %v1263_v5 }
 0x19d   : > { %v951_v40 = vsel %vm941_vm11, nan, %v950_v37  ;;  %v1265_v42 = vsel %vm941_vm11, nan, %v1264_v39  ;;  %v1082_v32 = vadd.f32 0.041655596, %v1081_v57  ;;  %v1089_v47 = vadd.f32 0.008332121, %v1088_v41 }
 0x19e   : > { %v1106_v44 = vmul.f32 %v951_v40, %v668_v17  ;;  %v1421_v63 = vmul.f32 %v1265_v42, %v668_v17 }
 0x19f   : > { %v1083_v30 = vmul.f32 %v1082_v32, %v1080_v24  ;;  %v1090_v48 = vmul.f32 %v1089_v47, %v1080_v24 }
 0x1a0   : > { %1108 = vst [vmem:[%s2028_s21] sm:$0xff] %v1106_v44 }
 0x1a1   : > { %1423 = vst [vmem:[%s2034_s28] sm:$0xff] %v1421_v63  ;;  %v1084_v49 = vadd.f32 -0.4999988, %v1083_v30  ;;  %v1091_v50 = vadd.f32 -0.16666654, %v1090_v48 }
 0x1a3   : > { %v1085_v52 = vmul.f32 %v1084_v49, %v1080_v24  ;;  %v1092_v53 = vmul.f32 %v1091_v50, %v1080_v24 }
 0x1a5   : > { %v1086_v54 = vadd.f32 1.0, %v1085_v52  ;;  %v1093_v55 = vadd.f32 1.0, %v1092_v53 }
 0x1a7   : > { %v1094_v58 = vmul.f32 %v1093_v55, %v1078_v34  ;;  %v1102_v36 = vxor.u32 2147483648, %v1086_v54 }
 0x1a9   : > { %v1099_v35 = vxor.u32 2147483648, %v1094_v58  ;;  %v1103_v62 = vsel %vm1101_vm14, %v1102_v36, %v1094_v58  ;;  %v1418_v38 = vsel %vm1416_vm1, %v1102_v36, %v1094_v58 }
 0x1ab   : > { %v1100_v61 = vsel %vm1098_vm13, %v1086_v54, %v1099_v35  ;;  %v1415_v23 = vsel %vm1413_vm0, %v1086_v54, %v1099_v35 }
 0x1ac   : > { %v1104_v4 = vsel %vm1097_vm12, %v1100_v61, %v1103_v62  ;;  %v1419_v43 = vsel %vm1412_vm15, %v1415_v23, %v1418_v38 }
 0x1ad   : > { %v1105_v6 = vsel %vm1095_vm2, nan, %v1104_v4  ;;  %v1420_v1 = vsel %vm1095_vm2, nan, %v1419_v43 }
 0x1ae   : > { %v1107_v16 = vmul.f32 %v1105_v6, %v688_v0  ;;  %v1422_v7 = vmul.f32 %v1420_v1, %v688_v0 }
 0x1b0   : > { %1110 = vst.msk [vmem:[%s2028_s21 + $0x8] sm:$0xff] %vm1109_vm3, %v1107_v16 }
 0x1b1   : > { %1424 = vst.msk [vmem:[%s2034_s28 + $0x8] sm:$0xff] %vm1109_vm3, %v1422_v7 }
 0x1b2 PF: > { %s23_s23 = sadd.s32 1, %s1699_s23   ;;  %s2074_s21 = smov %s1695_s22 }
 0x1b3   : > { %p20_p5 = scmp.ge.s32.totalorder %s23_s23, 4   ;;  %s2075_s22 = smov %s2077_s24 }
 0x1b5   :  { %22 = sbr.rel (!%p20_p5) target bundleno = 2 (0x2), region = 112 }

// kernel: reverse.0
= control target key start
LH: loop header
LB: loop body
LE: loop exit
PB: predicated region body
PF: predicated region fallthrough
CT: control target
= control target key end

     0   :  { %v104_v10 = vlaneseq  ;;  %v97_v14 = vld [vmem:[#allocation0 + $0x7] ss:$-1 sm:$0xff]  ;;  %v111_v19 = vld [vmem:[#allocation0 + $0x17] ss:$-1 sm:$0xff]  ;;  %s606_s0 = inlined_call_operand.vmem [shape: f32[2,8,16,7], index: 0, kind: input, shape index: {}]   ;;  %s607_s1 = inlined_call_operand.vmem [shape: f32[2,8,16,7], index: 1, kind: output, shape index: {}]  }
   0x1   :  { %v61_v0 = vld [vmem:[%s606_s0] sm:$0xff]  ;;  %v63_v1 = vld [vmem:[%s606_s0 + $0x8] sm:$0xff]  ;;  %v65_v2 = vld [vmem:[%s606_s0 + $0x10] sm:$0xff]  ;;  %v98_v21 = vrot.slane %v97_v14, 1  ;;  %v112_v25 = vrot.slane %v111_v19, 1 }
   0x2   :  { %62 = vst [vmem:[#allocation0 + $0x8] sm:$0xff] %v61_v0  ;;  %v67_v3 = vld [vmem:[%s606_s0 + $0x18] sm:$0xff]  ;;  %v69_v4 = vld [vmem:[%s606_s0 + $0x20] sm:$0xff]  ;;  %v71_v5 = vld [vmem:[%s606_s0 + $0x28] sm:$0xff]  ;;  %v517_v17 = vshrl.u32 %v104_v10, 7 }
   0x3   :  { %64 = vst [vmem:[#allocation0 + $0x18] sm:$0xff] %v63_v1  ;;  %v73_v6 = vld [vmem:[%s606_s0 + $0x30] sm:$0xff]  ;;  %v75_v7 = vld [vmem:[%s606_s0 + $0x38] sm:$0xff]  ;;  %v77_v8 = vld [vmem:[%s606_s0 + $0x40] sm:$0xff] }
   0x4   :  { %66 = vst [vmem:[#allocation0 + $0x28] sm:$0xff] %v65_v2  ;;  %v79_v9 = vld [vmem:[%s606_s0 + $0x48] sm:$0xff]  ;;  %v81_v11 = vld [vmem:[%s606_s0 + $0x50] sm:$0xff]  ;;  %v83_v12 = vld [vmem:[%s606_s0 + $0x58] sm:$0xff]  ;;  %vm106_vm0 = vcmp.lt.s32.totalorder %v517_v17, 7 }
   0x5   :  { %68 = vst [vmem:[#allocation0 + $0x38] sm:$0xff] %v67_v3  ;;  %v85_v13 = vld [vmem:[%s606_s0 + $0x60] sm:$0xff]  ;;  %v87_v15 = vld [vmem:[%s606_s0 + $0x68] sm:$0xff]  ;;  %v89_v18 = vld [vmem:[%s606_s0 + $0x70] sm:$0xff] }
   0x6   :  { %70 = vst [vmem:[#allocation0 + $0x48] sm:$0xff] %v69_v4  ;;  %v91_v20 = vld [vmem:[%s606_s0 + $0x78] sm:$0xff]  ;;  %v125_v24 = vld [vmem:[#allocation0 + $0x27] ss:$-1 sm:$0xff]  ;;  %v139_v28 = vld [vmem:[#allocation0 + $0x37] ss:$-1 sm:$0xff] }
   0x7   :  { %72 = vst [vmem:[#allocation0 + $0x58] sm:$0xff] %v71_v5  ;;  %v126_v29 = vrot.slane %v125_v24, 1  ;;  %v153_v32 = vld [vmem:[#allocation0 + $0x47] ss:$-1 sm:$0xff]  ;;  %v140_v33 = vrot.slane %v139_v28, 1 }
   0x8   :  { %74 = vst [vmem:[#allocation0 + $0x68] sm:$0xff] %v73_v6  ;;  %v167_v36 = vld [vmem:[#allocation0 + $0x57] ss:$-1 sm:$0xff]  ;;  %v154_v37 = vrot.slane %v153_v32, 1  ;;  %v181_v40 = vld [vmem:[#allocation0 + $0x67] ss:$-1 sm:$0xff] }
   0x9   :  { %76 = vst [vmem:[#allocation0 + $0x78] sm:$0xff] %v75_v7  ;;  %v102_v16 = vld [vmem:[#allocation0 + $0xf] ss:$-1 sm:$0xff]  ;;  %v168_v41 = vrot.slane %v167_v36, 1  ;;  %v195_v44 = vld [vmem:[#allocation0 + $0x77] ss:$-1 sm:$0xff] }
   0xa   :  { %78 = vst [vmem:[#allocation0 + $0x88] sm:$0xff] %v77_v8  ;;  %v116_v22 = vld [vmem:[#allocation0 + $0x1f] ss:$-1 sm:$0xff]  ;;  %v103_v23 = vrot.slane %v102_v16, 1  ;;  %v182_v45 = vrot.slane %v181_v40, 1  ;;  %v196_v49 = vrot.slane %v195_v44, 1 }
   0xb   :  { %80 = vst [vmem:[#allocation0 + $0x98] sm:$0xff] %v79_v9  ;;  %v130_v26 = vld [vmem:[#allocation0 + $0x2f] ss:$-1 sm:$0xff]  ;;  %v117_v27 = vrot.slane %v116_v22, 1  ;;  %v209_v48 = vld [vmem:[#allocation0 + $0x87] ss:$-1 sm:$0xff] }
   0xc   :  { %82 = vst [vmem:[#allocation0 + $0xa8] sm:$0xff] %v81_v11  ;;  %v144_v30 = vld [vmem:[#allocation0 + $0x3f] ss:$-1 sm:$0xff]  ;;  %v131_v31 = vrot.slane %v130_v26, 1  ;;  %v223_v52 = vld [vmem:[#allocation0 + $0x97] ss:$-1 sm:$0xff] }
   0xd   :  { %84 = vst [vmem:[#allocation0 + $0xb8] sm:$0xff] %v83_v12  ;;  %v158_v34 = vld [vmem:[#allocation0 + $0x4f] ss:$-1 sm:$0xff]  ;;  %v145_v35 = vrot.slane %v144_v30, 1  ;;  %v210_v53 = vrot.slane %v209_v48, 1  ;;  %v224_v57 = vrot.slane %v223_v52, 1 }
   0xe   :  { %86 = vst [vmem:[#allocation0 + $0xc8] sm:$0xff] %v85_v13  ;;  %v172_v38 = vld [vmem:[#allocation0 + $0x5f] ss:$-1 sm:$0xff]  ;;  %v159_v39 = vrot.slane %v158_v34, 1  ;;  %v237_v56 = vld [vmem:[#allocation0 + $0xa7] ss:$-1 sm:$0xff] }
   0xf   :  { %88 = vst [vmem:[#allocation0 + $0xd8] sm:$0xff] %v87_v15  ;;  %v186_v42 = vld [vmem:[#allocation0 + $0x6f] ss:$-1 sm:$0xff]  ;;  %v173_v43 = vrot.slane %v172_v38, 1  ;;  %v251_v60 = vld [vmem:[#allocation0 + $0xb7] ss:$-1 sm:$0xff] }
  0x10   :  { %90 = vst [vmem:[#allocation0 + $0xe8] sm:$0xff] %v89_v18  ;;  %v200_v46 = vld [vmem:[#allocation0 + $0x7f] ss:$-1 sm:$0xff]  ;;  %v187_v47 = vrot.slane %v186_v42, 1  ;;  %v238_v61 = vrot.slane %v237_v56, 1  ;;  %v252_v1 = vrot.slane %v251_v60, 1 }
  0x11   :  { %92 = vst [vmem:[#allocation0 + $0xf8] sm:$0xff] %v91_v20  ;;  %v214_v50 = vld [vmem:[#allocation0 + $0x8f] ss:$-1 sm:$0xff]  ;;  %v201_v51 = vrot.slane %v200_v46, 1  ;;  %v265_v0 = vld [vmem:[#allocation0 + $0xc7] ss:$-1 sm:$0xff] }
  0x12   :  { %99 = vst [vmem:[#allocation1] sm:$0xff] %v98_v21  ;;  %v228_v54 = vld [vmem:[#allocation0 + $0x9f] ss:$-1 sm:$0xff]  ;;  %v215_v55 = vrot.slane %v214_v50, 1  ;;  %v279_v4 = vld [vmem:[#allocation0 + $0xd7] ss:$-1 sm:$0xff] }
  0x13   :  { %107 = vst.msk [vmem:[#allocation1] sm:$0xff] %vm106_vm0, %v103_v23  ;;  %v242_v58 = vld [vmem:[#allocation0 + $0xaf] ss:$-1 sm:$0xff]  ;;  %v229_v59 = vrot.slane %v228_v54, 1  ;;  %v266_v5 = vrot.slane %v265_v0, 1  ;;  %v280_v9 = vrot.slane %v279_v4, 1 }
  0x14   :  { %113 = vst [vmem:[#allocation1 + $0x8] sm:$0xff] %v112_v25  ;;  %v256_v62 = vld [vmem:[#allocation0 + $0xbf] ss:$-1 sm:$0xff]  ;;  %v243_v63 = vrot.slane %v242_v58, 1  ;;  %v293_v8 = vld [vmem:[#allocation0 + $0xe7] ss:$-1 sm:$0xff] }
  0x15   :  { %121 = vst.msk [vmem:[#allocation1 + $0x8] sm:$0xff] %vm106_vm0, %v117_v27  ;;  %v270_v2 = vld [vmem:[#allocation0 + $0xcf] ss:$-1 sm:$0xff]  ;;  %v257_v3 = vrot.slane %v256_v62, 1  ;;  %v307_v12 = vld [vmem:[#allocation0 + $0xf7] ss:$-1 sm:$0xff] }
  0x16   :  { %127 = vst [vmem:[#allocation1 + $0x10] sm:$0xff] %v126_v29  ;;  %v284_v6 = vld [vmem:[#allocation0 + $0xdf] ss:$-1 sm:$0xff]  ;;  %v271_v7 = vrot.slane %v270_v2, 1  ;;  %v294_v13 = vrot.slane %v293_v8, 1  ;;  %v308_v16 = vrot.slane %v307_v12, 1 }
  0x17   :  { %135 = vst.msk [vmem:[#allocation1 + $0x10] sm:$0xff] %vm106_vm0, %v131_v31  ;;  %v298_v10 = vld [vmem:[#allocation0 + $0xef] ss:$-1 sm:$0xff]  ;;  %v285_v11 = vrot.slane %v284_v6, 1 }
  0x18   :  { %141 = vst [vmem:[#allocation1 + $0x18] sm:$0xff] %v140_v33  ;;  %v312_v14 = vld [vmem:[#allocation0 + $0xff] ss:$-1 sm:$0xff]  ;;  %v299_v15 = vrot.slane %v298_v10, 1 }
  0x19   :  { %149 = vst.msk [vmem:[#allocation1 + $0x18] sm:$0xff] %vm106_vm0, %v145_v35  ;;  %v313_v18 = vrot.slane %v312_v14, 1 }
  0x1a   :  { %155 = vst [vmem:[#allocation1 + $0x20] sm:$0xff] %v154_v37  ;;  %v376_v19 = vld [vmem:[#allocation1] sm:$0xff] }
  0x1b   :  { %163 = vst.msk [vmem:[#allocation1 + $0x20] sm:$0xff] %vm106_vm0, %v159_v39 }
  0x1c   :  { %169 = vst [vmem:[#allocation1 + $0x28] sm:$0xff] %v168_v41  ;;  %v378_v20 = vld [vmem:[#allocation1 + $0x8] sm:$0xff] }
  0x1d   :  { %177 = vst.msk [vmem:[#allocation1 + $0x28] sm:$0xff] %vm106_vm0, %v173_v43 }
  0x1e   :  { %183 = vst [vmem:[#allocation1 + $0x30] sm:$0xff] %v182_v45  ;;  %v380_v17 = vld [vmem:[#allocation1 + $0x10] sm:$0xff] }
  0x1f   :  { %191 = vst.msk [vmem:[#allocation1 + $0x30] sm:$0xff] %vm106_vm0, %v187_v47 }
  0x20   :  { %197 = vst [vmem:[#allocation1 + $0x38] sm:$0xff] %v196_v49  ;;  %v382_v21 = vld [vmem:[#allocation1 + $0x18] sm:$0xff] }
  0x21   :  { %205 = vst.msk [vmem:[#allocation1 + $0x38] sm:$0xff] %vm106_vm0, %v201_v51 }
  0x22   :  { %211 = vst [vmem:[#allocation1 + $0x40] sm:$0xff] %v210_v53  ;;  %v384_v22 = vld [vmem:[#allocation1 + $0x20] sm:$0xff] }
  0x23   :  { %219 = vst.msk [vmem:[#allocation1 + $0x40] sm:$0xff] %vm106_vm0, %v215_v55 }
  0x24   :  { %225 = vst [vmem:[#allocation1 + $0x48] sm:$0xff] %v224_v57  ;;  %v386_v23 = vld [vmem:[#allocation1 + $0x28] sm:$0xff] }
  0x25   :  { %233 = vst.msk [vmem:[#allocation1 + $0x48] sm:$0xff] %vm106_vm0, %v229_v59 }
  0x26   :  { %239 = vst [vmem:[#allocation1 + $0x50] sm:$0xff] %v238_v61  ;;  %v388_v24 = vld [vmem:[#allocation1 + $0x30] sm:$0xff] }
  0x27   :  { %247 = vst.msk [vmem:[#allocation1 + $0x50] sm:$0xff] %vm106_vm0, %v243_v63 }
  0x28   :  { %253 = vst [vmem:[#allocation1 + $0x58] sm:$0xff] %v252_v1  ;;  %v390_v25 = vld [vmem:[#allocation1 + $0x38] sm:$0xff] }
  0x29   :  { %261 = vst.msk [vmem:[#allocation1 + $0x58] sm:$0xff] %vm106_vm0, %v257_v3 }
  0x2a   :  { %267 = vst [vmem:[#allocation1 + $0x60] sm:$0xff] %v266_v5  ;;  %v392_v26 = vld [vmem:[#allocation1 + $0x40] sm:$0xff] }
  0x2b   :  { %275 = vst.msk [vmem:[#allocation1 + $0x60] sm:$0xff] %vm106_vm0, %v271_v7 }
  0x2c   :  { %281 = vst [vmem:[#allocation1 + $0x68] sm:$0xff] %v280_v9  ;;  %v394_v27 = vld [vmem:[#allocation1 + $0x48] sm:$0xff] }
  0x2d   :  { %289 = vst.msk [vmem:[#allocation1 + $0x68] sm:$0xff] %vm106_vm0, %v285_v11 }
  0x2e   :  { %295 = vst [vmem:[#allocation1 + $0x70] sm:$0xff] %v294_v13  ;;  %v396_v28 = vld [vmem:[#allocation1 + $0x50] sm:$0xff] }
  0x2f   :  { %303 = vst.msk [vmem:[#allocation1 + $0x70] sm:$0xff] %vm106_vm0, %v299_v15 }
  0x30   :  { %309 = vst [vmem:[#allocation1 + $0x78] sm:$0xff] %v308_v16  ;;  %v398_v29 = vld [vmem:[#allocation1 + $0x58] sm:$0xff] }
  0x31   :  { %317 = vst.msk [vmem:[#allocation1 + $0x78] sm:$0xff] %vm106_vm0, %v313_v18 }
  0x32   :  { %377 = vst [vmem:[%s607_s1] sm:$0xff] %v376_v19  ;;  %v400_v30 = vld [vmem:[#allocation1 + $0x60] sm:$0xff] }
  0x33   :  { %379 = vst [vmem:[%s607_s1 + $0x8] sm:$0xff] %v378_v20 }
  0x34   :  { %381 = vst [vmem:[%s607_s1 + $0x10] sm:$0xff] %v380_v17  ;;  %v402_v31 = vld [vmem:[#allocation1 + $0x68] sm:$0xff] }
  0x35   :  { %383 = vst [vmem:[%s607_s1 + $0x18] sm:$0xff] %v382_v21 }
  0x36   :  { %385 = vst [vmem:[%s607_s1 + $0x20] sm:$0xff] %v384_v22  ;;  %v404_v32 = vld [vmem:[#allocation1 + $0x70] sm:$0xff] }
  0x37   :  { %387 = vst [vmem:[%s607_s1 + $0x28] sm:$0xff] %v386_v23 }
  0x38   :  { %389 = vst [vmem:[%s607_s1 + $0x30] sm:$0xff] %v388_v24  ;;  %v406_v33 = vld [vmem:[#allocation1 + $0x78] sm:$0xff] }
  0x39   :  { %391 = vst [vmem:[%s607_s1 + $0x38] sm:$0xff] %v390_v25 }
  0x3a   :  { %393 = vst [vmem:[%s607_s1 + $0x40] sm:$0xff] %v392_v26 }
  0x3b   :  { %395 = vst [vmem:[%s607_s1 + $0x48] sm:$0xff] %v394_v27 }
  0x3c   :  { %397 = vst [vmem:[%s607_s1 + $0x50] sm:$0xff] %v396_v28 }
  0x3d   :  { %399 = vst [vmem:[%s607_s1 + $0x58] sm:$0xff] %v398_v29 }
  0x3e   :  { %401 = vst [vmem:[%s607_s1 + $0x60] sm:$0xff] %v400_v30 }
  0x3f   :  { %403 = vst [vmem:[%s607_s1 + $0x68] sm:$0xff] %v402_v31 }
  0x40   :  { %405 = vst [vmem:[%s607_s1 + $0x70] sm:$0xff] %v404_v32 }
  0x41   :  { %407 = vst [vmem:[%s607_s1 + $0x78] sm:$0xff] %v406_v33 }

// kernel: spi_attention.5
= control target key start
LH: loop header
LB: loop body
LE: loop exit
PB: predicated region body
PF: predicated region fallthrough
CT: control target
= control target key end

     0   :  { %s3959_s27 = smov 0   ;;  %s4397_s0 = inlined_call_operand.vmem [shape: f32[2,8,256], index: 0, kind: input, shape index: {}]   ;;  %s4398_s1 = inlined_call_operand.vmem [shape: f32[2,8,256], index: 1, kind: input, shape index: {}]   ;;  %s4399_s2 = inlined_call_operand.vmem [shape: f32[2,8,256], index: 2, kind: input, shape index: {}]   ;;  %s4400_s3 = inlined_call_operand.vmem [shape: f32[8,8], index: 3, kind: input, shape index: {}]   ;;  %s4401_s4 = inlined_call_operand.vmem [shape: f32[8,1], index: 4, kind: input, shape index: {}]   ;;  %s4402_s5 = inlined_call_operand.vmem [shape: f32[9,8,8], index: 5, kind: input, shape index: {}]   ;;  %s4403_s6 = inlined_call_operand.vmem [shape: f32[8,1], index: 6, kind: input, shape index: {}]   ;;  %s4404_s7 = inlined_call_operand.vmem [shape: f32[9,8,8], index: 7, kind: input, shape index: {}]   ;;  %s4405_s8 = inlined_call_operand.vmem [shape: f32[8,1], index: 8, kind: input, shape index: {}]   ;;  %s4406_s9 = inlined_call_operand.vmem [shape: f32[9,8,8], index: 9, kind: input, shape index: {}]   ;;  %s4407_s10 = inlined_call_operand.vmem [shape: f32[8,1], index: 10, kind: input, shape index: {}]   ;;  %s4408_s11 = inlined_call_operand.vmem [shape: f32[8,1], index: 11, kind: input, shape index: {}]   ;;  %s4409_s12 = inlined_call_operand.<no memory space> [shape: f32[1,1], index: 12, kind: input, shape index: {}]   ;;  %s4410_s13 = inlined_call_operand.vmem [shape: f32[8,1], index: 13, kind: input, shape index: {}]   ;;  %s4411_s14 = inlined_call_operand.vmem [shape: f32[8,1], index: 14, kind: input, shape index: {}]   ;;  %s4412_s15 = inlined_call_operand.vmem [shape: f32[1,8], index: 15, kind: input, shape index: {}]   ;;  %s4413_s19 = inlined_call_operand.vmem [shape: f32[1,324], index: 19, kind: input, shape index: {}]   ;;  %s4414_s20 = inlined_call_operand.vmem [shape: f32[2,8,256], index: 20, kind: output, shape index: {}]   ;;  %s4415_s16 = inlined_call_operand.<no memory space> [shape: f32[1,1], index: 16, kind: input, shape index: {}]   ;;  %s4416_s17 = inlined_call_operand.<no memory space> [shape: f32[1,1], index: 17, kind: input, shape index: {}]   ;;  %s4417_s18 = inlined_call_operand.<no memory space> [shape: f32[1,1], index: 18, kind: input, shape index: {}]  }
   0x1   :  { %4420 = sst [smem:[#allocation9_spill]] %s4397_s0  ;;  %v25_v0 = vstv %s4409_s12  ;;  %v27_v1 = vstv %s4415_s16  ;;  %v29_v2 = vstv %s4416_s17  ;;  %v31_v3 = vstv %s4417_s18 }
   0x2   :  { %4421 = sst [smem:[#allocation10_spill]] %s4398_s1  ;;  %26 = vst [vmem:[#allocation5] sm:$0x1] %v25_v0 }
   0x3   :  { %4422 = sst [smem:[#allocation11_spill]] %s4399_s2  ;;  %28 = vst [vmem:[#allocation6] sm:$0x1] %v27_v1 }
   0x4   :  { %4423 = sst [smem:[#allocation12_spill]] %s4400_s3  ;;  %30 = vst [vmem:[#allocation7] sm:$0x1] %v29_v2 }
   0x5   :  { %4424 = sst [smem:[#allocation13_spill]] %s4401_s4  ;;  %32 = vst [vmem:[#allocation8] sm:$0x1] %v31_v3 }
   0x6 LB: > { %s3498_s12 = sadd.s32 4294967295, %s3803_s27   ;;  %p3502_p0 = scmp.ge.s32.totalorder %s3803_s27, 1  ;;  %s3803_s27 = sphi %s3959_s27, %s38_s27  }
   0x7   : > { %p590_p1 = scmp.lt.s32.totalorder %s3803_s27, 3 }
   0x9   : > { %p591_p2 = pnand %p3502_p0, %p590_p1 }
   0xa   : > { %p658_p3 = scmp.lt.s32.totalorder (!%p591_p2), %s3498_s12, 1  ;;  %s4425_s18 = sld [smem:[#allocation13_spill]] (!%p591_p2) }
   0xb   : > { %594 = sbr.rel (%p591_p2) target bundleno = 2686 (0xa7e), region = 100  ;;  %s4426_s30 = sld [smem:[#allocation9_spill]] (!%p591_p2) }
   0xc   : > { %s4427_s22 = sld [smem:[#allocation12_spill]] (!%p591_p2)  ;;  %s3806_s17 = smov (!%p591_p2), 38  }
   0xd   : > { %s4428_s2 = sld [smem:[#allocation10_spill]] (!%p591_p2)  ;;  %s3808_s4 = smov (!%p591_p2), 48  }
   0xe   : > { %s3809_s29 = smov (!%p591_p2), 54   ;;  %s4419_s21 = smov (!%p591_p2), 62  }
   0xf   : > { %s3814_s1 = smov (!%p591_p2), 56   ;;  %s3816_s23 = smov (!%p591_p2), 64  }
  0x10   : > { %v692_v4 = vld [vmem:[%s4425_s18] sm:$0xff]  ;;  %v3805_v5 = vmov 0   ;;  %s4433_s12 = smov (!%p658_p3, %s3498_s12), 1  ;;  %vm698_vm0 = vcmask 64512   ;;  %s3807_s18 = smov 50   ;;  %v3812_v24 = vmov 0.0  }
  0x11   : > { %3658 = vset.pattern.permute.xlu0 %v3805_v5  ;;  %3774 = vset.pattern.permute.xlu2 %v3805_v5  ;;  %s3970_s28 = sshll.u32 %s4433_s12, 4  ;;  %s4429_s12 = sld [smem:[#allocation11_spill]]  ;;  %679 = vst [vmem:[#allocation2] sm:$0xff] %v3812_v24  ;;  %vm681_vm1 = vcmask 867328   ;;  %vm756_vm2 = vcmask 441648   ;;  %vm819_vm3 = vcmask 113664  }
  0x12   : > { %695 = vperm.xlu0 %3658, %v692_v4   ;;  %3775 = vset.pattern.permute.xlu1 %v3805_v5  ;;  %s662_s0 = scalar_lea.vmem %s4426_s30, %s3970_s28  ;;  %v689_v6 = vld [vmem:[%s4427_s22] sm:$0xff]  ;;  %s3810_s30 = smov 52   ;;  %680 = vst [vmem:[#allocation2 + $0x8] sm:$0xff] %v3812_v24  ;;  %vm824_vm4 = vcmask 261248   ;;  %vm781_vm5 = vcmask 130048   ;;  %vm786_vm6 = vcmask 277648  }
  0x13   : > { %v690_v7 = vld [vmem:[%s662_s0] sm:$0xff]  ;;  %v691_v8 = vld [vmem:[%s662_s0 + $0x8] sm:$0xff]  ;;  %s667_s25 = scalar_lea.vmem %s4428_s2, %s3970_s28  ;;  %s3811_s0 = smov 40   ;;  %683 = vst [vmem:[#allocation3] sm:$0xff] %v3812_v24  ;;  %vm829_vm7 = vcmask 408848   ;;  %vm791_vm8 = vcmask 425248  }
  0x14   : > { %717 = vmatpush.msra.mxu0 %v690_v7  ;;  %737 = vmatpush.msra.mxu1 %v691_v8  ;;  %v742_v11 = vld [vmem:[%s667_s25] sm:$0xff]  ;;  %v743_v17 = vld [vmem:[%s667_s25 + $0x8] sm:$0xff]  ;;  %686 = vst [vmem:[#allocation4] sm:$0xff] %v3812_v24  ;;  %s3815_s22 = smov 42   ;;  %s3817_s24 = smov 58   ;;  %vm761_vm9 = vcmask 589248  }
  0x15   : > { %3511 = vmatmul.msk.f32.vlgmr.msra.gmra.mxu0 %vm698_vm0, %v689_v6  ;;  %3512 = vmatmul.msk.f32.vlgmr.msra.gmra.mxu1 %vm698_vm0, %v689_v6  ;;  %s3818_s2 = smov 44   ;;  %s3819_s25 = smov 66   ;;  %682 = vst.msk [vmem:[#allocation2 + $0x10] sm:$0xff] %vm681_vm1, %v3812_v24  ;;  %vm797_vm10 = vcmask 572848   ;;  %vm802_vm11 = vcmask 720448   ;;  %vm766_vm12 = vcmask 736848  }
  0x16   : > { %s4418_s3 = smov 60   ;;  %s3821_s26 = smov 46   ;;  %685 = vst.msk [vmem:[#allocation3 + $0x10] sm:$0xff] %vm681_vm1, %v3812_v24  ;;  %vm807_vm13 = vcmask 868048   ;;  %vm771_vm14 = vcmask 884448   ;;  %vm812_vm15 = vcmask 1015648  }
  0x17   : > { %s672_s16 = scalar_lea.vmem %s4429_s12, %s3970_s28  ;;  %s3822_s12 = smov 68   ;;  %688 = vst.msk [vmem:[#allocation4 + $0x10] sm:$0xff] %vm681_vm1, %v3812_v24  ;;  %vm817_vm1 = vcmask 1048560   ;;  %v845_v46 = vld [vmem:[%s4403_s6] sm:$0xff]  ;;  %v837_v52 = vld [vmem:[%s4402_s5 + $0x8] sm:$0xff]  ;;  %v838_v4 = vld [vmem:[%s4402_s5 + $0x10] sm:$0xff] }
  0x18   : > { %v746_v14 = vld [vmem:[%s672_s16] sm:$0xff]  ;;  %v747_v21 = vld [vmem:[%s672_s16 + $0x8] sm:$0xff]  ;;  %s3823_s16 = smov 126  }
  0x19   : > { %v836_v47 = vld [vmem:[%s4402_s5] sm:$0xff] }
  0x84   : > { %v696_v9 = vpop.permute.xlu0 %695 }
  0x92   : > { %v719_v10 = vpop.f32.mrf.mxu0  ;;  %v739_v12 = vpop.f32.mrf.mxu1 }
  0x93   : > { %v720_v13 = vadd.f32 %v719_v10, %v696_v9  ;;  %v740_v16 = vadd.f32 %v739_v12, %v696_v9 }
  0x95   : > { %v744_v15 = vadd.f32 %v742_v11, %v720_v13  ;;  %v745_v20 = vadd.f32 %v743_v17, %v740_v16  ;;  %v840_v16 = vld [vmem:[%s4402_s5 + $0x20] sm:$0xff] }
  0x97   : > { %v748_v18 = vmul.f32 %v746_v14, %v744_v15  ;;  %v749_v22 = vmul.f32 %v747_v21, %v745_v20 }
  0x99   : > { %v750_v19 = vadd.f32 %v748_v18, %v746_v14  ;;  %v751_v23 = vadd.f32 %v749_v22, %v747_v21  ;;  %v839_v14 = vld [vmem:[%s4402_s5 + $0x18] sm:$0xff] }
  0x9b   : > { %753 = vrot.lane.b32.xlu2 %v750_v19, %s3806_s17  ;;  %783 = vrot.lane.b32.xlu1 %v750_v19, %s3807_s18  ;;  %s3824_s17 = smov 127   ;;  %s3825_s18 = smov 110  }
  0x9c   : > { %778 = vrot.lane.b32.xlu0 %v750_v19, %s3808_s4  ;;  %s3826_s4 = smov 108  }
  0xa3   : > { %794 = vrot.lane.b32.xlu2 %v751_v23, %s3809_s29  ;;  %788 = vrot.lane.b32.xlu1 %v750_v19, %s3810_s30  ;;  %s3827_s29 = smov 109   ;;  %s3828_s30 = smov 91  }
  0xa4   : > { %758 = vrot.lane.b32.xlu0 %v750_v19, %s3811_s0  ;;  %s3829_s0 = smov 92  }
  0xab   : > { %814 = vrot.lane.b32.xlu2 %v751_v23, %s4419_s21  ;;  %799 = vrot.lane.b32.xlu1 %v751_v23, %s3814_s1  ;;  %s3830_s1 = smov 90   ;;  %s3834_s21 = smov 82  }
  0xac   : > { %763 = vrot.lane.b32.xlu0 %v750_v19, %s3815_s22  ;;  %s3838_s22 = smov 80  }
  0xb3   : > { %821 = vrot.lane.b32.xlu2 %v751_v23, %s3816_s23  ;;  %804 = vrot.lane.b32.xlu1 %v751_v23, %s3817_s24  ;;  %s3839_s24 = smov 86  }
  0xb4   : > { %768 = vrot.lane.b32.xlu0 %v750_v19, %s3818_s2  ;;  %s3831_s2 = smov 19  }
  0xbb   : > { %826 = vrot.lane.b32.xlu2 %v751_v23, %s3819_s25  ;;  %809 = vrot.lane.b32.xlu1 %v751_v23, %s4418_s3  ;;  %s3837_s3 = smov 70  }
  0xbc   : > { %773 = vrot.lane.b32.xlu0 %v750_v19, %s3821_s26  ;;  %s3833_s26 = smov 84  }
  0xc3   : > { %831 = vrot.lane.b32.xlu1 %v751_v23, %s3822_s12  ;;  %v841_v23 = vld [vmem:[%s4402_s5 + $0x28] sm:$0xff] }
  0xf5   : > { %v754_v25 = vpop.permute.xlu2 %753 }
  0xf6   : > { %757 = vst.msk [vmem:[#allocation2] sm:$0xff] %vm756_vm2, %v754_v25  ;;  %vm776_vm2 = vcmask 1032048  }
  0xfd   : > { %v795_v26 = vpop.permute.xlu2 %794 }
 0x105   : > { %v815_v27 = vpop.permute.xlu2 %814 }
 0x106   : > { %820 = vst.msk [vmem:[#allocation2 + $0x10] sm:$0xff] %vm819_vm3, %v815_v27  ;;  %vm834_vm3 = vcmask 556448  }
 0x10d   : > { %v822_v28 = vpop.permute.xlu2 %821  ;;  %v784_v29 = vpop.permute.xlu1 %783 }
 0x10e   : > { %825 = vst.msk [vmem:[#allocation2 + $0x10] sm:$0xff] %vm824_vm4, %v822_v28  ;;  %v779_v30 = vpop.permute.xlu0 %778 }
 0x10f   : > { %782 = vst.msk [vmem:[#allocation2 + $0x8] sm:$0xff] %vm781_vm5, %v779_v30 }
 0x110   : > { %787 = vst.msk [vmem:[#allocation2 + $0x8] sm:$0xff] %vm786_vm6, %v784_v29  ;;  %vm858_vm6 = vcmask 1039360  }
 0x115   : > { %v827_v31 = vpop.permute.xlu2 %826  ;;  %v789_v32 = vpop.permute.xlu1 %788 }
 0x116   : > { %830 = vst.msk [vmem:[#allocation2 + $0x10] sm:$0xff] %vm829_vm7, %v827_v31  ;;  %v759_v33 = vpop.permute.xlu0 %758  ;;  %vm996_vm7 = vcmask 1031168  }
 0x117   : > { %792 = vst.msk [vmem:[#allocation2 + $0x8] sm:$0xff] %vm791_vm8, %v789_v32  ;;  %vm1074_vm8 = vcmask 900096  }
 0x118   : > { %762 = vst.msk [vmem:[#allocation2] sm:$0xff] %vm761_vm9, %v759_v33  ;;  %vm1152_vm9 = vcmask 891904   ;;  %v842_v33 = vld [vmem:[%s4402_s5 + $0x30] sm:$0xff] }
 0x119   : > { %798 = vst.msk [vmem:[#allocation2 + $0x8] sm:$0xff] %vm797_vm10, %v795_v26  ;;  %vm1230_vm10 = vcmask 883712  }
 0x11d   : > { %v800_v34 = vpop.permute.xlu1 %799 }
 0x11e   : > { %803 = vst.msk [vmem:[#allocation2 + $0x8] sm:$0xff] %vm802_vm11, %v800_v34  ;;  %v764_v35 = vpop.permute.xlu0 %763  ;;  %vm1386_vm11 = vcmask 744448  }
 0x11f   : > { %767 = vst.msk [vmem:[#allocation2] sm:$0xff] %vm766_vm12, %v764_v35  ;;  %vm1308_vm12 = vcmask 752640  }
 0x125   : > { %v805_v36 = vpop.permute.xlu1 %804 }
 0x126   : > { %808 = vst.msk [vmem:[#allocation2 + $0x8] sm:$0xff] %vm807_vm13, %v805_v36  ;;  %v769_v37 = vpop.permute.xlu0 %768  ;;  %vm1464_vm13 = vcmask 736256  }
 0x127   : > { %772 = vst.msk [vmem:[#allocation2] sm:$0xff] %vm771_vm14, %v769_v37  ;;  %vm1563_vm14 = vcmask 154624  }
 0x12d   : > { %v810_v38 = vpop.permute.xlu1 %809 }
 0x12e   : > { %813 = vst.msk [vmem:[#allocation2 + $0x8] sm:$0xff] %vm812_vm15, %v810_v38  ;;  %v774_v39 = vpop.permute.xlu0 %773  ;;  %v843_v38 = vld [vmem:[%s4402_s5 + $0x38] sm:$0xff]  ;;  %vm1572_vm15 = vcmask 711680  }
 0x12f   : > { %818 = vst.msk [vmem:[#allocation2 + $0x8] sm:$0xff] %vm817_vm1, %v815_v27  ;;  %vm1569_vm1 = vcmask 1047704  }
 0x130   : > { %777 = vst.msk [vmem:[#allocation2] sm:$0xff] %vm776_vm2, %v774_v39  ;;  %v844_v39 = vld [vmem:[%s4402_s5 + $0x40] sm:$0xff]  ;;  %vm3041_vm2 = vcmask 556032  }
 0x135   : > { %v832_v40 = vpop.permute.xlu1 %831 }
 0x136   : > { %835 = vst.msk [vmem:[#allocation2 + $0x10] sm:$0xff] %vm834_vm3, %v832_v40  ;;  %v847_v41 = vld [vmem:[#allocation2 + $0x8] sm:$0xff]  ;;  %vm3049_vm3 = vcmask 7168  }
 0x137   : > { %v846_v42 = vld [vmem:[#allocation2] sm:$0xff] }
 0x138   : > { %945 = vmatpush.msrb.mxu1 %v846_v42  ;;  %v3664_v43 = vpack.i.bf16 %v847_v41, %v846_v42 }
 0x139   : > { %3516 = vmatmul.msk.f32.vlgmr.msrb.gmra.mxu1 %vm698_vm0, %v836_v47 }
 0x13a   : > { %3665 = vrot.lane.b32.xlu1 %v3664_v43, %s3823_s16  ;;  %3660 = vrot.lane.b32.xlu2 %v3664_v43, %s3824_s17 }
 0x13d   : > { %v848_v44 = vld [vmem:[#allocation2 + $0x10] sm:$0xff] }
 0x13e   : > { %856 = vrot.lane.b32.xlu0 %v848_v44, %s3824_s17  ;;  %v3679_v45 = vpack.i.bf16 %v848_v44, %v847_v41 }
 0x142   : > { %1072 = vrot.lane.b32.xlu1 %v848_v44, %s3825_s18  ;;  %3670 = vrot.lane.b32.xlu2 %v3664_v43, %s3825_s18 }
 0x146   : > { %994 = vrot.lane.b32.xlu0 %v848_v44, %s3823_s16 }
 0x14a   : > { %3680 = vrot.lane.b32.xlu1 %v3679_v45, %s3826_s4  ;;  %3675 = vrot.lane.b32.xlu2 %v3664_v43, %s3827_s29 }
 0x14e   : > { %1150 = vrot.lane.b32.xlu0 %v848_v44, %s3827_s29 }
 0x152   : > { %3690 = vrot.lane.b32.xlu1 %v3664_v43, %s3828_s30  ;;  %1224 = vrot.lane.b32.xlu2 %v846_v42, %s3826_s4 }
 0x156   : > { %3685 = vrot.lane.b32.xlu0 %v3664_v43, %s3829_s0 }
 0x15a   : > { %3695 = vrot.lane.b32.xlu1 %v3664_v43, %s3830_s1  ;;  %1306 = vrot.lane.b32.xlu2 %v848_v44, %s3829_s0 }
 0x15e   : > { %1384 = vrot.lane.b32.xlu0 %v848_v44, %s3828_s30 }
 0x162   : > { %1462 = vrot.lane.b32.xlu2 %v848_v44, %s3830_s1 }
 0x166   : > { %1538 = vperm.xlu0 %3658, %v845_v46  }
 0x194   : > { %v3661_v48 = vpop.permute.xlu2 %3660 }
 0x195   : > { %v3663_v49 = vunpack.i.h.bf16 %v3661_v48  ;;  %v3662_v50 = vunpack.i.l.bf16 %v3661_v48 }
 0x197   : > { %v859_v51 = vsel %vm858_vm6, %v3662_v50, %v3663_v49 }
 0x198   : > { %882 = vmatpush.msra.mxu2 %v859_v51 }
 0x199   : > { %3513 = vmatmul.msk.f32.vlgmr.msra.gmra.mxu2 %vm698_vm0, %v837_v52 }
 0x19a   : > { %965 = vmatpush.msrb.mxu2 %v847_v41 }
 0x19c   : > { %v3671_v53 = vpop.permute.xlu2 %3670 }
 0x19d   : > { %v3673_v58 = vunpack.i.h.bf16 %v3671_v53  ;;  %v3672_v59 = vunpack.i.l.bf16 %v3671_v53 }
 0x19f   : > { %v1075_v0 = vsel %vm1074_vm8, %v3672_v59, %v3673_v58 }
 0x1a1   : > { %3517 = vmatmul.msk.f32.vlgmr.msrb.gmra.mxu2 %vm698_vm0, %v836_v47 }
 0x1a4   : > { %v3676_v57 = vpop.permute.xlu2 %3675 }
 0x1a5   : > { %v3678_v2 = vunpack.i.h.bf16 %v3676_v57  ;;  %v3677_v3 = vunpack.i.l.bf16 %v3676_v57 }
 0x1a7   : > { %v1153_v8 = vsel %vm1152_vm9, %v3677_v3, %v3678_v2 }
 0x1ac   : > { %v3666_v54 = vpop.permute.xlu1 %3665  ;;  %v1225_v6 = vpop.permute.xlu2 %1224 }
 0x1ad   : > { %v3668_v55 = vunpack.i.h.bf16 %v3666_v54  ;;  %v3667_v56 = vunpack.i.l.bf16 %v3666_v54 }
 0x1af   : > { %v997_v62 = vsel %vm996_vm7, %v3667_v56, %v3668_v55 }
 0x1b0   : > { %v857_v60 = vpop.permute.xlu0 %856 }
 0x1b1   : > { %922 = vmatpush.msrb.mxu0 %v857_v60  ;;  %v860_v61 = vsel %vm858_vm6, %v3663_v49, %v857_v60 }
 0x1b2   : > { %902 = vmatpush.msra.mxu3 %v860_v61  ;;  %3515 = vmatmul.msk.f32.vlgmr.msrb.gmra.mxu0 %vm698_vm0, %v837_v52 }
 0x1b3   : > { %1020 = vmatpush.msra.mxu0 %v997_v62  ;;  %3514 = vmatmul.msk.f32.vlgmr.msra.gmra.mxu3 %vm698_vm0, %v837_v52 }
 0x1b4   : > { %v1073_v63 = vpop.permute.xlu1 %1072  ;;  %985 = vmatpush.msrb.mxu3 %v848_v44  ;;  %v1307_v18 = vpop.permute.xlu2 %1306 }
 0x1b5   : > { %v1076_v1 = vsel %vm1074_vm8, %v3673_v58, %v1073_v63 }
 0x1b6   : > { %1098 = vmatpush.msra.mxu3 %v1075_v0  ;;  %1118 = vmatpush.msrb.mxu0 %v1076_v1  ;;  %v947_v42 = vpop.f32.mrf.mxu1 }
 0x1b8   : > { %v995_v5 = vpop.permute.xlu0 %994 }
 0x1b9   : > { %v998_v7 = vsel %vm996_vm7, %v3668_v55, %v995_v5  ;;  %1060 = vmatpush.msra.mxu2 %v995_v5 }
 0x1ba   : > { %3519 = vmatmul.msk.f32.vlgmr.msra.gmra.mxu0 %vm698_vm0, %v838_v4  ;;  %1040 = vmatpush.msra.mxu1 %v998_v7 }
 0x1bb   : > { %3521 = vmatmul.msk.f32.vlgmr.msra.gmra.mxu2 %vm698_vm0, %v838_v4  ;;  %3518 = vmatmul.msk.f32.vlgmr.msrb.gmra.mxu3 %vm698_vm0, %v836_v47 }
 0x1bc   : > { %1176 = vmatpush.msrb.mxu2 %v1153_v8  ;;  %v3681_v9 = vpop.permute.xlu1 %3680  ;;  %3520 = vmatmul.msk.f32.vlgmr.msra.gmra.mxu1 %vm698_vm0, %v838_v4  ;;  %v1463_v36 = vpop.permute.xlu2 %1462 }
 0x1bd   : > { %v3683_v10 = vunpack.i.h.bf16 %v3681_v9  ;;  %v3682_v11 = vunpack.i.l.bf16 %v3681_v9  ;;  %1138 = vmatpush.msrb.mxu1 %v1073_v63 }
 0x1bf   : > { %v1231_v12 = vsel %vm1230_vm10, %v1225_v6, %v3682_v11  ;;  %v1232_v13 = vsel %vm1230_vm10, %v3682_v11, %v3683_v10 }
 0x1c0   : > { %1254 = vmatpush.msra.mxu1 %v1231_v12  ;;  %1274 = vmatpush.msra.mxu2 %v1232_v13  ;;  %v1151_v15 = vpop.permute.xlu0 %1150 }
 0x1c1   : > { %v1154_v17 = vsel %vm1152_vm9, %v3678_v2, %v1151_v15  ;;  %1216 = vmatpush.msra.mxu0 %v1151_v15  ;;  %v678_v15 = vld [vmem:[%s4413_s19] sm:$0x7] }
 0x1c2   : > { %3523 = vmatmul.msk.f32.vlgmr.msrb.gmra.mxu0 %vm698_vm0, %v839_v14  ;;  %1196 = vmatpush.msrb.mxu3 %v1154_v17 }
 0x1c3   : > { %3525 = vmatmul.msk.f32.vlgmr.msrb.gmra.mxu2 %vm698_vm0, %v840_v16  ;;  %3522 = vmatmul.msk.f32.vlgmr.msra.gmra.mxu3 %vm698_vm0, %v839_v14 }
 0x1c4   : > { %1372 = vmatpush.msrb.mxu2 %v1307_v18  ;;  %v3691_v19 = vpop.permute.xlu1 %3690  ;;  %1294 = vmatpush.msra.mxu3 %v3683_v10 }
 0x1c5   : > { %3524 = vmatmul.msk.f32.vlgmr.msrb.gmra.mxu1 %vm698_vm0, %v839_v14  ;;  %v3693_v20 = vunpack.i.h.bf16 %v3691_v19  ;;  %v3692_v21 = vunpack.i.l.bf16 %v3691_v19 }
 0x1c7   : > { %v1387_v26 = vsel %vm1386_vm11, %v3692_v21, %v3693_v20 }
 0x1c8   : > { %v3686_v22 = vpop.permute.xlu0 %3685 }
 0x1c9   : > { %v3688_v24 = vunpack.i.h.bf16 %v3686_v22  ;;  %v3687_v25 = vunpack.i.l.bf16 %v3686_v22 }
 0x1ca   : > { %3527 = vmatmul.msk.f32.vlgmr.msra.gmra.mxu0 %vm698_vm0, %v840_v16 }
 0x1cb   : > { %3526 = vmatmul.msk.f32.vlgmr.msrb.gmra.mxu3 %vm698_vm0, %v840_v16  ;;  %v1309_v27 = vsel %vm1308_vm12, %v3687_v25, %v3688_v24  ;;  %v1310_v28 = vsel %vm1308_vm12, %v3688_v24, %v1307_v18  ;;  %3529 = vmatmul.msk.f32.vlgmr.msra.gmra.mxu2 %vm698_vm0, %v841_v23 }
 0x1cc   : > { %v3696_v29 = vpop.permute.xlu1 %3695  ;;  %1410 = vmatpush.msrb.mxu3 %v1387_v26  ;;  %1332 = vmatpush.msrb.mxu0 %v1309_v27  ;;  %v4090_v26 = vperm.slane %v678_v15, 0 }
 0x1cd   : > { %v3698_v30 = vunpack.i.h.bf16 %v3696_v29  ;;  %v3697_v31 = vunpack.i.l.bf16 %v3696_v29  ;;  %1352 = vmatpush.msrb.mxu1 %v1310_v28 }
 0x1ce   : > { %3528 = vmatmul.msk.f32.vlgmr.msra.gmra.mxu1 %vm698_vm0, %v841_v23 }
 0x1cf   : > { %v1465_v32 = vsel %vm1464_vm13, %v3697_v31, %v3698_v30  ;;  %v1466_v37 = vsel %vm1464_vm13, %v3698_v30, %v1463_v36 }
 0x1d0   : > { %1488 = vmatpush.msra.mxu2 %v1465_v32  ;;  %v1385_v34 = vpop.permute.xlu0 %1384 }
 0x1d1   : > { %v1388_v35 = vsel %vm1386_vm11, %v3693_v20, %v1385_v34  ;;  %1450 = vmatpush.msra.mxu1 %v1385_v34 }
 0x1d2   : > { %3531 = vmatmul.msk.f32.vlgmr.msrb.gmra.mxu0 %vm698_vm0, %v842_v33 }
 0x1d3   : > { %1430 = vmatpush.msra.mxu0 %v1388_v35  ;;  %3530 = vmatmul.msk.f32.vlgmr.msra.gmra.mxu3 %vm698_vm0, %v841_v23  ;;  %v4088_v23 = vperm.slane %v678_v15, 2  ;;  %v4096_v35 = vperm.slane %v678_v15, 1 }
 0x1d4   : > { %1508 = vmatpush.msra.mxu3 %v1466_v37  ;;  %3533 = vmatmul.msk.f32.vlgmr.msrb.gmra.mxu2 %vm698_vm0, %v842_v33 }
 0x1d5   : > { %1528 = vmatpush.msrb.mxu0 %v1463_v36 }
 0x1d6   : > { %3532 = vmatmul.msk.f32.vlgmr.msrb.gmra.mxu1 %vm698_vm0, %v842_v33 }
 0x1d8   : > { %v1539_v24 = vpop.permute.xlu0 %1538 }
 0x1da   : > { %3535 = vmatmul.msk.f32.vlgmr.msra.gmra.mxu0 %vm698_vm0, %v843_v38 }
 0x1db   : > { %3534 = vmatmul.msk.f32.vlgmr.msrb.gmra.mxu3 %vm698_vm0, %v843_v38 }
 0x1dc   : > { %3537 = vmatmul.msk.f32.vlgmr.msra.gmra.mxu2 %vm698_vm0, %v844_v39 }
 0x1de   : > { %3536 = vmatmul.msk.f32.vlgmr.msra.gmra.mxu1 %vm698_vm0, %v843_v38 }
 0x1e2   : > { %3539 = vmatmul.msk.f32.vlgmr.msrb.gmra.mxu0 %vm698_vm0, %v844_v39 }
 0x1e3   : > { %3538 = vmatmul.msk.f32.vlgmr.msra.gmra.mxu3 %vm698_vm0, %v844_v39 }
 0x21c   : > { %v884_v40 = vpop.f32.mrf.mxu2 }
 0x21d   : > { %v948_v58 = vadd.f32 %v947_v42, %v884_v40 }
 0x224   : > { %v967_v43 = vpop.f32.mrf.mxu2 }
 0x22f   : > { %v924_v41 = vpop.f32.mrf.mxu0 }
 0x236   : > { %v904_v44 = vpop.f32.mrf.mxu3 }
 0x237   : > { %v1022_v45 = vpop.f32.mrf.mxu0  ;;  %v968_v62 = vadd.f32 %v967_v43, %v904_v44 }
 0x238   : > { %v1065_v61 = vadd.f32 %v1022_v45, %v948_v58  ;;  %v1575_v58 = vld [vmem:[%s4404_s7 + $0x8] sm:$0xff] }
 0x239   : > { %v1042_v46 = vpop.f32.mrf.mxu1 }
 0x23a   : > { %v1066_v4 = vadd.f32 %v1042_v46, %v968_v62 }
 0x23e   : > { %v987_v47 = vpop.f32.mrf.mxu3  ;;  %v1062_v48 = vpop.f32.mrf.mxu2 }
 0x23f   : > { %v1120_v49 = vpop.f32.mrf.mxu0  ;;  %v988_v54 = vadd.f32 %v987_v47, %v924_v41 }
 0x240   : > { %v1144_v9 = vadd.f32 %v1120_v49, %v1066_v4  ;;  %v1574_v49 = vld [vmem:[%s4404_s7] sm:$0xff]  ;;  %v1576_v4 = vld [vmem:[%s4404_s7 + $0x10] sm:$0xff] }
 0x241   : > { %v1067_v59 = vadd.f32 %v1062_v48, %v988_v54  ;;  %v1583_v48 = vld [vmem:[%s4405_s8] sm:$0xff] }
 0x242   : > { %v1140_v50 = vpop.f32.mrf.mxu1 }
 0x243   : > { %v1145_v63 = vadd.f32 %v1140_v50, %v1067_v59 }
 0x246   : > { %v1100_v51 = vpop.f32.mrf.mxu3  ;;  %v1178_v52 = vpop.f32.mrf.mxu2 }
 0x247   : > { %v1218_v53 = vpop.f32.mrf.mxu0  ;;  %v1143_v0 = vadd.f32 %v1100_v51, %v1065_v61 }
 0x248   : > { %v1223_v2 = vadd.f32 %v1218_v53, %v1145_v63 }
 0x249   : > { %v1221_v5 = vadd.f32 %v1178_v52, %v1143_v0 }
 0x24b   : > { %v1256_v55 = vpop.f32.mrf.mxu1 }
 0x24c   : > { %v1299_v11 = vadd.f32 %v1256_v55, %v1221_v5 }
 0x24e   : > { %v1198_v56 = vpop.f32.mrf.mxu3  ;;  %v1276_v57 = vpop.f32.mrf.mxu2 }
 0x24f   : > { %v1334_v60 = vpop.f32.mrf.mxu0  ;;  %v1222_v12 = vadd.f32 %v1198_v56, %v1144_v9 }
 0x250   : > { %v1377_v14 = vadd.f32 %v1334_v60, %v1299_v11 }
 0x251   : > { %v1300_v18 = vadd.f32 %v1276_v57, %v1222_v12 }
 0x253   : > { %v1354_v1 = vpop.f32.mrf.mxu1 }
 0x254   : > { %v1378_v28 = vadd.f32 %v1354_v1, %v1300_v18 }
 0x256   : > { %v1296_v3 = vpop.f32.mrf.mxu3 }
 0x257   : > { %v1301_v6 = vadd.f32 %v1296_v3, %v1223_v2  ;;  %v1432_v7 = vpop.f32.mrf.mxu0  ;;  %v1374_v8 = vpop.f32.mrf.mxu2 }
 0x258   : > { %v1456_v31 = vadd.f32 %v1432_v7, %v1378_v28 }
 0x259   : > { %v1379_v10 = vadd.f32 %v1374_v8, %v1301_v6 }
 0x25b   : > { %v1452_v13 = vpop.f32.mrf.mxu1 }
 0x25c   : > { %v1457_v16 = vadd.f32 %v1452_v13, %v1379_v10 }
 0x25e   : > { %v1412_v17 = vpop.f32.mrf.mxu3 }
 0x25f   : > { %v1455_v19 = vadd.f32 %v1412_v17, %v1377_v14  ;;  %v1530_v20 = vpop.f32.mrf.mxu0  ;;  %v1490_v22 = vpop.f32.mrf.mxu2  ;;  %v1577_v14 = vld [vmem:[%s4404_s7 + $0x18] sm:$0xff] }
 0x260   : > { %v1535_v21 = vadd.f32 %v1530_v20, %v1457_v16  ;;  %v1578_v20 = vld [vmem:[%s4404_s7 + $0x20] sm:$0xff] }
 0x261   : > { %v1533_v25 = vadd.f32 %v1490_v22, %v1455_v19 }
 0x262   : > { %v1543_v27 = vadd.f32 %v1539_v24, %v1535_v21 }
 0x263   : > { %v1541_v29 = vadd.f32 %v1539_v24, %v1533_v25 }
 0x264   : > { %v1553_v30 = vmul.f32 %v4088_v23, %v1543_v27 }
 0x265   : > { %v1551_v32 = vmul.f32 %v4090_v26, %v1541_v29 }
 0x266   : > { %v1510_v33 = vpop.f32.mrf.mxu3  ;;  %1561 = vrot.lane.b32.xlu0 %v1553_v30, %s3831_s2 }
 0x267   : > { %v1534_v34 = vadd.f32 %v1510_v33, %v1456_v31  ;;  %1557 = vrot.lane.b32.xlu1 %v1551_v32, %s3831_s2  ;;  %v1580_v32 = vld [vmem:[%s4404_s7 + $0x30] sm:$0xff] }
 0x269   : > { %v1542_v36 = vadd.f32 %v1539_v24, %v1534_v34  ;;  %v1579_v24 = vld [vmem:[%s4404_s7 + $0x28] sm:$0xff] }
 0x26b   : > { %v1552_v37 = vmul.f32 %v4096_v35, %v1542_v36 }
 0x26d   : > { %1559 = vrot.lane.b32.xlu2 %v1552_v37, %s3831_s2 }
 0x2c7   : > { %v1560_v38 = vpop.permute.xlu2 %1559 }
 0x2d8   : > { %v1562_v39 = vpop.permute.xlu0 %1561 }
 0x2d9   : > { %v1565_v40 = vsel %vm1563_vm14, %v1560_v38, %v1562_v39  ;;  %v1558_v41 = vpop.permute.xlu1 %1557 }
 0x2da   : > { %1573 = vst.msk [vmem:[#allocation3 + $0x10] sm:$0xff] %vm1572_vm15, %v1565_v40  ;;  %v1564_v42 = vsel %vm1563_vm14, %v1558_v41, %v1560_v38  ;;  %v1581_v40 = vld [vmem:[%s4404_s7 + $0x38] sm:$0xff] }
 0x2db   : > { %1570 = vst.msk [vmem:[#allocation3] sm:$0xff] %vm1569_vm1, %v1558_v41 }
 0x2dc   : > { %1571 = vst [vmem:[#allocation3 + $0x8] sm:$0xff] %v1564_v42 }
 0x2e1   : > { %v1586_v43 = vld [vmem:[#allocation3 + $0x10] sm:$0xff] }
 0x2e2   : > { %v1584_v44 = vld [vmem:[#allocation3] sm:$0xff]  ;;  %v3699_v45 = vpack.i.bf16 %v1586_v43, %v1564_v42 }
 0x2e3   : > { %1590 = vrot.lane.b32.xlu0 %v1584_v44, %s3824_s17  ;;  %1682 = vmatpush.msra.mxu0 %v1584_v44  ;;  %v3704_v46 = vpack.i.bf16 %v1564_v42, %v1584_v44  ;;  %v3719_v47 = vpack.i.bf16 %v1584_v44, %v1586_v43 }
 0x2e4   : > { %3700 = vrot.lane.b32.xlu1 %v3699_v45, %s3824_s17  ;;  %3543 = vmatmul.msk.f32.vlgmr.msra.gmra.mxu0 %vm698_vm0, %v1574_v49 }
 0x2e5   : > { %3705 = vrot.lane.b32.xlu2 %v3704_v46, %s3823_s16 }
 0x2eb   : > { %1731 = vrot.lane.b32.xlu0 %v1586_v43, %s3823_s16 }
 0x2ec   : > { %3710 = vrot.lane.b32.xlu1 %v3704_v46, %s3825_s18 }
 0x2ed   : > { %1808 = vrot.lane.b32.xlu2 %v1586_v43, %s3825_s18 }
 0x2f3   : > { %3715 = vrot.lane.b32.xlu0 %v3704_v46, %s3829_s0 }
 0x2f4   : > { %1883 = vrot.lane.b32.xlu1 %v1564_v42, %s3827_s29 }
 0x2f5   : > { %1885 = vrot.lane.b32.xlu2 %v1586_v43, %s3827_s29 }
 0x2fb   : > { %1960 = vrot.lane.b32.xlu0 %v1564_v42, %s3826_s4 }
 0x2fc   : > { %3720 = vrot.lane.b32.xlu1 %v3719_v47, %s3826_s4 }
 0x2fd   : > { %1881 = vrot.lane.b32.xlu2 %v1584_v44, %s3827_s29 }
 0x303   : > { %2039 = vrot.lane.b32.xlu0 %v1586_v43, %s3829_s0 }
 0x304   : > { %3725 = vrot.lane.b32.xlu1 %v3704_v46, %s3828_s30 }
 0x305   : > { %2116 = vrot.lane.b32.xlu2 %v1586_v43, %s3828_s30 }
 0x30b   : > { %2268 = vperm.xlu0 %3658, %v1583_v48  }
 0x30c   : > { %3730 = vrot.lane.b32.xlu1 %v3699_v45, %s3830_s1 }
 0x30d   : > { %2189 = vrot.lane.b32.xlu2 %v1584_v44, %s3830_s1 }
 0x33f   : > { %v3706_v50 = vpop.permute.xlu2 %3705 }
 0x340   : > { %v3708_v54 = vunpack.i.h.bf16 %v3706_v50  ;;  %v3707_v55 = vunpack.i.l.bf16 %v3706_v50 }
 0x342   : > { %v1733_v61 = vsel %vm996_vm7, %v3707_v55, %v3708_v54 }
 0x347   : > { %v1809_v51 = vpop.permute.xlu2 %1808 }
 0x34f   : > { %v4136_v62 = vpop.permute.xlu2 %1885 }
 0x355   : > { %v1591_v52 = vpop.permute.xlu0 %1590 }
 0x356   : > { %v3701_v53 = vpop.permute.xlu1 %3700 }
 0x357   : > { %v3703_v56 = vunpack.i.h.bf16 %v3701_v53  ;;  %v3702_v57 = vunpack.i.l.bf16 %v3701_v53  ;;  %v1882_v8 = vpop.permute.xlu2 %1881 }
 0x359   : > { %1659 = vmatpush.msrb.mxu3 %v3703_v56  ;;  %v1596_v59 = vsel %vm858_vm6, %v1591_v52, %v3702_v57  ;;  %v1597_v60 = vsel %vm858_vm6, %v3702_v57, %v3703_v56 }
 0x35a   : > { %1619 = vmatpush.msrb.mxu1 %v1596_v59  ;;  %1639 = vmatpush.msrb.mxu2 %v1597_v60 }
 0x35b   : > { %3542 = vmatmul.msk.f32.vlgmr.msrb.gmra.mxu3 %vm698_vm0, %v1575_v58  ;;  %3540 = vmatmul.msk.f32.vlgmr.msrb.gmra.mxu1 %vm698_vm0, %v1575_v58 }
 0x35c   : > { %1756 = vmatpush.msra.mxu3 %v1733_v61  ;;  %3541 = vmatmul.msk.f32.vlgmr.msrb.gmra.mxu2 %vm698_vm0, %v1575_v58 }
 0x35d   : > { %v1732_v63 = vpop.permute.xlu0 %1731  ;;  %1702 = vmatpush.msra.mxu1 %v1564_v42  ;;  %1722 = vmatpush.msra.mxu2 %v1586_v43  ;;  %v1582_v43 = vld [vmem:[%s4404_s7 + $0x40] sm:$0xff] }
 0x35e   : > { %v1734_v0 = vsel %vm996_vm7, %v3708_v54, %v1732_v63  ;;  %v3711_v1 = vpop.permute.xlu1 %3710 }
 0x35f   : > { %1796 = vmatpush.msrb.mxu1 %v1732_v63  ;;  %1776 = vmatpush.msrb.mxu0 %v1734_v0  ;;  %v3713_v2 = vunpack.i.h.bf16 %v3711_v1  ;;  %v3712_v3 = vunpack.i.l.bf16 %v3711_v1  ;;  %v2117_v27 = vpop.permute.xlu2 %2116 }
 0x360   : > { %3547 = vmatmul.msk.f32.vlgmr.msrb.gmra.mxu0 %vm698_vm0, %v1576_v4 }
 0x361   : > { %1873 = vmatpush.msra.mxu0 %v1809_v51  ;;  %v1810_v5 = vsel %vm1074_vm8, %v3712_v3, %v3713_v2  ;;  %v1811_v6 = vsel %vm1074_vm8, %v3713_v2, %v1809_v51  ;;  %v1684_v45 = vpop.f32.mrf.mxu0 }
 0x362   : > { %1833 = vmatpush.msrb.mxu2 %v1810_v5  ;;  %1853 = vmatpush.msrb.mxu3 %v1811_v6 }
 0x363   : > { %3546 = vmatmul.msk.f32.vlgmr.msra.gmra.mxu3 %vm698_vm0, %v1576_v4  ;;  %3544 = vmatmul.msk.f32.vlgmr.msra.gmra.mxu1 %vm698_vm0, %v1574_v49 }
 0x364   : > { %3545 = vmatmul.msk.f32.vlgmr.msra.gmra.mxu2 %vm698_vm0, %v1574_v49  ;;  %1950 = vmatpush.msra.mxu3 %v4136_v62 }
 0x365   : > { %v3716_v7 = vpop.permute.xlu0 %3715 }
 0x366   : > { %v1884_v9 = vpop.permute.xlu1 %1883  ;;  %v3718_v10 = vunpack.i.h.bf16 %v3716_v7  ;;  %v3717_v11 = vunpack.i.l.bf16 %v3716_v7 }
 0x367   : > { %v4151_v12 = vsel %vm1152_vm9, %v1882_v8, %v1884_v9  ;;  %v4155_v13 = vsel %vm1152_vm9, %v1884_v9, %v4136_v62  ;;  %v2190_v39 = vpop.permute.xlu2 %2189 }
 0x368   : > { %1910 = vmatpush.msra.mxu1 %v4151_v12  ;;  %1930 = vmatpush.msra.mxu2 %v4155_v13  ;;  %v2041_v15 = vsel %vm1308_vm12, %v3717_v11, %v3718_v10 }
 0x369   : > { %3551 = vmatmul.msk.f32.vlgmr.msra.gmra.mxu0 %vm698_vm0, %v1577_v14 }
 0x36b   : > { %3550 = vmatmul.msk.f32.vlgmr.msrb.gmra.mxu3 %vm698_vm0, %v1577_v14  ;;  %3548 = vmatmul.msk.f32.vlgmr.msrb.gmra.mxu1 %vm698_vm0, %v1576_v4 }
 0x36c   : > { %2064 = vmatpush.msrb.mxu3 %v2041_v15  ;;  %3549 = vmatmul.msk.f32.vlgmr.msrb.gmra.mxu2 %vm698_vm0, %v1577_v14 }
 0x36d   : > { %v1961_v16 = vpop.permute.xlu0 %1960 }
 0x36e   : > { %v3721_v17 = vpop.permute.xlu1 %3720 }
 0x36f   : > { %v3723_v18 = vunpack.i.h.bf16 %v3721_v17  ;;  %v3722_v19 = vunpack.i.l.bf16 %v3721_v17 }
 0x371   : > { %2027 = vmatpush.msrb.mxu2 %v3722_v19  ;;  %v1964_v21 = vsel %vm1230_vm10, %v3723_v18, %v1961_v16  ;;  %v1965_v22 = vsel %vm1230_vm10, %v1961_v16, %v3722_v19 }
 0x372   : > { %1987 = vmatpush.msrb.mxu0 %v1964_v21  ;;  %2007 = vmatpush.msrb.mxu1 %v1965_v22 }
 0x373   : > { %3554 = vmatmul.msk.f32.vlgmr.msra.gmra.mxu3 %vm698_vm0, %v1578_v20  ;;  %3552 = vmatmul.msk.f32.vlgmr.msra.gmra.mxu1 %vm698_vm0, %v1578_v20 }
 0x374   : > { %3553 = vmatmul.msk.f32.vlgmr.msra.gmra.mxu2 %vm698_vm0, %v1578_v20  ;;  %3555 = vmatmul.msk.f32.vlgmr.msrb.gmra.mxu0 %vm698_vm0, %v1579_v24 }
 0x375   : > { %v2040_v25 = vpop.permute.xlu0 %2039 }
 0x376   : > { %v2042_v28 = vsel %vm1308_vm12, %v3718_v10, %v2040_v25  ;;  %2104 = vmatpush.msra.mxu1 %v2040_v25  ;;  %v3726_v29 = vpop.permute.xlu1 %3725 }
 0x377   : > { %2084 = vmatpush.msra.mxu0 %v2042_v28  ;;  %v3728_v30 = vunpack.i.h.bf16 %v3726_v29  ;;  %v3727_v31 = vunpack.i.l.bf16 %v3726_v29 }
 0x379   : > { %2181 = vmatpush.msrb.mxu0 %v2117_v27  ;;  %v2118_v33 = vsel %vm1386_vm11, %v3727_v31, %v3728_v30  ;;  %v2119_v34 = vsel %vm1386_vm11, %v3728_v30, %v2117_v27 }
 0x37a   : > { %2141 = vmatpush.msra.mxu2 %v2118_v33  ;;  %2161 = vmatpush.msra.mxu3 %v2119_v34 }
 0x37b   : > { %3558 = vmatmul.msk.f32.vlgmr.msrb.gmra.mxu3 %vm698_vm0, %v1580_v32  ;;  %3556 = vmatmul.msk.f32.vlgmr.msrb.gmra.mxu1 %vm698_vm0, %v1579_v24 }
 0x37c   : > { %3557 = vmatmul.msk.f32.vlgmr.msrb.gmra.mxu2 %vm698_vm0, %v1579_v24  ;;  %3559 = vmatmul.msk.f32.vlgmr.msra.gmra.mxu0 %vm698_vm0, %v1580_v32 }
 0x37d   : > { %v2269_v29 = vpop.permute.xlu0 %2268 }
 0x37e   : > { %v3731_v36 = vpop.permute.xlu1 %3730 }
 0x37f   : > { %v3733_v37 = vunpack.i.h.bf16 %v3731_v36  ;;  %v3732_v38 = vunpack.i.l.bf16 %v3731_v36 }
 0x381   : > { %2258 = vmatpush.msrb.mxu3 %v3733_v37  ;;  %v2195_v41 = vsel %vm1464_vm13, %v2190_v39, %v3732_v38  ;;  %v2196_v42 = vsel %vm1464_vm13, %v3732_v38, %v3733_v37 }
 0x382   : > { %2218 = vmatpush.msrb.mxu1 %v2195_v41  ;;  %2238 = vmatpush.msrb.mxu2 %v2196_v42 }
 0x383   : > { %3562 = vmatmul.msk.f32.vlgmr.msra.gmra.mxu3 %vm698_vm0, %v1581_v40  ;;  %3560 = vmatmul.msk.f32.vlgmr.msra.gmra.mxu1 %vm698_vm0, %v1580_v32 }
 0x384   : > { %3561 = vmatmul.msk.f32.vlgmr.msra.gmra.mxu2 %vm698_vm0, %v1581_v40  ;;  %3563 = vmatmul.msk.f32.vlgmr.msrb.gmra.mxu0 %vm698_vm0, %v1581_v40 }
 0x38b   : > { %3566 = vmatmul.msk.f32.vlgmr.msrb.gmra.mxu3 %vm698_vm0, %v1582_v43  ;;  %3564 = vmatmul.msk.f32.vlgmr.msrb.gmra.mxu1 %vm698_vm0, %v1582_v43 }
 0x38c   : > { %3565 = vmatmul.msk.f32.vlgmr.msrb.gmra.mxu2 %vm698_vm0, %v1582_v43 }
 0x3d8   : > { %v1621_v44 = vpop.f32.mrf.mxu1 }
 0x3d9   : > { %v1685_v60 = vadd.f32 %v1684_v45, %v1621_v44 }
 0x3dd   : > { %v1778_v49 = vpop.f32.mrf.mxu0 }
 0x3de   : > { %v1661_v46 = vpop.f32.mrf.mxu3 }
 0x3df   : > { %v1641_v47 = vpop.f32.mrf.mxu2 }
 0x3e0   : > { %v1704_v48 = vpop.f32.mrf.mxu1 }
 0x3e1   : > { %v1705_v1 = vadd.f32 %v1704_v48, %v1641_v47 }
 0x3e3   : > { %v1802_v6 = vadd.f32 %v1778_v49, %v1705_v1 }
 0x3e6   : > { %v1758_v50 = vpop.f32.mrf.mxu3  ;;  %v1875_v53 = vpop.f32.mrf.mxu0 }
 0x3e7   : > { %v1724_v51 = vpop.f32.mrf.mxu2  ;;  %v1801_v0 = vadd.f32 %v1758_v50, %v1685_v60 }
 0x3e8   : > { %v1798_v52 = vpop.f32.mrf.mxu1  ;;  %v1725_v63 = vadd.f32 %v1724_v51, %v1661_v46 }
 0x3ea   : > { %v1803_v3 = vadd.f32 %v1798_v52, %v1725_v63 }
 0x3ec   : > { %v1880_v10 = vadd.f32 %v1875_v53, %v1803_v3 }
 0x3ee   : > { %v1855_v54 = vpop.f32.mrf.mxu3 }
 0x3ef   : > { %v1835_v55 = vpop.f32.mrf.mxu2  ;;  %v1879_v11 = vadd.f32 %v1855_v54, %v1802_v6 }
 0x3f0   : > { %v1912_v56 = vpop.f32.mrf.mxu1  ;;  %v1878_v2 = vadd.f32 %v1835_v55, %v1801_v0 }
 0x3f1   : > { %v1989_v57 = vpop.f32.mrf.mxu0 }
 0x3f2   : > { %v1955_v7 = vadd.f32 %v1912_v56, %v1878_v2 }
 0x3f4   : > { %v2032_v15 = vadd.f32 %v1989_v57, %v1955_v7  ;;  %v2300_v57 = vld [vmem:[%s4406_s9] sm:$0xff] }
 0x3f6   : > { %v1952_v58 = vpop.f32.mrf.mxu3 }
 0x3f7   : > { %v1932_v59 = vpop.f32.mrf.mxu2  ;;  %v1957_v14 = vadd.f32 %v1952_v58, %v1880_v10 }
 0x3f8   : > { %v2009_v61 = vpop.f32.mrf.mxu1  ;;  %v1956_v16 = vadd.f32 %v1932_v59, %v1879_v11 }
 0x3f9   : > { %v2086_v8 = vpop.f32.mrf.mxu0 }
 0x3fa   : > { %v2033_v21 = vadd.f32 %v2009_v61, %v1956_v16 }
 0x3fc   : > { %v2110_v30 = vadd.f32 %v2086_v8, %v2033_v21 }
 0x3fe   : > { %v2066_v4 = vpop.f32.mrf.mxu3 }
 0x3ff   : > { %v2029_v5 = vpop.f32.mrf.mxu2  ;;  %v2109_v18 = vadd.f32 %v2066_v4, %v2032_v15  ;;  %v2301_v4 = vld [vmem:[%s4406_s9 + $0x8] sm:$0xff]  ;;  %v2302_v15 = vld [vmem:[%s4406_s9 + $0x10] sm:$0xff] }
 0x400   : > { %v2106_v9 = vpop.f32.mrf.mxu1  ;;  %v2034_v17 = vadd.f32 %v2029_v5, %v1957_v14 }
 0x401   : > { %v2183_v27 = vpop.f32.mrf.mxu0 }
 0x402   : > { %v2111_v25 = vadd.f32 %v2106_v9, %v2034_v17 }
 0x404   : > { %v2188_v32 = vadd.f32 %v2183_v27, %v2111_v25 }
 0x406   : > { %v2163_v19 = vpop.f32.mrf.mxu3 }
 0x407   : > { %v2143_v20 = vpop.f32.mrf.mxu2  ;;  %v2187_v33 = vadd.f32 %v2163_v19, %v2110_v30 }
 0x408   : > { %v2186_v22 = vadd.f32 %v2143_v20, %v2109_v18  ;;  %v2220_v24 = vpop.f32.mrf.mxu1 }
 0x40a   : > { %v2263_v28 = vadd.f32 %v2220_v24, %v2186_v22  ;;  %v2303_v24 = vld [vmem:[%s4406_s9 + $0x18] sm:$0xff] }
 0x40c   : > { %v2271_v31 = vadd.f32 %v2269_v29, %v2263_v28 }
 0x40e   : > { %v2274_v34 = vmax.f32 %v2271_v31, 0.0  ;;  %v2260_v36 = vpop.f32.mrf.mxu3 }
 0x40f   : > { %v2265_v37 = vadd.f32 %v2260_v36, %v2188_v32  ;;  %v2240_v38 = vpop.f32.mrf.mxu2  ;;  %v2309_v32 = vld [vmem:[%s4407_s10] sm:$0xff]  ;;  %v2305_v36 = vld [vmem:[%s4406_s9 + $0x28] sm:$0xff] }
 0x410   : > { %v2277_v39 = vadd.f32 %v2274_v34, %v4151_v12  ;;  %v2264_v40 = vadd.f32 %v2240_v38, %v2187_v33 }
 0x411   : > { %v2273_v41 = vadd.f32 %v2269_v29, %v2265_v37 }
 0x412   : > { %v2272_v42 = vadd.f32 %v2269_v29, %v2264_v40  ;;  %v2280_v43 = vmul.f32 %v2277_v39, %v4090_v26  ;;  %v2304_v39 = vld [vmem:[%s4406_s9 + $0x20] sm:$0xff] }
 0x413   : > { %v2276_v44 = vmax.f32 %v2273_v41, 0.0 }
 0x414   : > { %v2275_v45 = vmax.f32 %v2272_v42, 0.0  ;;  %2286 = vrot.lane.b32.xlu0 %v2280_v43, %s3831_s2  ;;  %v2306_v43 = vld [vmem:[%s4406_s9 + $0x30] sm:$0xff] }
 0x415   : > { %v2279_v46 = vadd.f32 %v2276_v44, %v4136_v62 }
 0x416   : > { %v2278_v47 = vadd.f32 %v2275_v45, %v4155_v13 }
 0x417   : > { %v2282_v48 = vmul.f32 %v2279_v46, %v4088_v23 }
 0x418   : > { %v2281_v49 = vmul.f32 %v2278_v47, %v4096_v35 }
 0x419   : > { %2290 = vrot.lane.b32.xlu2 %v2282_v48, %s3831_s2 }
 0x41a   : > { %2288 = vrot.lane.b32.xlu1 %v2281_v49, %s3831_s2 }
 0x473   : > { %v2291_v50 = vpop.permute.xlu2 %2290 }
 0x486   : > { %v2287_v12 = vpop.permute.xlu0 %2286 }
 0x487   : > { %2297 = vst.msk [vmem:[#allocation4] sm:$0xff] %vm1569_vm1, %v2287_v12 }
 0x48c   : > { %v2289_v51 = vpop.permute.xlu1 %2288 }
 0x48d   : > { %v2292_v52 = vsel %vm1563_vm14, %v2287_v12, %v2289_v51  ;;  %v2293_v53 = vsel %vm1563_vm14, %v2289_v51, %v2291_v50 }
 0x48e   : > { %v2310_v62 = vld [vmem:[#allocation4] sm:$0xff]  ;;  %2318 = vrot.lane.b32.xlu2 %v2292_v52, %s3824_s17  ;;  %2299 = vst.msk [vmem:[#allocation4 + $0x10] sm:$0xff] %vm1572_vm15, %v2293_v53 }
 0x48f   : > { %2408 = vmatpush.msra.mxu3 %v2310_v62  ;;  %v3739_v13 = vpack.i.bf16 %v2292_v52, %v2310_v62 }
 0x490   : > { %3570 = vmatmul.msk.f32.vlgmr.msra.gmra.mxu3 %vm698_vm0, %v2300_v57 }
 0x491   : > { %3740 = vrot.lane.b32.xlu0 %v3739_v13, %s3823_s16 }
 0x495   : > { %v2312_v54 = vld [vmem:[#allocation4 + $0x10] sm:$0xff] }
 0x496   : > { %v3734_v55 = vpack.i.bf16 %v2310_v62, %v2312_v54  ;;  %v3744_v56 = vpack.i.bf16 %v2312_v54, %v2292_v52 }
 0x498   : > { %3735 = vrot.lane.b32.xlu1 %v3734_v55, %s3824_s17  ;;  %3745 = vrot.lane.b32.xlu2 %v3744_v56, %s3825_s18  ;;  %s4430_s17 = smov 62  }
 0x499   : > { %2530 = vrot.lane.b32.xlu0 %v2310_v62, %s3825_s18  ;;  %s3841_s18 = smov 76  }
 0x4a0   : > { %2457 = vrot.lane.b32.xlu1 %v2312_v54, %s3823_s16  ;;  %2609 = vrot.lane.b32.xlu2 %v2292_v52, %s3827_s29  ;;  %s3840_s16 = smov 78  }
 0x4a1   : > { %3755 = vrot.lane.b32.xlu0 %v3739_v13, %s3826_s4 }
 0x4a8   : > { %3750 = vrot.lane.b32.xlu1 %v3734_v55, %s3827_s29  ;;  %2688 = vrot.lane.b32.xlu2 %v2312_v54, %s3826_s4  ;;  %s4431_s4 = smov 60  }
 0x4a9   : > { %2765 = vrot.lane.b32.xlu0 %v2312_v54, %s3829_s0 }
 0x4b0   : > { %3760 = vrot.lane.b32.xlu1 %v3739_v13, %s3829_s0  ;;  %2838 = vrot.lane.b32.xlu2 %v2310_v62, %s3828_s30  ;;  %v2308_v13 = vld [vmem:[%s4406_s9 + $0x40] sm:$0xff]  ;;  %s4372_s0 = scalar_lea.vmem %s4414_s20, %s3970_s28 }
 0x4b1   : > { %3770 = vrot.lane.b32.xlu0 %v3734_v55, %s3830_s1 }
 0x4b8   : > { %3765 = vrot.lane.b32.xlu1 %v3744_v56, %s3828_s30  ;;  %2994 = vperm.xlu2 %3774, %v2309_v32  }
 0x4c0   : > { %2917 = vrot.lane.b32.xlu1 %v2292_v52, %s3830_s1 }
 0x4e8   : > { %v2319_v58 = vpop.permute.xlu2 %2318 }
 0x4f2   : > { %v3746_v60 = vpop.permute.xlu2 %3745 }
 0x4f3   : > { %v3748_v5 = vunpack.i.h.bf16 %v3746_v60  ;;  %v3747_v6 = vunpack.i.l.bf16 %v3746_v60 }
 0x4f5   : > { %v2537_v10 = vsel %vm1074_vm8, %v3747_v6, %v3748_v5 }
 0x4fa   : > { %v2610_v18 = vpop.permute.xlu2 %2609 }
 0x502   : > { %v2689_v30 = vpop.permute.xlu2 %2688 }
 0x503   : > { %v3741_v59 = vpop.permute.xlu0 %3740 }
 0x504   : > { %v3743_v1 = vunpack.i.h.bf16 %v3741_v59  ;;  %v3742_v2 = vunpack.i.l.bf16 %v3741_v59 }
 0x506   : > { %v2459_v9 = vsel %vm996_vm7, %v3742_v2, %v3743_v1 }
 0x50a   : > { %v3736_v61 = vpop.permute.xlu1 %3735  ;;  %v2839_v46 = vpop.permute.xlu2 %2838 }
 0x50b   : > { %v3738_v63 = vunpack.i.h.bf16 %v3736_v61  ;;  %v3737_v0 = vunpack.i.l.bf16 %v3736_v61  ;;  %v2531_v3 = vpop.permute.xlu0 %2530 }
 0x50c   : > { %v2536_v11 = vsel %vm1074_vm8, %v2531_v3, %v3747_v6 }
 0x50d   : > { %2385 = vmatpush.msra.mxu2 %v3737_v0  ;;  %v2322_v7 = vsel %vm858_vm6, %v3738_v63, %v2319_v58  ;;  %v2323_v8 = vsel %vm858_vm6, %v2319_v58, %v3737_v0 }
 0x50e   : > { %2345 = vmatpush.msra.mxu0 %v2322_v7  ;;  %2365 = vmatpush.msra.mxu1 %v2323_v8 }
 0x50f   : > { %3569 = vmatmul.msk.f32.vlgmr.msra.gmra.mxu2 %vm698_vm0, %v2301_v4  ;;  %3567 = vmatmul.msk.f32.vlgmr.msra.gmra.mxu0 %vm698_vm0, %v2301_v4 }
 0x510   : > { %2482 = vmatpush.msrb.mxu2 %v2459_v9  ;;  %3568 = vmatmul.msk.f32.vlgmr.msra.gmra.mxu1 %vm698_vm0, %v2301_v4 }
 0x511   : > { %2428 = vmatpush.msrb.mxu0 %v2292_v52  ;;  %2448 = vmatpush.msrb.mxu1 %v2312_v54  ;;  %v2307_v52 = vld [vmem:[%s4406_s9 + $0x38] sm:$0xff] }
 0x512   : > { %2579 = vmatpush.msra.mxu2 %v2537_v10  ;;  %v2458_v14 = vpop.permute.xlu1 %2457 }
 0x513   : > { %2559 = vmatpush.msra.mxu1 %v2536_v11  ;;  %v2460_v16 = vsel %vm996_vm7, %v3743_v1, %v2458_v14  ;;  %2522 = vmatpush.msra.mxu0 %v2458_v14  ;;  %v3756_v17 = vpop.permute.xlu0 %3755  ;;  %v2410_v56 = vpop.f32.mrf.mxu3 }
 0x514   : > { %2502 = vmatpush.msrb.mxu3 %v2460_v16  ;;  %v3758_v19 = vunpack.i.h.bf16 %v3756_v17  ;;  %v3757_v20 = vunpack.i.l.bf16 %v3756_v17 }
 0x515   : > { %3574 = vmatmul.msk.f32.vlgmr.msrb.gmra.mxu3 %vm698_vm0, %v2302_v15 }
 0x516   : > { %2599 = vmatpush.msra.mxu3 %v3748_v5  ;;  %v2690_v21 = vsel %vm1230_vm10, %v3757_v20, %v3758_v19  ;;  %v2691_v31 = vsel %vm1230_vm10, %v3758_v19, %v2689_v30 }
 0x517   : > { %3573 = vmatmul.msk.f32.vlgmr.msrb.gmra.mxu2 %vm698_vm0, %v2302_v15  ;;  %3571 = vmatmul.msk.f32.vlgmr.msrb.gmra.mxu0 %vm698_vm0, %v2300_v57 }
 0x518   : > { %3572 = vmatmul.msk.f32.vlgmr.msrb.gmra.mxu1 %vm698_vm0, %v2300_v57  ;;  %2713 = vmatpush.msrb.mxu3 %v2690_v21 }
 0x51a   : > { %v3751_v22 = vpop.permute.xlu1 %3750 }
 0x51b   : > { %v3753_v25 = vunpack.i.h.bf16 %v3751_v22  ;;  %v3752_v27 = vunpack.i.l.bf16 %v3751_v22  ;;  %v2766_v34 = vpop.permute.xlu0 %2765 }
 0x51d   : > { %3578 = vmatmul.msk.f32.vlgmr.msra.gmra.mxu3 %vm698_vm0, %v2303_v24  ;;  %2676 = vmatpush.msrb.mxu2 %v3752_v27  ;;  %v2613_v28 = vsel %vm1152_vm9, %v3753_v25, %v2610_v18  ;;  %v2614_v29 = vsel %vm1152_vm9, %v2610_v18, %v3752_v27 }
 0x51e   : > { %2636 = vmatpush.msrb.mxu0 %v2613_v28  ;;  %2656 = vmatpush.msrb.mxu1 %v2614_v29 }
 0x51f   : > { %3577 = vmatmul.msk.f32.vlgmr.msra.gmra.mxu2 %vm698_vm0, %v2303_v24  ;;  %3575 = vmatmul.msk.f32.vlgmr.msra.gmra.mxu0 %vm698_vm0, %v2302_v15 }
 0x520   : > { %3576 = vmatmul.msk.f32.vlgmr.msra.gmra.mxu1 %vm698_vm0, %v2303_v24  ;;  %2733 = vmatpush.msra.mxu0 %v2691_v31 }
 0x521   : > { %2753 = vmatpush.msra.mxu1 %v2689_v30 }
 0x522   : > { %v3761_v33 = vpop.permute.xlu1 %3760 }
 0x523   : > { %v3763_v37 = vunpack.i.h.bf16 %v3761_v33  ;;  %v3762_v38 = vunpack.i.l.bf16 %v3761_v33  ;;  %v3771_v47 = vpop.permute.xlu0 %3770 }
 0x524   : > { %v3772_v12 = vunpack.i.l.bf16 %v3771_v47  ;;  %v3773_v50 = vunpack.i.h.bf16 %v3771_v47 }
 0x525   : > { %v2768_v40 = vsel %vm1308_vm12, %v3763_v37, %v2766_v34  ;;  %3582 = vmatmul.msk.f32.vlgmr.msrb.gmra.mxu3 %vm698_vm0, %v2305_v36  ;;  %v2767_v41 = vsel %vm1308_vm12, %v3762_v38, %v3763_v37  ;;  %v2995_v38 = vpop.permute.xlu2 %2994 }
 0x526   : > { %2790 = vmatpush.msra.mxu2 %v2767_v41  ;;  %2810 = vmatpush.msra.mxu3 %v2768_v40 }
 0x527   : > { %3581 = vmatmul.msk.f32.vlgmr.msrb.gmra.mxu2 %vm698_vm0, %v2304_v39  ;;  %3579 = vmatmul.msk.f32.vlgmr.msrb.gmra.mxu0 %vm698_vm0, %v2304_v39 }
 0x528   : > { %3580 = vmatmul.msk.f32.vlgmr.msrb.gmra.mxu1 %vm698_vm0, %v2304_v39  ;;  %2830 = vmatpush.msrb.mxu0 %v2766_v34 }
 0x52a   : > { %v3766_v42 = vpop.permute.xlu1 %3765 }
 0x52b   : > { %v3768_v44 = vunpack.i.h.bf16 %v3766_v42  ;;  %v3767_v45 = vunpack.i.l.bf16 %v3766_v42 }
 0x52d   : > { %3586 = vmatmul.msk.f32.vlgmr.msra.gmra.mxu3 %vm698_vm0, %v2306_v43  ;;  %v2844_v48 = vsel %vm1386_vm11, %v2839_v46, %v3767_v45  ;;  %v2845_v49 = vsel %vm1386_vm11, %v3767_v45, %v3768_v44  ;;  %vm3192_vm11 = vcmask 1040384  }
 0x52e   : > { %2907 = vmatpush.msrb.mxu3 %v3768_v44  ;;  %2867 = vmatpush.msrb.mxu1 %v2844_v48 }
 0x52f   : > { %3585 = vmatmul.msk.f32.vlgmr.msra.gmra.mxu2 %vm698_vm0, %v2306_v43  ;;  %3583 = vmatmul.msk.f32.vlgmr.msra.gmra.mxu0 %vm698_vm0, %v2305_v36 }
 0x530   : > { %2887 = vmatpush.msrb.mxu2 %v2845_v49  ;;  %3584 = vmatmul.msk.f32.vlgmr.msra.gmra.mxu1 %vm698_vm0, %v2305_v36 }
 0x532   : > { %2984 = vmatpush.msra.mxu2 %v3772_v12  ;;  %v2918_v51 = vpop.permute.xlu1 %2917 }
 0x533   : > { %v2921_v53 = vsel %vm1464_vm13, %v3773_v50, %v2918_v51  ;;  %v2922_v62 = vsel %vm1464_vm13, %v2918_v51, %v3772_v12 }
 0x534   : > { %2944 = vmatpush.msra.mxu0 %v2921_v53  ;;  %2964 = vmatpush.msra.mxu1 %v2922_v62 }
 0x535   : > { %3590 = vmatmul.msk.f32.vlgmr.msrb.gmra.mxu3 %vm698_vm0, %v2307_v52 }
 0x537   : > { %3589 = vmatmul.msk.f32.vlgmr.msrb.gmra.mxu2 %vm698_vm0, %v2307_v52  ;;  %3587 = vmatmul.msk.f32.vlgmr.msrb.gmra.mxu0 %vm698_vm0, %v2306_v43 }
 0x538   : > { %3588 = vmatmul.msk.f32.vlgmr.msrb.gmra.mxu1 %vm698_vm0, %v2307_v52 }
 0x53f   : > { %3593 = vmatmul.msk.f32.vlgmr.msra.gmra.mxu2 %vm698_vm0, %v2308_v13  ;;  %3591 = vmatmul.msk.f32.vlgmr.msra.gmra.mxu0 %vm698_vm0, %v2308_v13 }
 0x540   : > { %3592 = vmatmul.msk.f32.vlgmr.msra.gmra.mxu1 %vm698_vm0, %v2308_v13 }
 0x58c   : > { %v2347_v54 = vpop.f32.mrf.mxu0 }
 0x58d   : > { %v2367_v55 = vpop.f32.mrf.mxu1  ;;  %v2411_v7 = vadd.f32 %v2410_v56, %v2347_v54 }
 0x592   : > { %v2387_v57 = vpop.f32.mrf.mxu2 }
 0x594   : > { %v2430_v58 = vpop.f32.mrf.mxu0 }
 0x595   : > { %v2450_v59 = vpop.f32.mrf.mxu1  ;;  %v2431_v9 = vadd.f32 %v2430_v58, %v2367_v55 }
 0x596   : > { %v2451_v18 = vadd.f32 %v2450_v59, %v2387_v57 }
 0x598   : > { %v2504_v60 = vpop.f32.mrf.mxu3 }
 0x599   : > { %v2528_v14 = vadd.f32 %v2504_v60, %v2431_v9 }
 0x59a   : > { %v2484_v61 = vpop.f32.mrf.mxu2 }
 0x59b   : > { %v2527_v10 = vadd.f32 %v2484_v61, %v2411_v7 }
 0x59c   : > { %v2524_v63 = vpop.f32.mrf.mxu0 }
 0x59d   : > { %v2561_v0 = vpop.f32.mrf.mxu1  ;;  %v2529_v22 = vadd.f32 %v2524_v63, %v2451_v18  ;;  %v3064_v18 = vld [vmem:[%s4411_s14] sm:$0xff] }
 0x59e   : > { %v2604_v15 = vadd.f32 %v2561_v0, %v2527_v10  ;;  %v3047_v0 = vld [vmem:[%s4408_s11] sm:$0xff]  ;;  %v3057_v10 = vld [vmem:[#allocation5] sm:$0x1] }
 0x5a0   : > { %v2601_v1 = vpop.f32.mrf.mxu3 }
 0x5a1   : > { %v2606_v28 = vadd.f32 %v2601_v1, %v2529_v22 }
 0x5a2   : > { %v2581_v2 = vpop.f32.mrf.mxu2 }
 0x5a3   : > { %v2605_v16 = vadd.f32 %v2581_v2, %v2528_v14 }
 0x5a4   : > { %v2638_v3 = vpop.f32.mrf.mxu0 }
 0x5a5   : > { %v2658_v4 = vpop.f32.mrf.mxu1  ;;  %v2681_v19 = vadd.f32 %v2638_v3, %v2604_v15 }
 0x5a6   : > { %v2682_v24 = vadd.f32 %v2658_v4, %v2605_v16  ;;  %v3060_v16 = vld [vmem:[%s4410_s13] sm:$0xff] }
 0x5a8   : > { %v2715_v5 = vpop.f32.mrf.mxu3 }
 0x5a9   : > { %v2758_v25 = vadd.f32 %v2715_v5, %v2681_v19 }
 0x5aa   : > { %v2678_v6 = vpop.f32.mrf.mxu2 }
 0x5ab   : > { %v2683_v31 = vadd.f32 %v2678_v6, %v2606_v28 }
 0x5ac   : > { %v2735_v8 = vpop.f32.mrf.mxu0 }
 0x5ad   : > { %v2755_v11 = vpop.f32.mrf.mxu1  ;;  %v2759_v29 = vadd.f32 %v2735_v8, %v2682_v24 }
 0x5ae   : > { %v2760_v39 = vadd.f32 %v2755_v11, %v2683_v31 }
 0x5b0   : > { %v2812_v20 = vpop.f32.mrf.mxu3 }
 0x5b1   : > { %v2836_v32 = vadd.f32 %v2812_v20, %v2759_v29 }
 0x5b2   : > { %v2792_v17 = vpop.f32.mrf.mxu2 }
 0x5b3   : > { %v2835_v30 = vadd.f32 %v2792_v17, %v2758_v25 }
 0x5b4   : > { %v2832_v21 = vpop.f32.mrf.mxu0 }
 0x5b5   : > { %v2869_v27 = vpop.f32.mrf.mxu1  ;;  %v2837_v44 = vadd.f32 %v2832_v21, %v2760_v39 }
 0x5b6   : > { %v2912_v34 = vadd.f32 %v2869_v27, %v2835_v30 }
 0x5b8   : > { %v2909_v42 = vpop.f32.mrf.mxu3 }
 0x5b9   : > { %v2914_v47 = vadd.f32 %v2909_v42, %v2837_v44  ;;  %v3182_v42 = vld [vmem:[#allocation8] sm:$0x1] }
 0x5ba   : > { %v2889_v33 = vpop.f32.mrf.mxu2 }
 0x5bb   : > { %v2913_v36 = vadd.f32 %v2889_v33, %v2836_v32 }
 0x5bc   : > { %v2946_v37 = vpop.f32.mrf.mxu0 }
 0x5bd   : > { %v2989_v40 = vadd.f32 %v2946_v37, %v2912_v34  ;;  %v2966_v41 = vpop.f32.mrf.mxu1 }
 0x5be   : > { %v2990_v43 = vadd.f32 %v2966_v41, %v2913_v36 }
 0x5bf   : > { %v2997_v45 = vadd.f32 %v2995_v38, %v2989_v40 }
 0x5c0   : > { %v2998_v46 = vadd.f32 %v2995_v38, %v2990_v43  ;;  %v3094_v43 = vld [vmem:[#allocation6] sm:$0x1] }
 0x5c1   : > { %v3000_v48 = vmul.f32 %v2997_v45, %v4090_v26 }
 0x5c2   : > { %v2986_v49 = vpop.f32.mrf.mxu2  ;;  %v3001_v12 = vmul.f32 %v2998_v46, %v4096_v35 }
 0x5c3   : > { %v2991_v50 = vadd.f32 %v2986_v49, %v2914_v47  ;;  %3006 = vrot.lane.b32.xlu0 %v3000_v48, %s3831_s2  ;;  %v3093_v47 = vld [vmem:[%s4412_s15] sm:$0x1] }
 0x5c4   : > { %3008 = vrot.lane.b32.xlu1 %v3001_v12, %s3831_s2 }
 0x5c5   : > { %v2999_v51 = vadd.f32 %v2995_v38, %v2991_v50 }
 0x5c7   : > { %v3002_v52 = vmul.f32 %v2999_v51, %v4088_v23 }
 0x5c9   : > { %3010 = vrot.lane.b32.xlu2 %v3002_v52, %s3831_s2 }
 0x623   : > { %v3011_v62 = vpop.permute.xlu2 %3010 }
 0x635   : > { %v3007_v53 = vpop.permute.xlu0 %3006 }
 0x636   : > { %v3009_v13 = vpop.permute.xlu1 %3008  ;;  %3017 = vst.msk [vmem:[#allocation2] sm:$0xff] %vm1569_vm1, %v3007_v53 }
 0x637   : > { %v3013_v26 = vsel %vm1563_vm14, %v3009_v13, %v3011_v62  ;;  %v3012_v54 = vsel %vm1563_vm14, %v3007_v53, %v3009_v13  ;;  %v3181_v13 = vld [vmem:[#allocation7] sm:$0x1] }
 0x638   : > { %3019 = vst.msk [vmem:[#allocation2 + $0x10] sm:$0xff] %vm1572_vm15, %v3013_v26  ;;  %3031 = vrot.lane.b32.xlu1 %v3012_v54, %s3827_s29 }
 0x639   : > { %3018 = vst [vmem:[#allocation2 + $0x8] sm:$0xff] %v3012_v54 }
 0x63d   : > { %v3020_v35 = vld [vmem:[#allocation2] sm:$0xff] }
 0x63e   : > { %3029 = vrot.lane.b32.xlu0 %v3020_v35, %s3827_s29 }
 0x63f   : > { %v3022_v23 = vld [vmem:[#allocation2 + $0x10] sm:$0xff] }
 0x640   : > { %3033 = vrot.lane.b32.xlu2 %v3022_v23, %s3827_s29 }
 0x69a   : > { %v3034_v56 = vpop.permute.xlu2 %3033 }
 0x69b   : > { %v3042_v61 = vsel %vm3041_vm2, %v3034_v56, 0.0 }
 0x6aa   : > { %v3032_v55 = vpop.permute.xlu1 %3031 }
 0x6ab   : > { %v3036_v59 = vsel %vm1152_vm9, %v3032_v55, %v3034_v56 }
 0x6b0   : > { %v3030_v57 = vpop.permute.xlu0 %3029 }
 0x6b1   : > { %v3035_v58 = vsel %vm1152_vm9, %v3030_v57, %v3032_v55 }
 0x6b2   : > { %v3040_v60 = vadd.f32 %v3036_v59, %v3035_v58 }
 0x6b4   : > { %v3043_v63 = vadd.f32 %v3042_v61, %v3040_v60 }
 0x6b6   : > { %3044 = vadd.xlane.f32.xlu0 %v3043_v63 }
 0x729   : > { %v3045_v1 = vpop.xlane.xlu0 %3044 }
 0x72a   : > { %v3046_v2 = vmul.f32 0.00390625, %v3045_v1 }
 0x72c   : > { %v3048_v3 = vmul.f32 %v3047_v0, %v3046_v2 }
 0x72e   : > { %v3050_v4 = vsel %vm3049_vm3, %v3048_v3, 0.0 }
 0x72f   : > { %v3051_v5 = vrot.slane %v3050_v4, 4 }
 0x731   : > { %v3052_v6 = vadd.f32 %v3051_v5, %v3050_v4 }
 0x733   : > { %v3053_v7 = vrot.slane %v3052_v6, 2 }
 0x735   : > { %v3054_v8 = vadd.f32 %v3053_v7, %v3052_v6 }
 0x737   : > { %v3055_v9 = vrot.slane %v3054_v8, 1 }
 0x739   : > { %v3056_v11 = vadd.f32 %v3055_v9, %v3054_v8 }
 0x73b   : > { %v3058_v14 = vadd.f32 %v3057_v10, %v3056_v11 }
 0x73d   : > { %v3059_v15 = vmax.f32 %v3058_v14, 0.0 }
 0x73f   : > { %v3061_v17 = vperm.slane %v3059_v15, 0 }
 0x741   : > { %v3062_v19 = vmul.f32 %v3061_v17, %v3060_v16 }
 0x743   : > { %v3065_v20 = vadd.f32 %v3064_v18, %v3062_v19 }
 0x745   : > { %v3594_v21 = vmul.f32 -1.442695, %v3065_v20 }
 0x747   : > { %3781 = vpow2.f32 %v3594_v21 }
 0x74d   : > { %v3782_v22 = vpop.eup %3781 }
 0x74e   : > { %v3069_v24 = vadd.f32 1.0, %v3782_v22 }
 0x750   : > { %3783 = vrcp.f32 %v3069_v24  ;;  %v3081_v29 = vand.u32 2147483648, %v3069_v24  ;;  %v3079_v31 = vand.u32 2147483647, %v3069_v24  ;;  %vm3075_vm7 = vweird.f32 %v3069_v24 }
 0x752   : > { %v3082_v33 = vor.u32 1.1754944e-38, %v3081_v29  ;;  %vm3080_vm10 = vcmp.eq.f32.partialorder %v3079_v31, 8.507059e+37 }
 0x756   : > { %v3784_v25 = vpop.eup %3783 }
 0x757   : > { %v3071_v27 = vmul.f32 %v3784_v25, %v3069_v24  ;;  %vm3076_vm6 = vweird.f32 %v3784_v25 }
 0x758   : > { %vm3077_vm8 = vmor %vm3075_vm7, %vm3076_vm6 }
 0x759   : > { %v3072_v28 = vsub.f32 1.0, %v3071_v27 }
 0x75b   : > { %v3073_v30 = vmul.f32 %v3784_v25, %v3072_v28 }
 0x75d   : > { %v3074_v32 = vadd.f32 %v3784_v25, %v3073_v30 }
 0x75f   : > { %v3078_v34 = vsel %vm3077_vm8, %v3784_v25, %v3074_v32 }
 0x760   : > { %v3083_v36 = vsel %vm3080_vm10, %v3082_v33, %v3078_v34 }
 0x761   : > { %3087 = vperm.xlu1 %3775, %v3083_v36  }
 0x7d3   : > { %v3088_v37 = vpop.permute.xlu1 %3087 }
 0x7d4   : > { %v4331_v38 = vmul.f32 %v3088_v37, %v3020_v35  ;;  %v4333_v39 = vmul.f32 %v3088_v37, %v3012_v54  ;;  %v4335_v40 = vmul.f32 %v3088_v37, %v3022_v23 }
 0x7d6   : > { %3108 = vrot.lane.b32.xlu1 %v4335_v40, %s3827_s29  ;;  %v3776_v41 = vpack.i.bf16 %v4333_v39, %v4331_v38 }
 0x7d8   : > { %3777 = vrot.lane.b32.xlu2 %v3776_v41, %s3827_s29  ;;  %s3832_s29 = smov 88  }
 0x7de   : > { %3185 = vperm.xlu1 %3775, %v3182_v42  }
 0x7e0   : > { %3097 = vperm.xlu2 %3774, %v3094_v43  }
 0x832   : > { %v3778_v44 = vpop.permute.xlu2 %3777 }
 0x833   : > { %v3780_v45 = vunpack.i.h.bf16 %v3778_v44  ;;  %v3779_v46 = vunpack.i.l.bf16 %v3778_v44 }
 0x835   : > { %v3110_v48 = vsel %vm1152_vm9, %v3779_v46, %v3780_v45 }
 0x836   : > { %3133 = vmatpush.msra.mxu3 %v3110_v48 }
 0x837   : > { %3595 = vmatmul.msk.f32.vlgmr.msra.gmra.mxu3 %vm698_vm0, %v3093_v47 }
 0x83a   : > { %v3098_v50 = vpop.permute.xlu2 %3097 }
 0x83b   : > { %v3100_v51 = vperm.slane %v3098_v50, 0 }
 0x848   : > { %v3109_v49 = vpop.permute.xlu1 %3108 }
 0x849   : > { %v3111_v12 = vsel %vm1152_vm9, %v3780_v45, %v3109_v49  ;;  %3173 = vmatpush.msrb.mxu1 %v3109_v49 }
 0x84a   : > { %3153 = vmatpush.msrb.mxu0 %v3111_v12  ;;  %3597 = vmatmul.msk.f32.vlgmr.msrb.gmra.mxu1 %vm698_vm0, %v3093_v47 }
 0x84b   : > { %3596 = vmatmul.msk.f32.vlgmr.msrb.gmra.mxu0 %vm698_vm0, %v3093_v47 }
 0x850   : > { %v3186_v57 = vpop.permute.xlu1 %3185 }
 0x851   : > { %v3188_v58 = vperm.slane %v3186_v57, 0 }
 0x8ba   : > { %v3135_v52 = vpop.f32.mrf.mxu3 }
 0x8bb   : > { %v3136_v53 = vadd.f32 %v3135_v52, %v3100_v51 }
 0x8bd   : > { %v3178_v62 = vmax.f32 %v3136_v53, 0.0  ;;  %v3023_v53 = vld [vmem:[#allocation3] sm:$0xff] }
 0x8bf   : > { %3598 = vmatpush.msk.msrb.mxu2 %vm3192_vm11, %v3178_v62 }
 0x8c0   : > { %3599 = vmatmul.msk.f32.vlgmr.msrb.gmra.mxu2 %vm3049_vm3, %v3181_v13 }
 0x8c7   : > { %v3175_v26 = vpop.f32.mrf.mxu1 }
 0x8c8   : > { %v3176_v54 = vadd.f32 %v3175_v26, %v3100_v51  ;;  %v3155_v35 = vpop.f32.mrf.mxu0 }
 0x8c9   : > { %v3156_v23 = vadd.f32 %v3155_v35, %v3100_v51 }
 0x8ca   : > { %v3180_v55 = vmax.f32 %v3176_v54, 0.0 }
 0x8cb   : > { %v3179_v56 = vmax.f32 %v3156_v23, 0.0 }
 0x8cc   : > { %3602 = vmatpush.msk.msra.mxu0 %vm3192_vm11, %v3180_v55  ;;  %v3024_v55 = vld [vmem:[#allocation3 + $0x8] sm:$0xff] }
 0x8cd   : > { %3600 = vmatpush.msk.msrb.mxu3 %vm3192_vm11, %v3179_v56  ;;  %3603 = vmatmul.msk.f32.vlgmr.msra.gmra.mxu0 %vm3049_vm3, %v3181_v13  ;;  %v3025_v56 = vld [vmem:[#allocation3 + $0x10] sm:$0xff]  ;;  %vm3403_vm11 = vcmask 539648  }
 0x8ce   : > { %3601 = vmatmul.msk.f32.vlgmr.msrb.gmra.mxu3 %vm3049_vm3, %v3181_v13 }
 0x943   : > { %v3219_v59 = vpop.f32.mrf.mxu2 }
 0x944   : > { %v3220_v60 = vadd.f32 %v3219_v59, %v3188_v58 }
 0x946   : > { %v3604_v61 = vmul.f32 -1.442695, %v3220_v60 }
 0x948   : > { %3785 = vpow2.f32 %v3604_v61 }
 0x94a   : > { %v3259_v63 = vpop.f32.mrf.mxu0 }
 0x94b   : > { %v3260_v0 = vadd.f32 %v3259_v63, %v3188_v58 }
 0x94d   : > { %v3606_v1 = vmul.f32 -1.442695, %v3260_v0 }
 0x94e   : > { %v3786_v2 = vpop.eup %3785 }
 0x94f   : > { %v3271_v3 = vadd.f32 1.0, %v3786_v2  ;;  %3787 = vpow2.f32 %v3606_v1 }
 0x951   : > { %3789 = vrcp.f32 %v3271_v3  ;;  %v3239_v4 = vpop.f32.mrf.mxu3  ;;  %v3285_v14 = vand.u32 2147483648, %v3271_v3  ;;  %v3283_v17 = vand.u32 2147483647, %v3271_v3  ;;  %vm3279_vm9 = vweird.f32 %v3271_v3 }
 0x952   : > { %v3240_v5 = vadd.f32 %v3239_v4, %v3188_v58 }
 0x953   : > { %v3286_v21 = vor.u32 1.1754944e-38, %v3285_v14  ;;  %vm3284_vm13 = vcmp.eq.f32.partialorder %v3283_v17, 8.507059e+37 }
 0x954   : > { %v3605_v6 = vmul.f32 -1.442695, %v3240_v5 }
 0x955   : > { %v3788_v7 = vpop.eup %3787 }
 0x956   : > { %v3273_v8 = vadd.f32 1.0, %v3788_v7  ;;  %3791 = vpow2.f32 %v3605_v6 }
 0x957   : > { %v3790_v9 = vpop.eup %3789 }
 0x958   : > { %3793 = vrcp.f32 %v3273_v8  ;;  %v3275_v10 = vmul.f32 %v3790_v9, %v3271_v3  ;;  %vm3280_vm0 = vweird.f32 %v3790_v9  ;;  %v3315_v29 = vand.u32 2147483648, %v3273_v8 }
 0x959   : > { %vm3281_vm12 = vmor %vm3279_vm9, %vm3280_vm0  ;;  %v3313_v31 = vand.u32 2147483647, %v3273_v8  ;;  %vm3309_vm1 = vweird.f32 %v3273_v8  ;;  %vm3359_vm0 = vcmask 523648   ;;  %vm3364_vm9 = vcmask 654848  }
 0x95a   : > { %v3276_v11 = vsub.f32 1.0, %v3275_v10  ;;  %v3316_v34 = vor.u32 1.1754944e-38, %v3315_v29 }
 0x95b   : > { %vm3314_vm3 = vcmp.eq.f32.partialorder %v3313_v31, 8.507059e+37 }
 0x95c   : > { %v3792_v15 = vpop.eup %3791  ;;  %v3277_v16 = vmul.f32 %v3790_v9, %v3276_v11 }
 0x95d   : > { %v3272_v18 = vadd.f32 1.0, %v3792_v15 }
 0x95e   : > { %v3794_v19 = vpop.eup %3793  ;;  %v3278_v20 = vadd.f32 %v3790_v9, %v3277_v16 }
 0x95f   : > { %3795 = vrcp.f32 %v3272_v18  ;;  %v3305_v22 = vmul.f32 %v3794_v19, %v3273_v8  ;;  %vm3310_vm15 = vweird.f32 %v3794_v19  ;;  %v3300_v44 = vand.u32 2147483648, %v3272_v18 }
 0x960   : > { %v3282_v24 = vsel %vm3281_vm12, %v3790_v9, %v3278_v20  ;;  %vm3311_vm2 = vmor %vm3309_vm1, %vm3310_vm15  ;;  %v3298_v46 = vand.u32 2147483647, %v3272_v18  ;;  %vm3294_vm7 = vweird.f32 %v3272_v18  ;;  %vm3380_vm12 = vcmask 1048448  }
 0x961   : > { %v3287_v25 = vsel %vm3284_vm13, %v3286_v21, %v3282_v24  ;;  %v3306_v27 = vsub.f32 1.0, %v3305_v22  ;;  %v3301_v48 = vor.u32 1.1754944e-38, %v3300_v44 }
 0x962   : > { %v3319_v28 = vperm.slane %v3287_v25, 0  ;;  %vm3299_vm10 = vcmp.eq.f32.partialorder %v3298_v46, 8.507059e+37 }
 0x963   : > { %v3307_v30 = vmul.f32 %v3794_v19, %v3306_v27 }
 0x964   : > { %3325 = vrot.lane.b32.xlu2 %v3319_v28, %s3831_s2 }
 0x965   : > { %v3796_v32 = vpop.eup %3795  ;;  %v3308_v33 = vadd.f32 %v3794_v19, %v3307_v30 }
 0x966   : > { %v3290_v36 = vmul.f32 %v3796_v32, %v3272_v18  ;;  %vm3295_vm6 = vweird.f32 %v3796_v32 }
 0x967   : > { %v3312_v37 = vsel %vm3311_vm2, %v3794_v19, %v3308_v33  ;;  %vm3296_vm8 = vmor %vm3294_vm7, %vm3295_vm6 }
 0x968   : > { %v3317_v41 = vsel %vm3314_vm3, %v3316_v34, %v3312_v37  ;;  %v3291_v42 = vsub.f32 1.0, %v3290_v36 }
 0x969   : > { %v3321_v43 = vperm.slane %v3317_v41, 0 }
 0x96a   : > { %v3292_v45 = vmul.f32 %v3796_v32, %v3291_v42 }
 0x96c   : > { %3329 = vrot.lane.b32.xlu2 %v3321_v43, %s3831_s2  ;;  %v3293_v47 = vadd.f32 %v3796_v32, %v3292_v45 }
 0x96e   : > { %v3297_v49 = vsel %vm3296_vm8, %v3796_v32, %v3293_v47 }
 0x96f   : > { %v3302_v12 = vsel %vm3299_vm10, %v3301_v48, %v3297_v49 }
 0x970   : > { %v3320_v50 = vperm.slane %v3302_v12, 0 }
 0x972   : > { %3327 = vrot.lane.b32.xlu1 %v3320_v50, %s3831_s2  ;;  %s3835_s2 = smov 72  }
 0x9be   : > { %v3326_v51 = vpop.permute.xlu2 %3325 }
 0x9bf   : > { %v3336_v52 = vmul.f32 %v3326_v51, %v4331_v38 }
 0x9c1   : > { %v3339_v62 = vadd.f32 %v3336_v52, %v3023_v53 }
 0x9c3   : > { %3347 = vrot.lane.b32.xlu2 %v3339_v62, %s3832_s29  ;;  %3343 = vrot.lane.b32.xlu1 %v3339_v62, %s3830_s1  ;;  %s3836_s1 = smov 74  }
 0x9c6   : > { %v3330_v13 = vpop.permute.xlu2 %3329 }
 0x9cb   : > { %3356 = vrot.lane.b32.xlu2 %v3339_v62, %s3833_s26  ;;  %3361 = vrot.lane.b32.xlu1 %v3339_v62, %s3834_s21 }
 0x9e4   : > { %v3328_v26 = vpop.permute.xlu1 %3327 }
 0x9e5   : > { %v3331_v54 = vsel %vm1563_vm14, %v3326_v51, %v3328_v26  ;;  %v3332_v35 = vsel %vm1563_vm14, %v3328_v26, %v3330_v13  ;;  %vm3354_vm14 = vcmask 392448  }
 0x9e6   : > { %v3337_v23 = vmul.f32 %v3331_v54, %v4333_v39  ;;  %v3338_v38 = vmul.f32 %v3332_v35, %v4335_v40 }
 0x9e8   : > { %v3340_v57 = vadd.f32 %v3337_v23, %v3024_v55  ;;  %v3341_v58 = vadd.f32 %v3338_v38, %v3025_v56 }
 0x9ea   : > { %3386 = vrot.lane.b32.xlu2 %v3340_v57, %s3835_s2  ;;  %3382 = vrot.lane.b32.xlu1 %v3340_v57, %s3836_s1 }
 0x9eb   : > { %3401 = vrot.lane.b32.xlu0 %v3341_v58, %s3819_s25 }
 0x9f2   : > { %3399 = vrot.lane.b32.xlu2 %v3340_v57, %s3819_s25  ;;  %3390 = vrot.lane.b32.xlu1 %v3340_v57, %s3837_s3 }
 0x9f3   : > { %3407 = vrot.lane.b32.xlu0 %v3341_v58, %s3816_s23 }
 0x9fa   : > { %3367 = vrot.lane.b32.xlu2 %v3340_v57, %s3838_s22  ;;  %3394 = vrot.lane.b32.xlu1 %v3340_v57, %s3822_s12 }
 0x9fb   : > { %3351 = vrot.lane.b32.xlu0 %v3339_v62, %s3839_s24 }
 0xa02   : > { %3372 = vrot.lane.b32.xlu1 %v3340_v57, %s3840_s16  ;;  %3411 = vrot.lane.b32.xlu2 %v3341_v58, %s4430_s17 }
 0xa03   : > { %3377 = vrot.lane.b32.xlu0 %v3340_v57, %s3841_s18 }
 0xa0a   : > { %3415 = vrot.lane.b32.xlu1 %v3341_v58, %s4431_s4 }
 0xa1d   : > { %v3348_v40 = vpop.permute.xlu2 %3347 }
 0xa25   : > { %v3357_v59 = vpop.permute.xlu2 %3356 }
 0xa35   : > { %v3344_v39 = vpop.permute.xlu1 %3343 }
 0xa36   : > { %3346 = vst.msk [vmem:[%s4372_s0] sm:$0xff] %vm781_vm5, %v3344_v39 }
 0xa37   : > { %3350 = vst.msk [vmem:[%s4372_s0] sm:$0xff] %vm824_vm4, %v3348_v40 }
 0xa3d   : > { %v3362_v60 = vpop.permute.xlu1 %3361 }
 0xa44   : > { %v3387_v61 = vpop.permute.xlu2 %3386 }
 0xa4c   : > { %v3400_v1 = vpop.permute.xlu2 %3399 }
 0xa54   : > { %v3368_v4 = vpop.permute.xlu2 %3367 }
 0xa5c   : > { %v3383_v63 = vpop.permute.xlu1 %3382  ;;  %v3412_v8 = vpop.permute.xlu2 %3411 }
 0xa5d   : > { %3385 = vst.msk [vmem:[%s4372_s0 + $0x8] sm:$0xff] %vm781_vm5, %v3383_v63  ;;  %v3402_v0 = vpop.permute.xlu0 %3401  ;;  %vm3375_vm5 = vcmask 917248  }
 0xa5e   : > { %3389 = vst.msk [vmem:[%s4372_s0 + $0x8] sm:$0xff] %vm824_vm4, %v3387_v61  ;;  %v3404_v6 = vsel %vm3403_vm11, %v3400_v1, %v3402_v0  ;;  %vm3370_vm4 = vcmask 786048  }
 0xa64   : > { %v3391_v2 = vpop.permute.xlu1 %3390 }
 0xa65   : > { %3393 = vst.msk [vmem:[%s4372_s0 + $0x8] sm:$0xff] %vm3354_vm14, %v3391_v2  ;;  %v3408_v3 = vpop.permute.xlu0 %3407 }
 0xa6c   : > { %v3395_v5 = vpop.permute.xlu1 %3394 }
 0xa6d   : > { %3397 = vst.msk [vmem:[%s4372_s0 + $0x8] sm:$0xff] %vm3359_vm0, %v3395_v5  ;;  %v3352_v7 = vpop.permute.xlu0 %3351 }
 0xa6e   : > { %3406 = vst.msk [vmem:[%s4372_s0 + $0x8] sm:$0xff] %vm3364_vm9, %v3404_v6 }
 0xa6f   : > { %3355 = vst.msk [vmem:[%s4372_s0] sm:$0xff] %vm3354_vm14, %v3352_v7 }
 0xa70   : > { %3360 = vst.msk [vmem:[%s4372_s0] sm:$0xff] %vm3359_vm0, %v3357_v59 }
 0xa71   : > { %3365 = vst.msk [vmem:[%s4372_s0] sm:$0xff] %vm3364_vm9, %v3362_v60 }
 0xa72   : > { %3371 = vst.msk [vmem:[%s4372_s0] sm:$0xff] %vm3370_vm4, %v3368_v4 }
 0xa73   : > { %3410 = vst.msk [vmem:[%s4372_s0 + $0x8] sm:$0xff] %vm3370_vm4, %v3408_v3 }
 0xa74   : > { %v3373_v9 = vpop.permute.xlu1 %3372  ;;  %3414 = vst.msk [vmem:[%s4372_s0 + $0x8] sm:$0xff] %vm3375_vm5, %v3412_v8 }
 0xa75   : > { %3376 = vst.msk [vmem:[%s4372_s0] sm:$0xff] %vm3375_vm5, %v3373_v9  ;;  %v3378_v10 = vpop.permute.xlu0 %3377 }
 0xa76   : > { %3381 = vst.msk [vmem:[%s4372_s0] sm:$0xff] %vm3380_vm12, %v3378_v10 }
 0xa7c   : > { %v3416_v11 = vpop.permute.xlu1 %3415 }
 0xa7d   : > { %3418 = vst.msk [vmem:[%s4372_s0 + $0x8] sm:$0xff] %vm3380_vm12, %v3416_v11 }
 0xa7e PF: > { %s38_s27 = sadd.s32 1, %s3803_s27  }
 0xa7f   : > { %p35_p4 = scmp.ge.s32.totalorder %s38_s27, 4  }
 0xa81   :  { %37 = sbr.rel (!%p35_p4) target bundleno = 6 (0x6), region = 136 }

</bundles_post_ra>
